<compile_context>
chip_gen: v7x
topology: tpu7x:2x2x1
jax: 0.10.0
libtpu: 0.0.40
codegen_flags: <defaults>
</compile_context>

<pallas_src>
import functools
import math

import jax
import jax.numpy as jnp
from jax.experimental import pallas as pl
from jax.experimental.pallas import tpu as pltpu


def _softplus(x):
    # softplus(x) = -log(sigmoid(-x)); numerically stable form.
    return jnp.maximum(x, 0.0) + jnp.log(1.0 + jnp.exp(-jnp.abs(x)))


def _vgae_loss_kernel(anc_ref, pos_ref, neg_ref, w1t_ref, b1_ref, w2_ref, b2_ref,
                      mean_ref, std_ref, o_ref, *,
                      n_valid, tile_b, tiles_per_core, inv_b, beta_over_n):
    """Accumulates (sum_b loss_rec_b)/B + beta*(sum_n kl_n)/N into per-core blocks."""
    c = pl.program_id(0)      # TensorCore split (parallel axis)
    i = pl.program_id(1)      # batch-tile step within this core (arbitrary axis)

    @pl.when(i == 0)
    def _init():
        o_ref[...] = jnp.zeros_like(o_ref)

    # KL term: lane-dense resident blocks, computed once (core 0, step 0).
    # Padded entries (mean=0, std=1) contribute exactly 0, so no mask is needed.
    @pl.when(jnp.logical_and(i == 0, c == 0))
    def _kl():
        mu = mean_ref[...].astype(jnp.float32)
        sd = std_ref[...].astype(jnp.float32)
        kl_sum = -0.5 * jnp.sum(1.0 + 2.0 * jnp.log(sd) - mu * mu - sd * sd)
        o_ref[...] += beta_over_n * kl_sum

    anc = anc_ref[...].astype(jnp.float32)      # (TB, H), streamed as bf16
    pos = pos_ref[...].astype(jnp.float32)
    neg = neg_ref[...].astype(jnp.float32)
    w1t = w1t_ref[...]                          # (H, H), already (in, out)
    b1 = b1_ref[...]                            # (1, H)
    w2 = w2_ref[...]                            # (1, H) row of Linear2
    b2 = b2_ref[...]                            # (1, 1)

    # One fused matmul for both branches: (2*TB, H) @ (H, H).
    z = jnp.concatenate([anc * pos, anc * neg], axis=0)
    h = jnp.maximum(z, 0.0)                                          # ReLU
    h = jnp.dot(h, w1t, preferred_element_type=jnp.float32) + b1     # Linear1 (MXU)
    h = jnp.maximum(h, 0.0)                                          # ReLU
    # Linear2 (hidden -> 1): elementwise mul + lane reduce, no transpose.
    s = jnp.sum(h * w2, axis=1, keepdims=True) + b2                  # (2*TB, 1)
    s_pos = s[:tile_b]
    s_neg = s[tile_b:]

    # BCE(sigmoid(s), 1) = softplus(-s);  BCE(sigmoid(s), 0) = softplus(s)
    loss_row = _softplus(-s_pos) + _softplus(s_neg)                  # (TB, 1)

    # Mask rows padded up to the batch tile (cheap VALU filler; kernel is DMA-bound).
    row = (c * tiles_per_core + i) * tile_b + jax.lax.broadcasted_iota(
        jnp.int32, (tile_b, 1), 0)
    loss_row = jnp.where(row < n_valid, loss_row, 0.0)

    o_ref[...] += inv_b * jnp.sum(loss_row)


def _round_up(v, m):
    return -(-v // m) * m


def vgae_decoder_forward(x, x_mean, x_std, users, items, neg_items, params, *,
                         n_user, n_item, beta=0.1, tile_b=2048):
    """Returns the scalar loss of vgae_decoder.forward."""
    w1, b1, w2, b2 = params            # PyTorch shapes: (H,H), (H,), (1,H), (1,)
    H = x.shape[1]
    N = x_mean.shape[0]
    B = int(users.shape[0])

    # ---- gather glue (plain JAX) on the bf16-cast embedding table ----
    # TODO(synk): the data-dependent row gather stays in XLA; moving it in-kernel
    #             (VMEM-resident table + scalar-prefetched indices) would cut one
    #             more HBM round-trip but needs a Mosaic dynamic-gather path.
    x_bf = x.astype(jnp.bfloat16)
    x_user = x_bf[:n_user]
    x_item = x_bf[n_user:n_user + n_item]

    # ---- batch tiling: pad the *index* vectors, never the (B,H) activations ----
    num_cores = 2                                 # v7x megacore split; harmless elsewhere
    rows_per_core = -(-B // num_cores)
    # keep streamed inputs (3 tiles x 2 buffers, bf16) under ~8 MiB of scoped VMEM
    tb_cap = max(8, (8 * 1024 * 1024 // (3 * 2 * H * 2)) // 8 * 8)
    tb = max(8, min(tile_b, tb_cap, _round_up(rows_per_core, 8)))
    tiles_per_core = -(-rows_per_core // tb)
    Bp = num_cores * tiles_per_core * tb

    def pad_idx(idx):
        idx = jnp.asarray(idx, jnp.int32)
        if Bp == B:
            return idx
        return jnp.concatenate([idx, jnp.zeros((Bp - B,), jnp.int32)])

    anc = jnp.take(x_user, pad_idx(users), axis=0)       # (Bp, H) bf16, tile-aligned
    pos = jnp.take(x_item, pad_idx(items), axis=0)
    neg = jnp.take(x_item, pad_idx(neg_items), axis=0)

    # ---- KL inputs: bf16, lane-dense (N*H/128, 128) resident blocks ----
    lane = 128
    row_mult = lane // math.gcd(H, lane)
    Np = _round_up(N, row_mult)
    mean_p = x_mean.astype(jnp.bfloat16)
    std_p = x_std.astype(jnp.bfloat16)
    if Np != N:
        mean_p = jnp.pad(mean_p, ((0, Np - N), (0, 0)))                      # mean=0
        std_p = jnp.pad(std_p, ((0, Np - N), (0, 0)), constant_values=1.0)   # std=1
    kl_rows = (Np * H) // lane
    mean_r = mean_p.reshape(kl_rows, lane)     # row-major reshape: free
    std_r = std_p.reshape(kl_rows, lane)

    # ---- decoder weights: pre-transposed / reshaped once in the wrapper ----
    w1t = jnp.asarray(w1, jnp.float32).T                 # (in, out)
    b1_2d = jnp.asarray(b1, jnp.float32).reshape(1, H)
    w2_2d = jnp.asarray(w2, jnp.float32).reshape(1, H)
    b2_2d = jnp.asarray(b2, jnp.float32).reshape(1, 1)

    kernel = functools.partial(
        _vgae_loss_kernel, n_valid=B, tile_b=tb, tiles_per_core=tiles_per_core,
        inv_b=1.0 / B, beta_over_n=float(beta) / N)

    batch_map = lambda c, i: (c * tiles_per_core + i, 0)
    const_map = lambda c, i: (0, 0)

    out = pl.pallas_call(
        kernel,
        out_shape=jax.ShapeDtypeStruct((num_cores * 8, 128), jnp.float32),
        grid_spec=pltpu.PrefetchScalarGridSpec(
            num_scalar_prefetch=0,
            grid=(num_cores, tiles_per_core),
            in_specs=[
                pl.BlockSpec((tb, H), batch_map),          # anc tile (bf16 stream)
                pl.BlockSpec((tb, H), batch_map),          # pos tile
                pl.BlockSpec((tb, H), batch_map),          # neg tile
                pl.BlockSpec((H, H), const_map),           # w1t (resident)
                pl.BlockSpec((1, H), const_map),           # b1
                pl.BlockSpec((1, H), const_map),           # w2 row
                pl.BlockSpec((1, 1), const_map),           # b2
                pl.BlockSpec((kl_rows, lane), const_map),  # mean (resident, lane-dense)
                pl.BlockSpec((kl_rows, lane), const_map),  # std  (resident, lane-dense)
            ],
            # one (8,128) partial-accumulator block per TensorCore (no cross-core race)
            out_specs=pl.BlockSpec((8, 128), lambda c, i: (c, 0)),
        ),
        compiler_params=pltpu.CompilerParams(
            dimension_semantics=("parallel", "arbitrary"),
            vmem_limit_bytes=32 * 1024 * 1024),
    )(anc, pos, neg, w1t, b1_2d, w2_2d, b2_2d, mean_r, std_r)

    # every element of a core's block holds that core's partial; sum one per core.
    return jnp.sum(out[::8, 0])


if __name__ == "__main__":
    key = jax.random.PRNGKey(0)
    ks = jax.random.split(key, 10)

    hidden = 32                 # args.latdim
    n_user, n_item = 90, 160
    N = n_user + n_item         # 250 nodes
    B = 500                     # training-batch edges (exercises index padding + mask)

    x = jax.random.normal(ks[0], (N, hidden), dtype=jnp.float32)
    x_mean = jax.random.normal(ks[1], (N, hidden), dtype=jnp.float32)
    x_std = jax.random.uniform(ks[2], (N, hidden), minval=0.5, maxval=1.5,
                               dtype=jnp.float32)
    users = jax.random.randint(ks[3], (B,), 0, n_user)
    items = jax.random.randint(ks[4], (B,), 0, n_item)
    neg_items = jax.random.randint(ks[5], (B,), 0, n_item)

    # PyTorch-style Linear init (uniform, bound = 1/sqrt(fan_in))
    bound = 1.0 / (hidden ** 0.5)
    w1 = jax.random.uniform(ks[6], (hidden, hidden), minval=-bound, maxval=bound,
                            dtype=jnp.float32)
    b1 = jax.random.uniform(ks[7], (hidden,), minval=-bound, maxval=bound,
                            dtype=jnp.float32)
    w2 = jax.random.uniform(ks[8], (1, hidden), minval=-bound, maxval=bound,
                            dtype=jnp.float32)
    b2 = jax.random.uniform(ks[9], (1,), minval=-bound, maxval=bound,
                            dtype=jnp.float32)

    loss = vgae_decoder_forward(x, x_mean, x_std, users, items, neg_items,
                                (w1, b1, w2, b2), n_user=n_user, n_item=n_item)
    loss = jax.block_until_ready(loss)

    # ---------------- pure-JAX references ----------------
    x_user_f = x[:n_user]
    x_item_f = x[n_user:n_user + n_item]

    def dec(z, prec):
        h = jnp.maximum(z, 0.0)
        h = jnp.dot(h, w1.T, precision=prec) + b1
        h = jnp.maximum(h, 0.0)
        return jnp.dot(h, w2.T, precision=prec) + b2     # (B, 1)

    def softplus(v):
        return jnp.maximum(v, 0.0) + jnp.log(1.0 + jnp.exp(-jnp.abs(v)))

    # (a) same bf16-rounded inputs the kernel streams, f32 math -> tight tolerance
    bf = lambda a: a.astype(jnp.bfloat16).astype(jnp.float32)
    anc_b, pos_b, neg_b = bf(x_user_f[users]), bf(x_item_f[items]), bf(x_item_f[neg_items])
    sp = dec(anc_b * pos_b, jax.lax.Precision.HIGHEST)
    sn = dec(anc_b * neg_b, jax.lax.Precision.HIGHEST)
    loss_rec_b = softplus(-sp) + softplus(sn)
    kl_b = -0.5 * jnp.sum(1.0 + 2.0 * jnp.log(bf(x_std)) - bf(x_mean) ** 2
                          - bf(x_std) ** 2, axis=1)
    ref_bf16 = (loss_rec_b + 0.1 * kl_b.mean()).mean()

    # (b) pure f32 PyTorch-literal reference (sanity check on bf16 streaming error)
    anc_f, pos_f, neg_f = x_user_f[users], x_item_f[items], x_item_f[neg_items]
    p_pos = jax.nn.sigmoid(dec(anc_f * pos_f, jax.lax.Precision.HIGHEST))
    p_neg = jax.nn.sigmoid(dec(anc_f * neg_f, jax.lax.Precision.HIGHEST))
    loss_rec = -jnp.log(p_pos) - jnp.log(1.0 - p_neg)
    kl = -0.5 * jnp.sum(1.0 + 2.0 * jnp.log(x_std) - x_mean ** 2 - x_std ** 2, axis=1)
    ref_f32 = (loss_rec + 0.1 * kl.mean()).mean()

    assert loss.shape == ()
    assert jnp.allclose(loss, ref_bf16, atol=2e-3, rtol=2e-3), (loss, ref_bf16)
    assert jnp.allclose(loss, ref_f32, atol=3e-2, rtol=3e-2), (loss, ref_f32)

    print("KERNEL_OK")
</pallas_src>

<mosaic_0001>
module attributes {stable_mosaic.version = 11 : i64} {
  func.func @_vgae_loss_kernel(%arg0: i32, %arg1: i32, %arg2: memref<256x32xbf16, #tpu.memory_space<vmem>>, %arg3: memref<256x32xbf16, #tpu.memory_space<vmem>>, %arg4: memref<256x32xbf16, #tpu.memory_space<vmem>>, %arg5: memref<32x32xf32, #tpu.memory_space<vmem>>, %arg6: memref<1x32xf32, #tpu.memory_space<vmem>>, %arg7: memref<1x32xf32, #tpu.memory_space<vmem>>, %arg8: memref<1x1xf32, #tpu.memory_space<vmem>>, %arg9: memref<63x128xbf16, #tpu.memory_space<vmem>>, %arg10: memref<63x128xbf16, #tpu.memory_space<vmem>>, %arg11: memref<8x128xf32, #tpu.memory_space<vmem>>) attributes {dimension_semantics = [#tpu.dimension_semantics<parallel>, #tpu.dimension_semantics<arbitrary>], iteration_bounds = array<i64: 2, 1>, scalar_prefetch = 0 : i64, scratch_operands = 0 : i64, tpu.core_type = #tpu.core_type<tc>, window_params = [{transform_indices = @transform_0, window_bounds = array<i64: 256, 32>}, {transform_indices = @transform_1, window_bounds = array<i64: 256, 32>}, {transform_indices = @transform_2, window_bounds = array<i64: 256, 32>}, {pipeline_mode = #tpu.pipeline_mode<synchronous>, transform_indices = @transform_3, window_bounds = array<i64: 32, 32>}, {pipeline_mode = #tpu.pipeline_mode<synchronous>, transform_indices = @transform_4, window_bounds = array<i64: 1, 32>}, {pipeline_mode = #tpu.pipeline_mode<synchronous>, transform_indices = @transform_5, window_bounds = array<i64: 1, 32>}, {pipeline_mode = #tpu.pipeline_mode<synchronous>, transform_indices = @transform_6, window_bounds = array<i64: 1, 1>}, {pipeline_mode = #tpu.pipeline_mode<synchronous>, transform_indices = @transform_7, window_bounds = array<i64: 63, 128>}, {pipeline_mode = #tpu.pipeline_mode<synchronous>, transform_indices = @transform_8, window_bounds = array<i64: 63, 128>}, {transform_indices = @transform_9, window_bounds = array<i64: 8, 128>}]} {
    %c0_i32 = arith.constant 0 : i32
    %0 = arith.cmpi eq, %arg1, %c0_i32 : i32
    %1 = arith.extui %0 : i1 to i32
    %c0_i32_0 = arith.constant 0 : i32
    %2 = arith.cmpi ne, %1, %c0_i32_0 : i32
    scf.if %2 {
      %cst_34 = arith.constant 0.000000e+00 : f32
      %78 = vector.broadcast %cst_34 : f32 to vector<8x128xf32>
      %c0_35 = arith.constant 0 : index
      %c0_36 = arith.constant 0 : index
      %79 = vector.load %arg11[%c0_35, %c0_36] : memref<8x128xf32, #tpu.memory_space<vmem>>, vector<8x128xf32>
      tpu.vector_store %arg11[%c0_35, %c0_36], %78 {strides = array<i32>} : memref<8x128xf32, #tpu.memory_space<vmem>>, vector<8x128xf32>,
    } else {
    }
    %c0_i32_1 = arith.constant 0 : i32
    %3 = arith.cmpi eq, %arg1, %c0_i32_1 : i32
    %c0_i32_2 = arith.constant 0 : i32
    %4 = arith.cmpi eq, %arg0, %c0_i32_2 : i32
    %5 = arith.andi %3, %4 : i1
    %6 = arith.extui %5 : i1 to i32
    %c0_i32_3 = arith.constant 0 : i32
    %7 = arith.cmpi ne, %6, %c0_i32_3 : i32
    scf.if %7 {
      %c0_34 = arith.constant 0 : index
      %c0_35 = arith.constant 0 : index
      %78 = vector.load %arg9[%c0_34, %c0_35] : memref<63x128xbf16, #tpu.memory_space<vmem>>, vector<63x128xbf16>
      %79 = arith.extf %78 : vector<63x128xbf16> to vector<63x128xf32>
      %c0_36 = arith.constant 0 : index
      %c0_37 = arith.constant 0 : index
      %80 = vector.load %arg10[%c0_36, %c0_37] : memref<63x128xbf16, #tpu.memory_space<vmem>>, vector<63x128xbf16>
      %81 = arith.extf %80 : vector<63x128xbf16> to vector<63x128xf32>
      %82 = math.log %81 : vector<63x128xf32>
      %cst_38 = arith.constant 2.000000e+00 : f32
      %83 = vector.broadcast %cst_38 : f32 to vector<63x128xf32>
      %84 = arith.mulf %83, %82 : vector<63x128xf32>
      %cst_39 = arith.constant 1.000000e+00 : f32
      %85 = vector.broadcast %cst_39 : f32 to vector<63x128xf32>
      %86 = arith.addf %85, %84 : vector<63x128xf32>
      %87 = arith.mulf %79, %79 : vector<63x128xf32>
      %88 = arith.subf %86, %87 : vector<63x128xf32>
      %89 = arith.mulf %81, %81 : vector<63x128xf32>
      %90 = arith.subf %88, %89 : vector<63x128xf32>
      %91 = vector.shape_cast %90 : vector<63x128xf32> to vector<1x63x128xf32>
      %cst_40 = arith.constant dense<0.000000e+00> : vector<1xf32>
      %92 = vector.multi_reduction <add>, %91, %cst_40 [1, 2] : vector<1x63x128xf32> to vector<1xf32>
      %93 = vector.shape_cast %92 : vector<1xf32> to vector<1x1x1xf32>
      %94 = vector.extract %93[0, 0, 0] : f32 from vector<1x1x1xf32>
      %cst_41 = arith.constant -5.000000e-01 : f32
      %95 = arith.mulf %cst_41, %94 : f32
      %c0_42 = arith.constant 0 : index
      %c0_43 = arith.constant 0 : index
      %96 = vector.load %arg11[%c0_42, %c0_43] : memref<8x128xf32, #tpu.memory_space<vmem>>, vector<8x128xf32>
      %cst_44 = arith.constant 4.000000e-04 : f32
      %97 = arith.mulf %cst_44, %95 : f32
      %98 = vector.broadcast %97 : f32 to vector<8x128xf32>
      %99 = arith.addf %96, %98 : vector<8x128xf32>
      %c0_45 = arith.constant 0 : index
      %c0_46 = arith.constant 0 : index
      %100 = vector.load %arg11[%c0_45, %c0_46] : memref<8x128xf32, #tpu.memory_space<vmem>>, vector<8x128xf32>
      tpu.vector_store %arg11[%c0_45, %c0_46], %99 {strides = array<i32>} : memref<8x128xf32, #tpu.memory_space<vmem>>, vector<8x128xf32>,
    } else {
    }
    %c0 = arith.constant 0 : index
    %c0_4 = arith.constant 0 : index
    %8 = vector.load %arg2[%c0, %c0_4] : memref<256x32xbf16, #tpu.memory_space<vmem>>, vector<256x32xbf16>
    %9 = arith.extf %8 : vector<256x32xbf16> to vector<256x32xf32>
    %c0_5 = arith.constant 0 : index
    %c0_6 = arith.constant 0 : index
    %10 = vector.load %arg3[%c0_5, %c0_6] : memref<256x32xbf16, #tpu.memory_space<vmem>>, vector<256x32xbf16>
    %11 = arith.extf %10 : vector<256x32xbf16> to vector<256x32xf32>
    %c0_7 = arith.constant 0 : index
    %c0_8 = arith.constant 0 : index
    %12 = vector.load %arg4[%c0_7, %c0_8] : memref<256x32xbf16, #tpu.memory_space<vmem>>, vector<256x32xbf16>
    %13 = arith.extf %12 : vector<256x32xbf16> to vector<256x32xf32>
    %c0_9 = arith.constant 0 : index
    %c0_10 = arith.constant 0 : index
    %14 = vector.load %arg5[%c0_9, %c0_10] : memref<32x32xf32, #tpu.memory_space<vmem>>, vector<32x32xf32>
    %c0_11 = arith.constant 0 : index
    %c0_12 = arith.constant 0 : index
    %15 = vector.load %arg6[%c0_11, %c0_12] : memref<1x32xf32, #tpu.memory_space<vmem>>, vector<1x32xf32>
    %c0_13 = arith.constant 0 : index
    %c0_14 = arith.constant 0 : index
    %16 = vector.load %arg7[%c0_13, %c0_14] : memref<1x32xf32, #tpu.memory_space<vmem>>, vector<1x32xf32>
    %c0_15 = arith.constant 0 : index
    %c0_16 = arith.constant 0 : index
    %17 = vector.load %arg8[%c0_15, %c0_16] : memref<1x1xf32, #tpu.memory_space<vmem>>, vector<1x1xf32>
    %18 = arith.mulf %9, %11 : vector<256x32xf32>
    %19 = arith.mulf %9, %13 : vector<256x32xf32>
    %20 = tpu.concatenate %18, %19 in 0 : vector<256x32xf32>, vector<256x32xf32> -> vector<512x32xf32>
    %cst = arith.constant 0.000000e+00 : f32
    %21 = vector.broadcast %cst : f32 to vector<512x32xf32>
    %22 = arith.maximumf %20, %21 : vector<512x32xf32>
    %cst_17 = arith.constant dense<0.000000e+00> : vector<512x32xf32>
    %23 = tpu.matmul %22, %14, %cst_17 {dimension_numbers = #tpu.dot_dimension_numbers<[1], [0], [0], [1], [0, 0, 1, 1], [], []>} : vector<512x32xf32>, vector<32x32xf32>, vector<512x32xf32> -> vector<512x32xf32>
    %24 = vector.broadcast %15 : vector<1x32xf32> to vector<512x32xf32>
    %25 = arith.addf %23, %24 : vector<512x32xf32>
    %cst_18 = arith.constant 0.000000e+00 : f32
    %26 = vector.broadcast %cst_18 : f32 to vector<512x32xf32>
    %27 = arith.maximumf %25, %26 : vector<512x32xf32>
    %28 = vector.broadcast %16 : vector<1x32xf32> to vector<512x32xf32>
    %29 = arith.mulf %27, %28 : vector<512x32xf32>
    %cst_19 = arith.constant dense<0.000000e+00> : vector<512xf32>
    %30 = vector.multi_reduction <add>, %29, %cst_19 [1] : vector<512x32xf32> to vector<512xf32>
    %31 = vector.shape_cast %30 : vector<512xf32> to vector<512x1xf32>
    %32 = vector.broadcast %17 : vector<1x1xf32> to vector<512x1xf32>
    %33 = arith.addf %31, %32 : vector<512x1xf32>
    %34 = vector.extract_strided_slice %33 {offsets = [0, 0], sizes = [256, 1], strides = [1, 1]} : vector<512x1xf32> to vector<256x1xf32>
    %35 = vector.extract_strided_slice %33 {offsets = [256, 0], sizes = [256, 1], strides = [1, 1]} : vector<512x1xf32> to vector<256x1xf32>
    %cst_20 = arith.constant 0.000000e+00 : f32
    %36 = vector.broadcast %cst_20 : f32 to vector<256x1xf32>
    %37 = arith.subf %36, %34 : vector<256x1xf32>
    %cst_21 = arith.constant 0.000000e+00 : f32
    %38 = vector.broadcast %cst_21 : f32 to vector<256x1xf32>
    %39 = arith.maximumf %37, %38 : vector<256x1xf32>
    %40 = math.absf %37 : vector<256x1xf32>
    %cst_22 = arith.constant 0.000000e+00 : f32
    %41 = vector.broadcast %cst_22 : f32 to vector<256x1xf32>
    %42 = arith.subf %41, %40 : vector<256x1xf32>
    %43 = math.exp %42 : vector<256x1xf32>
    %cst_23 = arith.constant 1.000000e+00 : f32
    %44 = vector.broadcast %cst_23 : f32 to vector<256x1xf32>
    %45 = arith.addf %44, %43 : vector<256x1xf32>
    %46 = math.log %45 : vector<256x1xf32>
    %47 = arith.addf %39, %46 : vector<256x1xf32>
    %cst_24 = arith.constant 0.000000e+00 : f32
    %48 = vector.broadcast %cst_24 : f32 to vector<256x1xf32>
    %49 = arith.maximumf %35, %48 : vector<256x1xf32>
    %50 = math.absf %35 : vector<256x1xf32>
    %cst_25 = arith.constant 0.000000e+00 : f32
    %51 = vector.broadcast %cst_25 : f32 to vector<256x1xf32>
    %52 = arith.subf %51, %50 : vector<256x1xf32>
    %53 = math.exp %52 : vector<256x1xf32>
    %cst_26 = arith.constant 1.000000e+00 : f32
    %54 = vector.broadcast %cst_26 : f32 to vector<256x1xf32>
    %55 = arith.addf %54, %53 : vector<256x1xf32>
    %56 = math.log %55 : vector<256x1xf32>
    %57 = arith.addf %49, %56 : vector<256x1xf32>
    %58 = arith.addf %47, %57 : vector<256x1xf32>
    %c1_i32 = arith.constant 1 : i32
    %59 = arith.muli %arg0, %c1_i32 : i32
    %60 = arith.addi %59, %arg1 : i32
    %c256_i32 = arith.constant 256 : i32
    %61 = arith.muli %60, %c256_i32 : i32
    %62 = tpu.iota {dimensions = array<i32: 0>} : vector<256x1xi32>
    %63 = vector.broadcast %61 : i32 to vector<256x1xi32>
    %64 = arith.addi %63, %62 : vector<256x1xi32>
    %c500_i32 = arith.constant 500 : i32
    %65 = vector.broadcast %c500_i32 : i32 to vector<256x1xi32>
    %66 = arith.cmpi slt, %64, %65 : vector<256x1xi32>
    %cst_27 = arith.constant 0.000000e+00 : f32
    %67 = vector.broadcast %cst_27 : f32 to vector<256x1xf32>
    %68 = arith.select %66, %58, %67 : vector<256x1xi1>, vector<256x1xf32>
    %c0_28 = arith.constant 0 : index
    %c0_29 = arith.constant 0 : index
    %69 = vector.load %arg11[%c0_28, %c0_29] : memref<8x128xf32, #tpu.memory_space<vmem>>, vector<8x128xf32>
    %70 = vector.shape_cast %68 : vector<256x1xf32> to vector<1x256x1xf32>
    %cst_30 = arith.constant dense<0.000000e+00> : vector<1xf32>
    %71 = vector.multi_reduction <add>, %70, %cst_30 [1, 2] : vector<1x256x1xf32> to vector<1xf32>
    %72 = vector.shape_cast %71 : vector<1xf32> to vector<1x1x1xf32>
    %73 = vector.extract %72[0, 0, 0] : f32 from vector<1x1x1xf32>
    %cst_31 = arith.constant 2.000000e-03 : f32
    %74 = arith.mulf %cst_31, %73 : f32
    %75 = vector.broadcast %74 : f32 to vector<8x128xf32>
    %76 = arith.addf %69, %75 : vector<8x128xf32>
    %c0_32 = arith.constant 0 : index
    %c0_33 = arith.constant 0 : index
    %77 = vector.load %arg11[%c0_32, %c0_33] : memref<8x128xf32, #tpu.memory_space<vmem>>, vector<8x128xf32>
    tpu.vector_store %arg11[%c0_32, %c0_33], %76 {strides = array<i32>} : memref<8x128xf32, #tpu.memory_space<vmem>>, vector<8x128xf32>,
    return
  }
  func.func @transform_0(%arg0: i32, %arg1: i32) -> (i32, i32) {
    %c1_i32 = arith.constant 1 : i32
    %0 = arith.muli %arg0, %c1_i32 : i32
    %1 = arith.addi %0, %arg1 : i32
    %c0_i32 = arith.constant 0 : i32
    %c0_i32_0 = arith.constant 0 : i32
    return %1, %c0_i32 : i32, i32
  }
  func.func @transform_1(%arg0: i32, %arg1: i32) -> (i32, i32) {
    %c1_i32 = arith.constant 1 : i32
    %0 = arith.muli %arg0, %c1_i32 : i32
    %1 = arith.addi %0, %arg1 : i32
    %c0_i32 = arith.constant 0 : i32
    %c0_i32_0 = arith.constant 0 : i32
    return %1, %c0_i32 : i32, i32
  }
  func.func @transform_2(%arg0: i32, %arg1: i32) -> (i32, i32) {
    %c1_i32 = arith.constant 1 : i32
    %0 = arith.muli %arg0, %c1_i32 : i32
    %1 = arith.addi %0, %arg1 : i32
    %c0_i32 = arith.constant 0 : i32
    %c0_i32_0 = arith.constant 0 : i32
    return %1, %c0_i32 : i32, i32
  }
  func.func @transform_3(%arg0: i32, %arg1: i32) -> (i32, i32) {
    %c0_i32 = arith.constant 0 : i32
    %c0_i32_0 = arith.constant 0 : i32
    %c0_i32_1 = arith.constant 0 : i32
    return %c0_i32, %c0_i32_0 : i32, i32
  }
  func.func @transform_4(%arg0: i32, %arg1: i32) -> (i32, i32) {
    %c0_i32 = arith.constant 0 : i32
    %c0_i32_0 = arith.constant 0 : i32
    %c0_i32_1 = arith.constant 0 : i32
    return %c0_i32, %c0_i32_0 : i32, i32
  }
  func.func @transform_5(%arg0: i32, %arg1: i32) -> (i32, i32) {
    %c0_i32 = arith.constant 0 : i32
    %c0_i32_0 = arith.constant 0 : i32
    %c0_i32_1 = arith.constant 0 : i32
    return %c0_i32, %c0_i32_0 : i32, i32
  }
  func.func @transform_6(%arg0: i32, %arg1: i32) -> (i32, i32) {
    %c0_i32 = arith.constant 0 : i32
    %c0_i32_0 = arith.constant 0 : i32
    %c0_i32_1 = arith.constant 0 : i32
    return %c0_i32, %c0_i32_0 : i32, i32
  }
  func.func @transform_7(%arg0: i32, %arg1: i32) -> (i32, i32) {
    %c0_i32 = arith.constant 0 : i32
    %c0_i32_0 = arith.constant 0 : i32
    %c0_i32_1 = arith.constant 0 : i32
    return %c0_i32, %c0_i32_0 : i32, i32
  }
  func.func @transform_8(%arg0: i32, %arg1: i32) -> (i32, i32) {
    %c0_i32 = arith.constant 0 : i32
    %c0_i32_0 = arith.constant 0 : i32
    %c0_i32_1 = arith.constant 0 : i32
    return %c0_i32, %c0_i32_0 : i32, i32
  }
  func.func @transform_9(%arg0: i32, %arg1: i32) -> (i32, i32) {
    %c0_i32 = arith.constant 0 : i32
    %c0_i32_0 = arith.constant 0 : i32
    return %arg0, %c0_i32 : i32, i32
  }
}

</mosaic_0001>

<bundles_post_ra>
// kernel: tpu_custom_call.1
= control target key start
LH: loop header
LB: loop body
LE: loop exit
PB: predicated region body
PF: predicated region fallthrough
CT: control target
= control target key end

     0   :  { %s5255_s0 = inlined_call_operand.vmem [shape: bf16[512,32], index: 0, kind: input, shape index: {}]   ;;  %s5256_s1 = inlined_call_operand.vmem [shape: bf16[512,32], index: 1, kind: input, shape index: {}]   ;;  %s5257_s2 = inlined_call_operand.vmem [shape: bf16[512,32], index: 2, kind: input, shape index: {}]   ;;  %s5258_s3 = inlined_call_operand.vmem [shape: f32[32,32], index: 3, kind: input, shape index: {}]   ;;  %s5259_s4 = inlined_call_operand.vmem [shape: f32[1,32], index: 4, kind: input, shape index: {}]   ;;  %s5260_s5 = inlined_call_operand.vmem [shape: f32[1,32], index: 5, kind: input, shape index: {}]   ;;  %s5261_s6 = inlined_call_operand.<no memory space> [shape: f32[1,1], index: 6, kind: input, shape index: {}]   ;;  %s5262_s7 = inlined_call_operand.vmem [shape: bf16[63,128], index: 7, kind: input, shape index: {}]   ;;  %s5263_s8 = inlined_call_operand.vmem [shape: bf16[63,128], index: 8, kind: input, shape index: {}]   ;;  %s5264_s9 = inlined_call_operand.hbm [shape: f32[16,128], index: 9, kind: output, shape index: {}]  }
   0x1   :  { %v14_v0 = vstv %s5261_s6 }
   0x2   :  { %15 = vst [vmem:[#allocation2] sm:$0x1] %v14_v0 }
   0x3   :  { %16 = vsyncpa [#allocation4], 0 }
   0x4   :  { %18 = vsyncpa [#allocation4 + $0x1], 0  ;;  %s3817_s11 = smov 0   ;;  %s3819_s12 = smov 0  }
   0x5   :  { %s3821_s13 = smov 0   ;;  %s3823_s14 = smov 0  }
   0x6   :  { %s3825_s15 = smov 0   ;;  %s3827_s16 = smov 0  }
   0x7 LB: > { %5285 = sst [smem:[#allocation6_spill]] %s3756_s15  ;;  %s2804_s6 = sadd.s32 4294967295, %s3760_s16   ;;  %s3760_s16 = sphi %s3827_s16, %s24_s16   ;;  %s3756_s15 = sphi %s3825_s15, %s5320_s15   ;;  %s3752_s14 = sphi %s3823_s14, %s5319_s14   ;;  %s3748_s13 = sphi %s3821_s13, %s5323_s13   ;;  %s3744_s12 = sphi %s3819_s12, %s5322_s12   ;;  %s3740_s11 = sphi %s3817_s11, %s5321_s11  }
   0x8   : > { %s2805_s17 = sadd.s32 4294967294, %s3760_s16   ;;  %s36_s18 = sadd.s32 1, %s3756_s15 }
   0x9   : > { %s253_s19 = sadd.s32 1, %s3748_s13  ;;  %p38_p0 = scmp.ge.s32.totalorder %s36_s18, 2 }
   0xa   : > { %p263_p1 = scmp.ne.s32.totalorder %s3748_s13, %s3744_s12  ;;  %p264_p2 = scmp.eq.s32.totalorder %s2804_s6, 1 }
   0xb   : > { %p269_p3 = scmp.ne.s32.totalorder %s3744_s12, %s3740_s11  ;;  %s5325_s18 = smov (%p38_p0, %s36_s18), 0 }
   0xc   : > { %5286 = sst [smem:[#allocation7_spill]] %s5325_s18  ;;  %p3857_p4 = por %p264_p2, %p263_p1 }
   0xd   : > { %p270_p5 = scmp.eq.s32.totalorder %s2805_s17, 1  ;;  %s250_s21 = ssub.s32 %s3756_s15, %s5325_s18 }
   0xe   : > { %p2808_p6 = scmp.ge.s32.totalorder %s3760_s16, 1  ;;  %p251_p7 = scmp.eq.s32.totalorder %s250_s21, 0 }
   0xf   : > { %p3864_p8 = por %p270_p5, %p269_p3  ;;  %p339_p9 = scmp.lt.s32.totalorder %s3760_s16, 3 }
  0x10   : > { %s3870_s23 = scalar_select %p251_p7, %s3748_s13, %s253_s19  }
  0x11   : > { %p340_p10 = pnand %p2808_p6, %p339_p9 }
  0x12   : > { %5289 = sst [smem:[#allocation8_spill]] %s3870_s23 }
  0x13   : > { %343 = sbr.rel (%p340_p10) target bundleno = 1112 (0x458), region = 56 }
  0x1a   : > { %s5265_s24 = sand.u32 1, %s3744_s12   ;;  %s2810_s25 = sshll.u32 %s3752_s14, 5  ;;  %v3762_v1 = vmov 0.0  }
  0x1b   : > { %s2809_s26 = sshll.u32 %s5265_s24, 3  ;;  %p390_p11 = scmp.lt.s32.totalorder %s2810_s25, 63 }
  0x1c   : > { %p417_p12 = scmp.eq.s32.totalorder %s3752_s14, 0  ;;  %s3877_s27 = scalar_lea.vmem [#allocation3], %s2809_s26 }
  0x1d   : > { %s5327_s25 = smov (!%p390_p11, %s2810_s25), 63  ;;  %416 = vst [vmem:[%s3877_s27] sm:$0xff] %v3762_v1  ;;  %v2907_v2 = vld [vmem:[%s5263_s8] sm:$0xff] (%p417_p12)   ;;  %v3117_v3 = vld [vmem:[%s5263_s8 + $0x8] sm:$0xff] (%p417_p12)   ;;  %v3118_v4 = vld [vmem:[%s5263_s8 + $0x10] sm:$0xff] (%p417_p12)   ;;  %vm524_vm0 = vcmask (%p417_p12), 1046528  }
  0x1e   : > { %s2811_s28 = sshll.u32 %s5327_s25, 2  ;;  %421 = sbr.rel (!%p417_p12) target bundleno = 280 (0x118), region = 64  ;;  %v2908_v5 = vunpack.c.l.bf16 (%p417_p12), %v2907_v2  ;;  %v2909_v6 = vunpack.c.h.bf16 (%p417_p12), %v2907_v2  ;;  %v2912_v7 = vunpack.c.l.bf16 (%p417_p12), %v3117_v3  ;;  %v2913_v8 = vunpack.c.h.bf16 (%p417_p12), %v3117_v3  ;;  %v3119_v9 = vld [vmem:[%s5263_s8 + $0x18] sm:$0xff] (%p417_p12)   ;;  %v2891_v13 = vld [vmem:[%s5262_s7] sm:$0xff] (%p417_p12)   ;;  %v3114_v15 = vld [vmem:[%s5262_s7 + $0x8] sm:$0xff] (%p417_p12)  }
  0x1f   : > { %s3883_s10 = scalar_lea.vmem %s5255_s0, %s2811_s28  ;;  %s3888_s19 = scalar_lea.vmem %s5256_s1, %s2811_s28  ;;  %v2916_v10 = vunpack.c.l.bf16 (%p417_p12), %v3118_v4  ;;  %v3907_v11 = vunpack.c.h.bf16 (%p417_p12), %v3118_v4  ;;  %v3909_v12 = vunpack.c.l.bf16 (%p417_p12), %v3119_v9  ;;  %v3914_v14 = vunpack.c.h.bf16 (%p417_p12), %v3119_v9  ;;  %v3115_v16 = vld [vmem:[%s5262_s7 + $0x10] sm:$0xff] (%p417_p12)   ;;  %v3116_v17 = vld [vmem:[%s5262_s7 + $0x18] sm:$0xff] (%p417_p12)  }
  0x20   : > { %s3893_s18 = scalar_lea.vmem %s5257_s2, %s2811_s28  ;;  %3409 = vlog2.f32 (%p417_p12), %v2908_v5  ;;  %v2892_v18 = vunpack.c.l.bf16 (%p417_p12), %v2891_v13  ;;  %v2893_v19 = vunpack.c.h.bf16 (%p417_p12), %v2891_v13  ;;  %v2896_v20 = vunpack.c.l.bf16 (%p417_p12), %v3114_v15 }
  0x21   : > { %3411 = vlog2.f32 (%p417_p12), %v2909_v6  ;;  %v2897_v21 = vunpack.c.h.bf16 (%p417_p12), %v3114_v15  ;;  %v2900_v22 = vunpack.c.l.bf16 (%p417_p12), %v3115_v16  ;;  %v2901_v23 = vunpack.c.h.bf16 (%p417_p12), %v3115_v16 }
  0x22   : > { %3413 = vlog2.f32 (%p417_p12), %v2912_v7  ;;  %v2904_v24 = vunpack.c.l.bf16 (%p417_p12), %v3116_v17  ;;  %v2905_v25 = vunpack.c.h.bf16 (%p417_p12), %v3116_v17  ;;  %v486_v27 = vmul.f32 (%p417_p12), %v2892_v18, %v2892_v18 }
  0x23   : > { %3415 = vlog2.f32 (%p417_p12), %v2913_v8  ;;  %v487_v30 = vmul.f32 (%p417_p12), %v2893_v19, %v2893_v19  ;;  %v488_v31 = vmul.f32 (%p417_p12), %v2896_v20, %v2896_v20  ;;  %v489_v32 = vmul.f32 (%p417_p12), %v2897_v21, %v2897_v21 }
  0x24   : > { %3417 = vlog2.f32 (%p417_p12), %v2916_v10  ;;  %v490_v35 = vmul.f32 (%p417_p12), %v2900_v22, %v2900_v22  ;;  %v491_v36 = vmul.f32 (%p417_p12), %v2901_v23, %v2901_v23  ;;  %v492_v37 = vmul.f32 (%p417_p12), %v2904_v24, %v2904_v24 }
  0x25   : > { %3419 = vlog2.f32 %v3907_v11  ;;  %v493_v41 = vmul.f32 %v2905_v25, %v2905_v25  ;;  %v502_v42 = vmul.f32 %v2908_v5, %v2908_v5  ;;  %v503_v46 = vmul.f32 %v2909_v6, %v2909_v6 }
  0x26   : > { %3421 = vlog2.f32 %v3909_v12  ;;  %v504_v47 = vmul.f32 %v2912_v7, %v2912_v7  ;;  %v505_v52 = vmul.f32 %v2913_v8, %v2913_v8  ;;  %v506_v57 = vmul.f32 %v2916_v10, %v2916_v10 }
  0x27   : > { %3423 = vlog2.f32 %v3914_v14  ;;  %v507_v10 = vmul.f32 %v3907_v11, %v3907_v11  ;;  %v508_v22 = vmul.f32 %v3909_v12, %v3909_v12  ;;  %v509_v23 = vmul.f32 %v3914_v14, %v3914_v14 }
  0x2a   : > { %v3410_v26 = vpop.eup %3409 }
  0x2b   : > { %v3412_v28 = vpop.eup %3411  ;;  %v455_v29 = vmul.f32 0.6931472, %v3410_v26 }
  0x2c   : > { %v3414_v33 = vpop.eup %3413  ;;  %v457_v34 = vmul.f32 0.6931472, %v3412_v28 }
  0x2d   : > { %v3416_v38 = vpop.eup %3415  ;;  %v459_v39 = vmul.f32 0.6931472, %v3414_v33  ;;  %v470_v40 = vmul.f32 2.0, %v455_v29 }
  0x2e   : > { %v3418_v43 = vpop.eup %3417  ;;  %v461_v44 = vmul.f32 0.6931472, %v3416_v38  ;;  %v471_v45 = vmul.f32 2.0, %v457_v34 }
  0x2f   : > { %v3420_v48 = vpop.eup %3419  ;;  %v463_v49 = vmul.f32 0.6931472, %v3418_v43  ;;  %v472_v50 = vmul.f32 2.0, %v459_v39  ;;  %v478_v51 = vadd.f32 1.0, %v470_v40 }
  0x30   : > { %v3422_v53 = vpop.eup %3421  ;;  %v465_v54 = vmul.f32 0.6931472, %v3420_v48  ;;  %v473_v55 = vmul.f32 2.0, %v461_v44  ;;  %v479_v56 = vadd.f32 1.0, %v471_v45 }
  0x31   : > { %v3424_v58 = vpop.eup %3423  ;;  %v467_v59 = vmul.f32 0.6931472, %v3422_v53  ;;  %v474_v60 = vmul.f32 2.0, %v463_v49  ;;  %v480_v61 = vadd.f32 1.0, %v472_v50  ;;  %v494_v62 = vsub.f32 %v478_v51, %v486_v27 }
  0x32   : > { %v469_v63 = vmul.f32 0.6931472, %v3424_v58  ;;  %v475_v0 = vmul.f32 2.0, %v465_v54  ;;  %v481_v1 = vadd.f32 1.0, %v473_v55  ;;  %v495_v2 = vsub.f32 %v479_v56, %v487_v30 }
  0x33   : > { %v476_v3 = vmul.f32 2.0, %v467_v59  ;;  %v482_v4 = vadd.f32 1.0, %v474_v60  ;;  %v496_v5 = vsub.f32 %v480_v61, %v488_v31  ;;  %v510_v6 = vsub.f32 %v494_v62, %v502_v42 }
  0x34   : > { %v477_v7 = vmul.f32 2.0, %v469_v63  ;;  %v483_v8 = vadd.f32 1.0, %v475_v0  ;;  %v497_v9 = vsub.f32 %v481_v1, %v489_v32  ;;  %v511_v13 = vsub.f32 %v495_v2, %v503_v46 }
  0x35   : > { %v484_v15 = vadd.f32 1.0, %v476_v3  ;;  %v498_v16 = vsub.f32 %v482_v4, %v490_v35  ;;  %v512_v17 = vsub.f32 %v496_v5, %v504_v47 }
  0x36   : > { %v485_v18 = vadd.f32 1.0, %v477_v7  ;;  %v499_v19 = vsub.f32 %v483_v8, %v491_v36  ;;  %v513_v20 = vsub.f32 %v497_v9, %v505_v52  ;;  %v518_v21 = vadd.f32 %v511_v13, %v510_v6 }
  0x37   : > { %v500_v24 = vsub.f32 %v484_v15, %v492_v37  ;;  %v514_v26 = vsub.f32 %v498_v16, %v506_v57 }
  0x38   : > { %v501_v25 = vsub.f32 %v485_v18, %v493_v41  ;;  %v519_v27 = vadd.f32 %v518_v21, %v512_v17  ;;  %v515_v28 = vsub.f32 %v499_v19, %v507_v10  ;;  %v537_v41 = vld [vmem:[%s3877_s27] sm:$0xff] }
  0x39   : > { %v516_v31 = vsub.f32 %v500_v24, %v508_v22 }
  0x3a   : > { %v520_v29 = vadd.f32 %v519_v27, %v513_v20  ;;  %v517_v30 = vsub.f32 %v501_v25, %v509_v23 }
  0x3c   : > { %v521_v11 = vadd.f32 %v520_v29, %v514_v26  ;;  %v525_v33 = vsel %vm524_vm0, %v517_v30, 0.0 }
  0x3e   : > { %v522_v32 = vadd.f32 %v521_v11, %v515_v28 }
  0x40   : > { %v523_v34 = vadd.f32 %v522_v32, %v516_v31 }
  0x42   : > { %v526_v35 = vadd.f32 %v525_v33, %v523_v34 }
  0x44   : > { %527 = vadd.xlane.f32.xlu0 %v526_v35 }
  0xd1   : > { %v528_v12 = vpop.xlane.xlu0 %527 }
  0xd2   : > { %v529_v36 = vrot.slane %v528_v12, 4 }
  0xd4   : > { %v530_v14 = vadd.f32 %v529_v36, %v528_v12 }
  0xd6   : > { %v531_v37 = vrot.slane %v530_v14, 2 }
  0xd8   : > { %v532_v38 = vadd.f32 %v531_v37, %v530_v14 }
  0xda   : > { %v533_v39 = vrot.slane %v532_v38, 1 }
  0xdc   : > { %v534_v40 = vadd.f32 %v533_v39, %v532_v38 }
  0xde   : > { %3349 = vpush %v534_v40 }
 0x10f   : > { %s3350_s30 = spop %3349 }
 0x110   : > { %s536_s24 = smul.f32 -0.5, %s3350_s30 }
 0x112   : > { %s538_s28 = smul.f32 0.0004, %s536_s24 }
 0x114   : > { %v539_v42 = vstv %s538_s28 }
 0x115   : > { %v540_v43 = vadd.f32 %v539_v42, %v537_v41 }
 0x117   : > { %541 = vst [vmem:[%s3877_s27] sm:$0xff] %v540_v43 }
 0x118 PF: > { %v734_v44 = vld [vmem:[%s5258_s3] sm:$0xff]  ;;  %v735_v45 = vld [vmem:[%s5258_s3 + $0x8] sm:$0xff]  ;;  %v736_v46 = vld [vmem:[%s5258_s3 + $0x10] sm:$0xff]  ;;  %vm875_vm1 = vcmask 261120   ;;  %s2884_s24 = sshll.u32 %s3752_s14, 8  ;;  %vm2622_vm4 = vcmask 7168  }
 0x119   : > { %v3337_v47 = vpack.c.bf16 %v735_v45, %v734_v44  ;;  %v737_v48 = vld [vmem:[%s5258_s3 + $0x18] sm:$0xff]  ;;  %v2923_v49 = vld [vmem:[%s3883_s10] sm:$0xff]   ;;  %v3120_v56 = vld [vmem:[%s3883_s10 + $0x8] sm:$0xff]   ;;  %s2886_s15 = sshll.u32 %s3752_s14, 7  ;;  %s2713_s6 = sshll.u32 %s3877_s27, 4  ;;  %s5207_s6 = int_to_ptr.vmem [resolvable:$true] %s2713_s6 }
 0x11a   : > { %v2987_v50 = vld [vmem:[%s3888_s19] sm:$0xff]   ;;  %v3341_v51 = vpack.c.bf16 %v737_v48, %v736_v46  ;;  %v2924_v52 = vunpack.c.l.bf16 %v2923_v49  ;;  %v2925_v53 = vunpack.c.h.bf16 %v2923_v49  ;;  %v3135_v57 = vld [vmem:[%s3888_s19 + $0x8] sm:$0xff]   ;;  %v2928_v61 = vunpack.c.l.bf16 %v3120_v56  ;;  %v3121_v7 = vld [vmem:[%s3883_s10 + $0x10] sm:$0xff]   ;;  %s5205_s26 = scalar_lea.hbm %s5264_s9, %s2886_s15  ;;  %s5317_s25 = sand.u32 1, %s3744_s12  }
 0x11b   : > { %v2988_v54 = vunpack.c.l.bf16 %v2987_v50  ;;  %v3051_v55 = vld [vmem:[%s3893_s18] sm:$0xff]   ;;  %3338 = vmatprep.subr.bf16.mxu0 %v3337_v47  ;;  %3345 = vmatprep.subr.bf16.mxu1 %v3337_v47  ;;  %v2989_v58 = vunpack.c.h.bf16 %v2987_v50  ;;  %v3150_v62 = vld [vmem:[%s3893_s18 + $0x8] sm:$0xff]   ;;  %v2992_v0 = vunpack.c.l.bf16 %v3135_v57  ;;  %v2929_v1 = vunpack.c.h.bf16 %v3120_v56  ;;  %v3136_v16 = vld [vmem:[%s3888_s19 + $0x10] sm:$0xff]   ;;  %s2700_s29 = scalar_lea.sflag [#allocation4], %s5317_s25  ;;  %s3763_s14 = smov [#allocation3]  }
 0x11c   : > { %v3052_v59 = vunpack.c.l.bf16 %v3051_v55  ;;  %v3053_v60 = vunpack.c.h.bf16 %v3051_v55  ;;  %3340 = vmatpush3.bf16.msra.mxu0 %v3337_v47  ;;  %3347 = vmatpush3.bf16.msra.mxu1 %v3337_v47  ;;  %v2993_v2 = vunpack.c.h.bf16 %v3135_v57  ;;  %v3056_v6 = vunpack.c.l.bf16 %v3150_v62  ;;  %v3151_v20 = vld [vmem:[%s3893_s18 + $0x10] sm:$0xff]   ;;  %v3122_v21 = vld [vmem:[%s3883_s10 + $0x18] sm:$0xff]   ;;  %v3123_v41 = vld [vmem:[%s3883_s10 + $0x20] sm:$0xff]  }
 0x11d   : > { %v741_v63 = vmul.f32 %v2988_v54, %v2924_v52  ;;  %3342 = vmatprep.subr.bf16.mxu0 %v3341_v51  ;;  %3346 = vmatprep.subr.bf16.mxu1 %v3341_v51  ;;  %v742_v4 = vmul.f32 %v2989_v58, %v2925_v53  ;;  %v743_v9 = vmul.f32 %v2992_v0, %v2928_v61  ;;  %v3057_v15 = vunpack.c.h.bf16 %v3150_v62  ;;  %v3137_v26 = vld [vmem:[%s3888_s19 + $0x18] sm:$0xff]   ;;  %v3138_v42 = vld [vmem:[%s3888_s19 + $0x20] sm:$0xff]   ;;  %v3124_v55 = vld [vmem:[%s3883_s10 + $0x28] sm:$0xff]  }
 0x11e   : > { %v773_v3 = vmul.f32 %v3052_v59, %v2924_v52  ;;  %v774_v5 = vmul.f32 %v3053_v60, %v2925_v53  ;;  %v744_v13 = vmul.f32 %v2993_v2, %v2929_v1  ;;  %v775_v19 = vmul.f32 %v3056_v6, %v2928_v61  ;;  %v3152_v31 = vld [vmem:[%s3893_s18 + $0x18] sm:$0xff]   ;;  %v3153_v50 = vld [vmem:[%s3893_s18 + $0x20] sm:$0xff]   ;;  %v3139_v56 = vld [vmem:[%s3888_s19 + $0x28] sm:$0xff]  }
 0x11f   : > { %v805_v8 = vmax.f32 %v741_v63, 0.0  ;;  %v806_v17 = vmax.f32 %v742_v4, 0.0  ;;  %v807_v22 = vmax.f32 %v743_v9, 0.0  ;;  %v776_v24 = vmul.f32 %v3057_v15, %v2929_v1  ;;  %v3154_v1 = vld [vmem:[%s3893_s18 + $0x28] sm:$0xff]   ;;  %v3125_v6 = vld [vmem:[%s3883_s10 + $0x30] sm:$0xff]  }
 0x120   : > { %v837_v10 = vmax.f32 %v773_v3, 0.0  ;;  %v838_v18 = vmax.f32 %v774_v5, 0.0  ;;  %3344 = vmatpush3.bf16.msra.mxu0 %v3341_v51  ;;  %3348 = vmatpush3.bf16.msra.mxu1 %v3341_v51  ;;  %v808_v23 = vmax.f32 %v744_v13, 0.0  ;;  %v2932_v25 = vunpack.c.l.bf16 %v3121_v7  ;;  %v3140_v15 = vld [vmem:[%s3888_s19 + $0x30] sm:$0xff]  }
 0x121   : > { %3241 = vmatprep.mubr.msk.f32.mxu0 %vm875_vm1, %v805_v8  ;;  %v839_v27 = vmax.f32 %v775_v19, 0.0  ;;  %v2996_v28 = vunpack.c.l.bf16 %v3136_v16  ;;  %v2933_v29 = vunpack.c.h.bf16 %v3121_v7  ;;  %v2997_v30 = vunpack.c.h.bf16 %v3136_v16  ;;  %v3155_v19 = vld [vmem:[%s3893_s18 + $0x30] sm:$0xff]  }
 0x122   : > { %3289 = vmatprep.mubr.msk.f32.mxu1 %vm875_vm1, %v837_v10  ;;  %v840_v11 = vmax.f32 %v776_v24, 0.0  ;;  %v3060_v32 = vunpack.c.l.bf16 %v3151_v20  ;;  %v3061_v33 = vunpack.c.h.bf16 %v3151_v20  ;;  %v2936_v34 = vunpack.c.l.bf16 %v3122_v21 }
 0x123   : > { %3242 = vmatmul.mubr.msk.f32.vlgmr.msra.gmra.mrb[0].mxu0 %vm875_vm1, %v806_v17  ;;  %3290 = vmatmul.mubr.msk.f32.vlgmr.msra.gmra.mrb[0].mxu1 %vm875_vm1, %v838_v18  ;;  %v745_v35 = vmul.f32 %v2996_v28, %v2932_v25  ;;  %v746_v12 = vmul.f32 %v2997_v30, %v2933_v29  ;;  %v3000_v36 = vunpack.c.l.bf16 %v3137_v26  ;;  %v2937_v14 = vunpack.c.h.bf16 %v3122_v21  ;;  %v3141_v28 = vld [vmem:[%s3888_s19 + $0x38] sm:$0xff]  }
 0x124   : > { %3244 = vmatprep.mubr.msk.f32.mxu0 %vm875_vm1, %v807_v22  ;;  %3292 = vmatprep.mubr.msk.f32.mxu1 %vm875_vm1, %v839_v27  ;;  %v777_v37 = vmul.f32 %v3060_v32, %v2932_v25  ;;  %v778_v38 = vmul.f32 %v3061_v33, %v2933_v29  ;;  %v3001_v39 = vunpack.c.h.bf16 %v3137_v26  ;;  %v3064_v40 = vunpack.c.l.bf16 %v3152_v31  ;;  %v3126_v27 = vld [vmem:[%s3883_s10 + $0x38] sm:$0xff]  }
 0x125   : > { %v809_v43 = vmax.f32 %v745_v35, 0.0  ;;  %v747_v44 = vmul.f32 %v3000_v36, %v2936_v34  ;;  %v3065_v45 = vunpack.c.h.bf16 %v3152_v31  ;;  %v810_v46 = vmax.f32 %v746_v12, 0.0  ;;  %v3156_v12 = vld [vmem:[%s3893_s18 + $0x38] sm:$0xff]  }
 0x126   : > { %v841_v47 = vmax.f32 %v777_v37, 0.0  ;;  %v748_v48 = vmul.f32 %v3001_v39, %v2937_v14  ;;  %v779_v49 = vmul.f32 %v3064_v40, %v2936_v34  ;;  %v842_v51 = vmax.f32 %v778_v38, 0.0  ;;  %v3127_v39 = vld [vmem:[%s3883_s10 + $0x40] sm:$0xff]  }
 0x127   : > { %3245 = vmatmul.mubr.msk.f32.gmra.mrb[2].mxu0 %vm875_vm1, %v808_v23  ;;  %3293 = vmatmul.mubr.msk.f32.gmra.mrb[2].mxu1 %vm875_vm1, %v840_v11  ;;  %v780_v52 = vmul.f32 %v3065_v45, %v2937_v14  ;;  %v2940_v53 = vunpack.c.l.bf16 %v3123_v41  ;;  %v3004_v54 = vunpack.c.l.bf16 %v3138_v42  ;;  %v811_v57 = vmax.f32 %v747_v44, 0.0 }
 0x128   : > { %3247 = vmatprep.mubr.msk.f32.mxu0 %vm875_vm1, %v809_v43  ;;  %3295 = vmatprep.mubr.msk.f32.mxu1 %vm875_vm1, %v841_v47  ;;  %v843_v58 = vmax.f32 %v779_v49, 0.0  ;;  %v2941_v59 = vunpack.c.h.bf16 %v3123_v41  ;;  %v3005_v60 = vunpack.c.h.bf16 %v3138_v42  ;;  %v812_v61 = vmax.f32 %v748_v48, 0.0  ;;  %v3142_v43 = vld [vmem:[%s3888_s19 + $0x40] sm:$0xff]  }
 0x129   : > { %v749_v62 = vmul.f32 %v3004_v54, %v2940_v53  ;;  %v3068_v63 = vunpack.c.l.bf16 %v3153_v50  ;;  %v3069_v0 = vunpack.c.h.bf16 %v3153_v50  ;;  %v2944_v3 = vunpack.c.l.bf16 %v3124_v55  ;;  %v3157_v48 = vld [vmem:[%s3893_s18 + $0x40] sm:$0xff]  }
 0x12a   : > { %v750_v2 = vmul.f32 %v3005_v60, %v2941_v59  ;;  %v3008_v4 = vunpack.c.l.bf16 %v3139_v56  ;;  %v2945_v5 = vunpack.c.h.bf16 %v3124_v55  ;;  %v844_v7 = vmax.f32 %v780_v52, 0.0 }
 0x12b   : > { %3248 = vmatmul.mubr.msk.f32.gmra.mrb[4].mxu0 %vm875_vm1, %v810_v46  ;;  %3296 = vmatmul.mubr.msk.f32.gmra.mrb[4].mxu1 %vm875_vm1, %v842_v51  ;;  %v781_v8 = vmul.f32 %v3068_v63, %v2940_v53  ;;  %v782_v9 = vmul.f32 %v3069_v0, %v2941_v59  ;;  %v3009_v13 = vunpack.c.h.bf16 %v3139_v56  ;;  %v813_v16 = vmax.f32 %v749_v62, 0.0 }
 0x12c   : > { %3250 = vmatprep.mubr.msk.f32.mxu0 %vm875_vm1, %v811_v57  ;;  %3298 = vmatprep.mubr.msk.f32.mxu1 %vm875_vm1, %v843_v58  ;;  %v751_v10 = vmul.f32 %v3008_v4, %v2944_v3  ;;  %v3072_v17 = vunpack.c.l.bf16 %v3154_v1  ;;  %v3073_v18 = vunpack.c.h.bf16 %v3154_v1  ;;  %v814_v20 = vmax.f32 %v750_v2, 0.0  ;;  %v3128_v57 = vld [vmem:[%s3883_s10 + $0x48] sm:$0xff]  }
 0x12d   : > { %v845_v21 = vmax.f32 %v781_v8, 0.0  ;;  %v2948_v22 = vunpack.c.l.bf16 %v3125_v6  ;;  %v846_v23 = vmax.f32 %v782_v9, 0.0  ;;  %v752_v24 = vmul.f32 %v3009_v13, %v2945_v5  ;;  %v3143_v58 = vld [vmem:[%s3888_s19 + $0x48] sm:$0xff]   ;;  %v3129_v8 = vld [vmem:[%s3883_s10 + $0x50] sm:$0xff]  }
 0x12e   : > { %v783_v25 = vmul.f32 %v3072_v17, %v2944_v3  ;;  %v3012_v26 = vunpack.c.l.bf16 %v3140_v15  ;;  %v784_v29 = vmul.f32 %v3073_v18, %v2945_v5  ;;  %v2949_v30 = vunpack.c.h.bf16 %v3125_v6  ;;  %v3158_v3 = vld [vmem:[%s3893_s18 + $0x48] sm:$0xff]  }
 0x12f   : > { %3251 = vmatmul.mubr.msk.f32.gmra.mrb[6].mxu0 %vm875_vm1, %v812_v61  ;;  %3299 = vmatmul.mubr.msk.f32.gmra.mrb[6].mxu1 %vm875_vm1, %v844_v7  ;;  %v3013_v31 = vunpack.c.h.bf16 %v3140_v15  ;;  %v3076_v11 = vunpack.c.l.bf16 %v3155_v19  ;;  %v815_v32 = vmax.f32 %v751_v10, 0.0  ;;  %v3077_v35 = vunpack.c.h.bf16 %v3155_v19  ;;  %v3144_v10 = vld [vmem:[%s3888_s19 + $0x50] sm:$0xff]  }
 0x130   : > { %3253 = vmatprep.mubr.msk.f32.mxu0 %vm875_vm1, %v813_v16  ;;  %3301 = vmatprep.mubr.msk.f32.mxu1 %vm875_vm1, %v845_v21  ;;  %v847_v33 = vmax.f32 %v783_v25, 0.0  ;;  %v753_v34 = vmul.f32 %v3012_v26, %v2948_v22  ;;  %v2952_v37 = vunpack.c.l.bf16 %v3126_v27  ;;  %v3016_v38 = vunpack.c.l.bf16 %v3141_v28  ;;  %v3159_v19 = vld [vmem:[%s3893_s18 + $0x50] sm:$0xff]  }
 0x131   : > { %v754_v36 = vmul.f32 %v3013_v31, %v2949_v30  ;;  %v785_v14 = vmul.f32 %v3076_v11, %v2948_v22  ;;  %v786_v40 = vmul.f32 %v3077_v35, %v2949_v30  ;;  %v2953_v41 = vunpack.c.h.bf16 %v3126_v27 }
 0x132   : > { %v3017_v42 = vunpack.c.h.bf16 %v3141_v28  ;;  %v816_v44 = vmax.f32 %v752_v24, 0.0  ;;  %v848_v45 = vmax.f32 %v784_v29, 0.0  ;;  %v755_v46 = vmul.f32 %v3016_v38, %v2952_v37  ;;  %v3130_v28 = vld [vmem:[%s3883_s10 + $0x58] sm:$0xff]  }
 0x133   : > { %3254 = vmatmul.mubr.msk.f32.gmra.mrb[8].mxu0 %vm875_vm1, %v814_v20  ;;  %3302 = vmatmul.mubr.msk.f32.gmra.mrb[8].mxu1 %vm875_vm1, %v846_v23  ;;  %v3080_v47 = vunpack.c.l.bf16 %v3156_v12  ;;  %v817_v49 = vmax.f32 %v753_v34, 0.0  ;;  %v849_v50 = vmax.f32 %v785_v14, 0.0  ;;  %v3081_v51 = vunpack.c.h.bf16 %v3156_v12  ;;  %v3145_v29 = vld [vmem:[%s3888_s19 + $0x58] sm:$0xff]  }
 0x134   : > { %3256 = vmatprep.mubr.msk.f32.mxu0 %vm875_vm1, %v815_v32  ;;  %3304 = vmatprep.mubr.msk.f32.mxu1 %vm875_vm1, %v847_v33  ;;  %v2956_v52 = vunpack.c.l.bf16 %v3127_v39  ;;  %v818_v53 = vmax.f32 %v754_v36, 0.0  ;;  %v3020_v55 = vunpack.c.l.bf16 %v3142_v43  ;;  %v2957_v56 = vunpack.c.h.bf16 %v3127_v39  ;;  %v3160_v36 = vld [vmem:[%s3893_s18 + $0x58] sm:$0xff]  }
 0x135   : > { %v787_v54 = vmul.f32 %v3080_v47, %v2952_v37  ;;  %v850_v59 = vmax.f32 %v786_v40, 0.0  ;;  %v756_v60 = vmul.f32 %v3017_v42, %v2953_v41  ;;  %v3021_v61 = vunpack.c.h.bf16 %v3142_v43  ;;  %v3161_v47 = vld [vmem:[%s3893_s18 + $0x60] sm:$0xff]  }
 0x136   : > { %v3084_v62 = vunpack.c.l.bf16 %v3157_v48  ;;  %v819_v63 = vmax.f32 %v755_v46, 0.0  ;;  %v788_v0 = vmul.f32 %v3081_v51, %v2953_v41  ;;  %v757_v1 = vmul.f32 %v3020_v55, %v2956_v52  ;;  %v3146_v46 = vld [vmem:[%s3888_s19 + $0x60] sm:$0xff]  }
 0x137   : > { %3257 = vmatmul.mubr.msk.f32.gmra.mrb[10].mxu0 %vm875_vm1, %v816_v44  ;;  %3305 = vmatmul.mubr.msk.f32.gmra.mrb[10].mxu1 %vm875_vm1, %v848_v45  ;;  %v3085_v2 = vunpack.c.h.bf16 %v3157_v48  ;;  %v851_v4 = vmax.f32 %v787_v54, 0.0  ;;  %v2960_v6 = vunpack.c.l.bf16 %v3128_v57  ;;  %v3024_v7 = vunpack.c.l.bf16 %v3143_v58  ;;  %v3131_v45 = vld [vmem:[%s3883_s10 + $0x60] sm:$0xff]  }
 0x138   : > { %3259 = vmatprep.mubr.msk.f32.mxu0 %vm875_vm1, %v817_v49  ;;  %3307 = vmatprep.mubr.msk.f32.mxu1 %vm875_vm1, %v849_v50  ;;  %v789_v5 = vmul.f32 %v3084_v62, %v2956_v52  ;;  %v758_v9 = vmul.f32 %v3021_v61, %v2957_v56  ;;  %v2961_v15 = vunpack.c.h.bf16 %v3128_v57  ;;  %v3025_v16 = vunpack.c.h.bf16 %v3143_v58  ;;  %v3147_v61 = vld [vmem:[%s3888_s19 + $0x68] sm:$0xff]  }
 0x139   : > { %v790_v13 = vmul.f32 %v3085_v2, %v2957_v56  ;;  %v820_v17 = vmax.f32 %v756_v60, 0.0  ;;  %v3088_v18 = vunpack.c.l.bf16 %v3158_v3  ;;  %v852_v20 = vmax.f32 %v788_v0, 0.0  ;;  %v3132_v60 = vld [vmem:[%s3883_s10 + $0x68] sm:$0xff]  }
 0x13a   : > { %v821_v21 = vmax.f32 %v757_v1, 0.0  ;;  %v3089_v22 = vunpack.c.h.bf16 %v3158_v3  ;;  %v2964_v23 = vunpack.c.l.bf16 %v3129_v8  ;;  %v853_v24 = vmax.f32 %v789_v5, 0.0  ;;  %v3162_v2 = vld [vmem:[%s3893_s18 + $0x68] sm:$0xff]  }
 0x13b   : > { %3260 = vmatmul.mubr.msk.f32.gmra.mrb[12].mxu0 %vm875_vm1, %v818_v53  ;;  %3308 = vmatmul.mubr.msk.f32.gmra.mrb[12].mxu1 %vm875_vm1, %v850_v59  ;;  %v759_v25 = vmul.f32 %v3024_v7, %v2960_v6  ;;  %v791_v26 = vmul.f32 %v3088_v18, %v2960_v6  ;;  %v3028_v27 = vunpack.c.l.bf16 %v3144_v10  ;;  %v822_v30 = vmax.f32 %v758_v9, 0.0 }
 0x13c   : > { %3262 = vmatprep.mubr.msk.f32.mxu0 %vm875_vm1, %v819_v63  ;;  %3310 = vmatprep.mubr.msk.f32.mxu1 %vm875_vm1, %v851_v4  ;;  %v854_v31 = vmax.f32 %v790_v13, 0.0  ;;  %v760_v11 = vmul.f32 %v3025_v16, %v2961_v15  ;;  %v3092_v32 = vunpack.c.l.bf16 %v3159_v19  ;;  %v792_v33 = vmul.f32 %v3089_v22, %v2961_v15 }
 0x13d   : > { %v761_v34 = vmul.f32 %v3028_v27, %v2964_v23  ;;  %v2965_v35 = vunpack.c.h.bf16 %v3129_v8  ;;  %v3029_v12 = vunpack.c.h.bf16 %v3144_v10  ;;  %v3093_v37 = vunpack.c.h.bf16 %v3159_v19  ;;  %v3133_v10 = vld [vmem:[%s3883_s10 + $0x70] sm:$0xff]  }
 0x13e   : > { %v793_v14 = vmul.f32 %v3092_v32, %v2964_v23  ;;  %v2968_v38 = vunpack.c.l.bf16 %v3130_v28  ;;  %v3032_v39 = vunpack.c.l.bf16 %v3145_v29  ;;  %v823_v40 = vmax.f32 %v759_v25, 0.0 }
 0x13f   : > { %3263 = vmatmul.mubr.msk.f32.gmra.mrb[14].mxu0 %vm875_vm1, %v820_v17  ;;  %3311 = vmatmul.mubr.msk.f32.gmra.mrb[14].mxu1 %vm875_vm1, %v852_v20  ;;  %v855_v41 = vmax.f32 %v791_v26, 0.0  ;;  %v2969_v42 = vunpack.c.h.bf16 %v3130_v28  ;;  %v3033_v43 = vunpack.c.h.bf16 %v3145_v29  ;;  %v3096_v44 = vunpack.c.l.bf16 %v3160_v36  ;;  %v3148_v17 = vld [vmem:[%s3888_s19 + $0x70] sm:$0xff]  }
 0x140   : > { %3265 = vmatprep.mubr.msk.f32.mxu0 %vm875_vm1, %v821_v21  ;;  %3313 = vmatprep.mubr.msk.f32.mxu1 %vm875_vm1, %v853_v24  ;;  %v824_v48 = vmax.f32 %v760_v11, 0.0  ;;  %v856_v49 = vmax.f32 %v792_v33, 0.0  ;;  %v762_v50 = vmul.f32 %v3029_v12, %v2965_v35  ;;  %v3097_v51 = vunpack.c.h.bf16 %v3160_v36  ;;  %v3163_v21 = vld [vmem:[%s3893_s18 + $0x70] sm:$0xff]   ;;  %v3164_v12 = vld [vmem:[%s3893_s18 + $0x78] sm:$0xff]   ;;  %s3682_s18 = scalar_lea.vmem %s5207_s6, 128 }
 0x141   : > { %v825_v52 = vmax.f32 %v761_v34, 0.0  ;;  %v857_v53 = vmax.f32 %v793_v14, 0.0  ;;  %v794_v54 = vmul.f32 %v3093_v37, %v2965_v35  ;;  %v763_v55 = vmul.f32 %v3032_v39, %v2968_v38  ;;  %v3134_v34 = vld [vmem:[%s3883_s10 + $0x78] sm:$0xff]   ;;  %p3683_p13 = scmp.ne.s32.totalorder %s5207_s6, %s3682_s18  ;;  %s3686_s10 = sshll.u32 %s3763_s14, 4  ;;  %s3687_s10 = int_to_ptr.vmem [resolvable:$false] %s3686_s10 }
 0x142   : > { %v795_v56 = vmul.f32 %v3096_v44, %v2968_v38  ;;  %v2972_v57 = vunpack.c.l.bf16 %v3131_v45  ;;  %v3036_v58 = vunpack.c.l.bf16 %v3146_v46  ;;  %v3100_v59 = vunpack.c.l.bf16 %v3161_v47  ;;  %v3149_v35 = vld [vmem:[%s3888_s19 + $0x78] sm:$0xff]   ;;  %s3688_s19 = scalar_lea.vmem %s3687_s10, 256  ;;  %p3689_p2 = scmp.lt.s32.totalorder %s5207_s6, %s3687_s10 }
 0x143   : > { %3266 = vmatmul.mubr.msk.f32.gmra.mrb[16].mxu0 %vm875_vm1, %v822_v30  ;;  %3314 = vmatmul.mubr.msk.f32.gmra.mrb[16].mxu1 %vm875_vm1, %v854_v31  ;;  %v764_v62 = vmul.f32 %v3033_v43, %v2969_v42  ;;  %v2973_v63 = vunpack.c.h.bf16 %v3131_v45  ;;  %v3037_v0 = vunpack.c.h.bf16 %v3146_v46  ;;  %v3101_v1 = vunpack.c.h.bf16 %v3161_v47  ;;  %p3684_p0 = pnand %p3683_p13, %p3857_p4  ;;  %p3690_p3 = scmp.lt.s32.totalorder %s3688_s19, %s3682_s18 }
 0x144   : > { %3268 = vmatprep.mubr.msk.f32.mxu0 %vm875_vm1, %v823_v40  ;;  %3316 = vmatprep.mubr.msk.f32.mxu1 %vm875_vm1, %v855_v41  ;;  %v826_v3 = vmax.f32 %v762_v50, 0.0  ;;  %v796_v4 = vmul.f32 %v3097_v51, %v2969_v42  ;;  %v858_v5 = vmax.f32 %v794_v54, 0.0  ;;  %v827_v6 = vmax.f32 %v763_v55, 0.0 }
 0x145   : > { %v2976_v7 = vunpack.c.l.bf16 %v3132_v60  ;;  %v3040_v8 = vunpack.c.l.bf16 %v3147_v61  ;;  %v859_v9 = vmax.f32 %v795_v56, 0.0  ;;  %v765_v13 = vmul.f32 %v3036_v58, %v2972_v57  ;;  %p3685_p1 = pneg %p3684_p0  ;;  %p3691_p5 = por %p3690_p3, %p3689_p2 }
 0x146   : > { %v797_v15 = vmul.f32 %v3100_v59, %v2972_v57  ;;  %v3104_v16 = vunpack.c.l.bf16 %v3162_v2  ;;  %v828_v18 = vmax.f32 %v764_v62, 0.0  ;;  %v766_v19 = vmul.f32 %v3037_v0, %v2973_v63 }
 0x147   : > { %3269 = vmatmul.mubr.msk.f32.gmra.mrb[18].mxu0 %vm875_vm1, %v824_v48  ;;  %3317 = vmatmul.mubr.msk.f32.gmra.mrb[18].mxu1 %vm875_vm1, %v856_v49  ;;  %v798_v20 = vmul.f32 %v3101_v1, %v2973_v63  ;;  %v860_v22 = vmax.f32 %v796_v4, 0.0  ;;  %v2977_v23 = vunpack.c.h.bf16 %v3132_v60  ;;  %v3041_v24 = vunpack.c.h.bf16 %v3147_v61  ;;  %p3692_p6 = pnand %p3691_p5, %p3685_p1 }
 0x148   : > { %3271 = vmatprep.mubr.msk.f32.mxu0 %vm875_vm1, %v825_v52  ;;  %3319 = vmatprep.mubr.msk.f32.mxu1 %vm875_vm1, %v857_v53  ;;  %v3105_v25 = vunpack.c.h.bf16 %v3162_v2  ;;  %v767_v26 = vmul.f32 %v3040_v8, %v2976_v7  ;;  %v799_v27 = vmul.f32 %v3104_v16, %v2976_v7  ;;  %v2980_v28 = vunpack.c.l.bf16 %v3133_v10  ;;  %v4063_v2 = vld [vmem:[%s5259_s4] ss:$0 sm:$0xff] }
 0x149   : > { %v3044_v29 = vunpack.c.l.bf16 %v3148_v17  ;;  %v829_v30 = vmax.f32 %v765_v13, 0.0  ;;  %v861_v31 = vmax.f32 %v797_v15, 0.0  ;;  %v3108_v11 = vunpack.c.l.bf16 %v3163_v21  ;;  %v4071_v13 = vld [vmem:[%s5260_s5] ss:$0 sm:$0xff] }
 0x14a   : > { %v830_v32 = vmax.f32 %v766_v19, 0.0  ;;  %v862_v33 = vmax.f32 %v798_v20, 0.0  ;;  %v768_v36 = vmul.f32 %v3041_v24, %v2977_v23  ;;  %v800_v14 = vmul.f32 %v3105_v25, %v2977_v23 }
 0x14b   : > { %3272 = vmatmul.mubr.msk.f32.gmra.mrb[20].mxu0 %vm875_vm1, %v826_v3  ;;  %3320 = vmatmul.mubr.msk.f32.gmra.mrb[20].mxu1 %vm875_vm1, %v858_v5  ;;  %v2981_v37 = vunpack.c.h.bf16 %v3133_v10  ;;  %v3045_v38 = vunpack.c.h.bf16 %v3148_v17  ;;  %v831_v39 = vmax.f32 %v767_v26, 0.0  ;;  %v863_v40 = vmax.f32 %v799_v27, 0.0 }
 0x14c   : > { %3274 = vmatprep.mubr.msk.f32.mxu0 %vm875_vm1, %v827_v6  ;;  %3322 = vmatprep.mubr.msk.f32.mxu1 %vm875_vm1, %v859_v9  ;;  %v769_v41 = vmul.f32 %v3044_v29, %v2980_v28  ;;  %v3109_v42 = vunpack.c.h.bf16 %v3163_v21  ;;  %v801_v43 = vmul.f32 %v3108_v11, %v2980_v28  ;;  %v2984_v44 = vunpack.c.l.bf16 %v3134_v34 }
 0x14d   : > { %v3048_v45 = vunpack.c.l.bf16 %v3149_v35  ;;  %v3112_v46 = vunpack.c.l.bf16 %v3164_v12  ;;  %v832_v47 = vmax.f32 %v768_v36, 0.0  ;;  %v864_v48 = vmax.f32 %v800_v14, 0.0 }
 0x14e   : > { %v770_v49 = vmul.f32 %v3045_v38, %v2981_v37  ;;  %v802_v50 = vmul.f32 %v3109_v42, %v2981_v37  ;;  %v2985_v51 = vunpack.c.h.bf16 %v3134_v34  ;;  %v3049_v52 = vunpack.c.h.bf16 %v3149_v35 }
 0x14f   : > { %3275 = vmatmul.mubr.msk.f32.gmra.mrb[22].mxu0 %vm875_vm1, %v828_v18  ;;  %3323 = vmatmul.mubr.msk.f32.gmra.mrb[22].mxu1 %vm875_vm1, %v860_v22  ;;  %v3113_v53 = vunpack.c.h.bf16 %v3164_v12  ;;  %v833_v54 = vmax.f32 %v769_v41, 0.0  ;;  %v865_v55 = vmax.f32 %v801_v43, 0.0  ;;  %v771_v56 = vmul.f32 %v3048_v45, %v2984_v44 }
 0x150   : > { %3277 = vmatprep.mubr.msk.f32.mxu0 %vm875_vm1, %v829_v30  ;;  %3325 = vmatprep.mubr.msk.f32.mxu1 %vm875_vm1, %v861_v31  ;;  %v803_v57 = vmul.f32 %v3112_v46, %v2984_v44  ;;  %v834_v58 = vmax.f32 %v770_v49, 0.0  ;;  %v866_v59 = vmax.f32 %v802_v50, 0.0  ;;  %v772_v60 = vmul.f32 %v3049_v52, %v2985_v51 }
 0x151   : > { %v804_v61 = vmul.f32 %v3113_v53, %v2985_v51  ;;  %v835_v62 = vmax.f32 %v771_v56, 0.0 }
 0x152   : > { %v867_v63 = vmax.f32 %v803_v57, 0.0  ;;  %v836_v0 = vmax.f32 %v772_v60, 0.0 }
 0x153   : > { %3278 = vmatmul.mubr.msk.f32.gmra.mrb[24].mxu0 %vm875_vm1, %v830_v32  ;;  %3326 = vmatmul.mubr.msk.f32.gmra.mrb[24].mxu1 %vm875_vm1, %v862_v33  ;;  %v868_v1 = vmax.f32 %v804_v61, 0.0 }
 0x154   : > { %3280 = vmatprep.mubr.msk.f32.mxu0 %vm875_vm1, %v831_v39  ;;  %3328 = vmatprep.mubr.msk.f32.mxu1 %vm875_vm1, %v863_v40 }
 0x157   : > { %3281 = vmatmul.mubr.msk.f32.gmra.mrb[26].mxu0 %vm875_vm1, %v832_v47  ;;  %3329 = vmatmul.mubr.msk.f32.gmra.mrb[26].mxu1 %vm875_vm1, %v864_v48 }
 0x158   : > { %3283 = vmatprep.mubr.msk.f32.mxu0 %vm875_vm1, %v833_v54  ;;  %3331 = vmatprep.mubr.msk.f32.mxu1 %vm875_vm1, %v865_v55 }
 0x15b   : > { %3284 = vmatmul.mubr.msk.f32.gmra.mrb[28].mxu0 %vm875_vm1, %v834_v58  ;;  %3332 = vmatmul.mubr.msk.f32.gmra.mrb[28].mxu1 %vm875_vm1, %v866_v59 }
 0x15c   : > { %3286 = vmatprep.mubr.msk.f32.mxu0 %vm875_vm1, %v835_v62  ;;  %3334 = vmatprep.mubr.msk.f32.mxu1 %vm875_vm1, %v867_v63 }
 0x15f   : > { %3287 = vmatmul.mubr.msk.f32.gmra.mrb[30].mxu0 %vm875_vm1, %v836_v0  ;;  %3335 = vmatmul.mubr.msk.f32.gmra.mrb[30].mxu1 %vm875_vm1, %v868_v1 }
 0x1f6   : > { %v3243_v3 = vpop.f32.mrb[0].mxu0  ;;  %v3291_v4 = vpop.f32.mrb[0].mxu1 }
 0x1f7   : > { %v1140_v5 = vadd.f32 %v3243_v3, %v4063_v2  ;;  %v1300_v6 = vadd.f32 %v3291_v4, %v4063_v2  ;;  %v1134_v7 = vpop.f32.mrb[1].mxu0  ;;  %v1294_v8 = vpop.f32.mrb[1].mxu1 }
 0x1f8   : > { %v1295_v9 = vadd.f32 %v4063_v2, %v1294_v8  ;;  %v1135_v10 = vadd.f32 %v4063_v2, %v1134_v7 }
 0x1f9   : > { %v1454_v15 = vmax.f32 %v1140_v5, 0.0  ;;  %v1486_v16 = vmax.f32 %v1300_v6, 0.0 }
 0x1fa   : > { %v1485_v17 = vmax.f32 %v1295_v9, 0.0  ;;  %v3246_v18 = vpop.f32.mrb[2].mxu0  ;;  %v3294_v19 = vpop.f32.mrb[2].mxu1  ;;  %v1453_v27 = vmax.f32 %v1135_v10, 0.0 }
 0x1fb   : > { %v1150_v20 = vadd.f32 %v3246_v18, %v4063_v2  ;;  %v1144_v21 = vpop.f32.mrb[3].mxu0  ;;  %v1524_v22 = vmul.f32 %v4071_v13, %v1454_v15  ;;  %v1310_v23 = vadd.f32 %v3294_v19, %v4063_v2  ;;  %v1304_v24 = vpop.f32.mrb[3].mxu1  ;;  %v1556_v30 = vmul.f32 %v4071_v13, %v1486_v16 }
 0x1fc   : > { %v1145_v25 = vadd.f32 %v4063_v2, %v1144_v21  ;;  %v1555_v26 = vmul.f32 %v4071_v13, %v1485_v17  ;;  %v1305_v37 = vadd.f32 %v4063_v2, %v1304_v24  ;;  %v1523_v41 = vmul.f32 %v4071_v13, %v1453_v27 }
 0x1fd   : > { %v1456_v28 = vmax.f32 %v1150_v20, 0.0  ;;  %v1590_v29 = vsel %vm875_vm1, %v1524_v22, 0.0  ;;  %v1488_v34 = vmax.f32 %v1310_v23, 0.0  ;;  %v1686_v38 = vsel %vm875_vm1, %v1556_v30, 0.0 }
 0x1fe   : > { %v1455_v31 = vmax.f32 %v1145_v25, 0.0  ;;  %1591 = vadd.xlane.f32.xlu0 %v1590_v29  ;;  %v1683_v11 = vsel %vm875_vm1, %v1555_v26, 0.0  ;;  %v3249_v32 = vpop.f32.mrb[4].mxu0  ;;  %v3297_v33 = vpop.f32.mrb[4].mxu1  ;;  %v1487_v52 = vmax.f32 %v1305_v37, 0.0  ;;  %v1587_v53 = vsel %vm875_vm1, %v1523_v41, 0.0 }
 0x1ff   : > { %1684 = vadd.xlane.f32.xlu1 %v1683_v11  ;;  %v1526_v35 = vmul.f32 %v4071_v13, %v1456_v28  ;;  %v1160_v12 = vadd.f32 %v3249_v32, %v4063_v2  ;;  %v1154_v36 = vpop.f32.mrb[5].mxu0  ;;  %v1314_v14 = vpop.f32.mrb[5].mxu1  ;;  %v1320_v46 = vadd.f32 %v3297_v33, %v4063_v2  ;;  %v1558_v47 = vmul.f32 %v4071_v13, %v1488_v34 }
 0x200   : > { %v1155_v42 = vadd.f32 %v4063_v2, %v1154_v36  ;;  %v1525_v43 = vmul.f32 %v4071_v13, %v1455_v31  ;;  %v1315_v56 = vadd.f32 %v4063_v2, %v1314_v14  ;;  %v1557_v5 = vmul.f32 %v4071_v13, %v1487_v52 }
 0x201   : > { %v1596_v39 = vsel %vm875_vm1, %v1526_v35, 0.0  ;;  %v1458_v40 = vmax.f32 %v1160_v12, 0.0  ;;  %v1490_v59 = vmax.f32 %v1320_v46, 0.0  ;;  %v1692_v60 = vsel %vm875_vm1, %v1558_v47, 0.0 }
 0x202   : > { %1687 = vadd.xlane.f32.xlu0 %v1686_v38  ;;  %v3252_v44 = vpop.f32.mrb[6].mxu0  ;;  %v3300_v45 = vpop.f32.mrb[6].mxu1  ;;  %v1457_v54 = vmax.f32 %v1155_v42, 0.0  ;;  %v1593_v55 = vsel %vm875_vm1, %v1525_v43, 0.0  ;;  %v1489_v8 = vmax.f32 %v1315_v56, 0.0  ;;  %v1689_v25 = vsel %vm875_vm1, %v1557_v5, 0.0 }
 0x203   : > { %1597 = vadd.xlane.f32.xlu1 %v1596_v39  ;;  %v1164_v48 = vpop.f32.mrb[7].mxu0  ;;  %v1324_v49 = vpop.f32.mrb[7].mxu1  ;;  %v1170_v50 = vadd.f32 %v3252_v44, %v4063_v2  ;;  %v1528_v51 = vmul.f32 %v4071_v13, %v1458_v40  ;;  %v1330_v61 = vadd.f32 %v3300_v45, %v4063_v2  ;;  %v1560_v18 = vmul.f32 %v4071_v13, %v1490_v59 }
 0x204   : > { %v1165_v3 = vadd.f32 %v4063_v2, %v1164_v48  ;;  %v1325_v4 = vadd.f32 %v4063_v2, %v1324_v49  ;;  %v1527_v9 = vmul.f32 %v4071_v13, %v1457_v54  ;;  %v1559_v30 = vmul.f32 %v4071_v13, %v1489_v8 }
 0x205   : > { %v1460_v0 = vmax.f32 %v1170_v50, 0.0  ;;  %v1602_v1 = vsel %vm875_vm1, %v1528_v51, 0.0  ;;  %v1492_v17 = vmax.f32 %v1330_v61, 0.0  ;;  %v1698_v33 = vsel %vm875_vm1, %v1560_v18, 0.0 }
 0x206   : > { %1588 = vadd.xlane.f32.xlu0 %v1587_v53  ;;  %v3255_v57 = vpop.f32.mrb[8].mxu0  ;;  %v3303_v58 = vpop.f32.mrb[8].mxu1  ;;  %v1459_v22 = vmax.f32 %v1165_v3, 0.0  ;;  %v1491_v23 = vmax.f32 %v1325_v4, 0.0  ;;  %v1599_v28 = vsel %vm875_vm1, %v1527_v9, 0.0  ;;  %v1695_v48 = vsel %vm875_vm1, %v1559_v30, 0.0 }
 0x207   : > { %1594 = vadd.xlane.f32.xlu1 %v1593_v55  ;;  %v1174_v62 = vpop.f32.mrb[9].mxu0  ;;  %v1334_v63 = vpop.f32.mrb[9].mxu1  ;;  %v1180_v6 = vadd.f32 %v3255_v57, %v4063_v2  ;;  %v1340_v7 = vadd.f32 %v3303_v58, %v4063_v2  ;;  %v1530_v24 = vmul.f32 %v4071_v13, %v1460_v0  ;;  %v1562_v35 = vmul.f32 %v4071_v13, %v1492_v17 }
 0x208   : > { %v1175_v15 = vadd.f32 %v4063_v2, %v1174_v62  ;;  %v1335_v19 = vadd.f32 %v4063_v2, %v1334_v63  ;;  %v1529_v38 = vmul.f32 %v4071_v13, %v1459_v22  ;;  %v1561_v40 = vmul.f32 %v4071_v13, %v1491_v23 }
 0x209   : > { %v1462_v26 = vmax.f32 %v1180_v6, 0.0  ;;  %v1494_v27 = vmax.f32 %v1340_v7, 0.0  ;;  %v1608_v37 = vsel %vm875_vm1, %v1530_v24, 0.0  ;;  %v1704_v49 = vsel %vm875_vm1, %v1562_v35, 0.0 }
 0x20a   : > { %1693 = vadd.xlane.f32.xlu0 %v1692_v60  ;;  %v3258_v16 = vpop.f32.mrb[10].mxu0  ;;  %v3306_v10 = vpop.f32.mrb[10].mxu1  ;;  %v1461_v29 = vmax.f32 %v1175_v15, 0.0  ;;  %v1493_v34 = vmax.f32 %v1335_v19, 0.0  ;;  %v1605_v54 = vsel %vm875_vm1, %v1529_v38, 0.0  ;;  %v1701_v56 = vsel %vm875_vm1, %v1561_v40, 0.0 }
 0x20b   : > { %1603 = vadd.xlane.f32.xlu1 %v1602_v1  ;;  %v1184_v20 = vpop.f32.mrb[11].mxu0  ;;  %v1344_v21 = vpop.f32.mrb[11].mxu1  ;;  %v1190_v31 = vadd.f32 %v3258_v16, %v4063_v2  ;;  %v1350_v12 = vadd.f32 %v3306_v10, %v4063_v2  ;;  %v1532_v41 = vmul.f32 %v4071_v13, %v1462_v26  ;;  %v1564_v43 = vmul.f32 %v4071_v13, %v1494_v27 }
 0x20c   : > { %v1185_v39 = vadd.f32 %v4063_v2, %v1184_v20  ;;  %v1345_v42 = vadd.f32 %v4063_v2, %v1344_v21  ;;  %v1531_v45 = vmul.f32 %v4071_v13, %v1461_v29  ;;  %v1563_v51 = vmul.f32 %v4071_v13, %v1493_v34 }
 0x20d   : > { %v1464_v44 = vmax.f32 %v1190_v31, 0.0  ;;  %v1496_v50 = vmax.f32 %v1350_v12, 0.0  ;;  %v1614_v58 = vsel %vm875_vm1, %v1532_v41, 0.0  ;;  %v4139_v60 = vsel %vm875_vm1, %v1564_v43, 0.0 }
 0x20e   : > { %1690 = vadd.xlane.f32.xlu0 %v1689_v25  ;;  %v3261_v11 = vpop.f32.mrb[12].mxu0  ;;  %v3309_v32 = vpop.f32.mrb[12].mxu1  ;;  %v1463_v55 = vmax.f32 %v1185_v39, 0.0  ;;  %v1495_v59 = vmax.f32 %v1345_v42, 0.0  ;;  %v1611_v62 = vsel %vm875_vm1, %v1531_v45, 0.0  ;;  %v4155_v6 = vsel %vm875_vm1, %v1563_v51, 0.0 }
 0x20f   : > { %1600 = vadd.xlane.f32.xlu1 %v1599_v28  ;;  %v1194_v36 = vpop.f32.mrb[13].mxu0  ;;  %v1354_v14 = vpop.f32.mrb[13].mxu1  ;;  %v4142_v61 = vadd.f32 %v3261_v11, %v4063_v2  ;;  %v1534_v63 = vmul.f32 %v4071_v13, %v1464_v44  ;;  %v4147_v0 = vadd.f32 %v3309_v32, %v4063_v2  ;;  %v1566_v7 = vmul.f32 %v4071_v13, %v1496_v50 }
 0x210   : > { %v4152_v5 = vadd.f32 %v4063_v2, %v1194_v36  ;;  %v1533_v16 = vmul.f32 %v4071_v13, %v1463_v55  ;;  %v4167_v20 = vadd.f32 %v4063_v2, %v1354_v14  ;;  %v1565_v21 = vmul.f32 %v4071_v13, %v1495_v59 }
 0x211   : > { %v1466_v19 = vmax.f32 %v4142_v61, 0.0  ;;  %v1620_v23 = vsel %vm875_vm1, %v1534_v63, 0.0  ;;  %v1498_v24 = vmax.f32 %v4147_v0, 0.0  ;;  %v4173_v29 = vsel %vm875_vm1, %v1566_v7, 0.0 }
 0x212   : > { %1699 = vadd.xlane.f32.xlu0 %v1698_v33  ;;  %v4125_v46 = vpop.f32.mrb[14].mxu0  ;;  %v4127_v47 = vpop.f32.mrb[14].mxu1  ;;  %v1465_v14 = vmax.f32 %v4152_v5, 0.0  ;;  %v1497_v40 = vmax.f32 %v4167_v20, 0.0  ;;  %v4192_v41 = vsel %vm875_vm1, %v1565_v21, 0.0 }
 0x213   : > { %1609 = vadd.xlane.f32.xlu1 %v1608_v37  ;;  %v4132_v52 = vpop.f32.mrb[15].mxu0  ;;  %v1364_v53 = vpop.f32.mrb[15].mxu1  ;;  %v1617_v37 = vsel %vm875_vm1, %v1533_v16, 0.0  ;;  %v1210_v59 = vadd.f32 %v4125_v46, %v4063_v2  ;;  %v1536_v61 = vmul.f32 %v4071_v13, %v1466_v19  ;;  %v4216_v0 = vadd.f32 %v4127_v47, %v4063_v2 }
 0x214   : > { %v1365_v57 = vadd.f32 %v4063_v2, %v1364_v53 }
 0x216   : > { %1696 = vadd.xlane.f32.xlu0 %v1695_v48  ;;  %v1499_v1 = vmax.f32 %v1365_v57, 0.0  ;;  %v4149_v3 = vpop.f32.mrb[16].mxu0  ;;  %v3315_v4 = vpop.f32.mrb[16].mxu1 }
 0x217   : > { %1606 = vadd.xlane.f32.xlu1 %v1605_v54  ;;  %v1214_v8 = vpop.f32.mrb[17].mxu0  ;;  %v1380_v9 = vadd.f32 %v3315_v4, %v4063_v2  ;;  %v1374_v15 = vpop.f32.mrb[17].mxu1 }
 0x218   : > { %v1215_v10 = vadd.f32 %v4063_v2, %v1214_v8  ;;  %v1375_v17 = vadd.f32 %v4063_v2, %v1374_v15  ;;  %v4163_v18 = vmul.f32 %v4071_v13, %v1499_v1  ;;  %v1568_v1 = vmul.f32 %v4071_v13, %v1498_v24 }
 0x219   : > { %v1502_v22 = vmax.f32 %v1380_v9, 0.0 }
 0x21a   : > { %1705 = vadd.xlane.f32.xlu0 %v1704_v49  ;;  %v1469_v25 = vmax.f32 %v1215_v10, 0.0  ;;  %v1501_v26 = vmax.f32 %v1375_v17, 0.0  ;;  %v3270_v27 = vpop.f32.mrb[18].mxu0  ;;  %v3318_v28 = vpop.f32.mrb[18].mxu1 }
 0x21b   : > { %1615 = vadd.xlane.f32.xlu1 %v1614_v58  ;;  %v1230_v30 = vadd.f32 %v3270_v27, %v4063_v2  ;;  %v1224_v31 = vpop.f32.mrb[19].mxu0  ;;  %v1390_v11 = vadd.f32 %v3318_v28, %v4063_v2  ;;  %v1384_v32 = vpop.f32.mrb[19].mxu1  ;;  %v4178_v33 = vmul.f32 %v4071_v13, %v1502_v22  ;;  %v4237_v22 = vadd.f32 %v4063_v2, %v4132_v52 }
 0x21c   : > { %v1225_v34 = vadd.f32 %v4063_v2, %v1224_v31  ;;  %v4182_v35 = vmul.f32 %v4071_v13, %v1469_v25  ;;  %v1385_v12 = vadd.f32 %v4063_v2, %v1384_v32  ;;  %v4186_v36 = vmul.f32 %v4071_v13, %v1501_v26 }
 0x21d   : > { %v1472_v38 = vmax.f32 %v1230_v30, 0.0  ;;  %v1504_v39 = vmax.f32 %v1390_v11, 0.0  ;;  %v1468_v26 = vmax.f32 %v1210_v59, 0.0  ;;  %v1626_v27 = vsel %vm875_vm1, %v1536_v61, 0.0 }
 0x21e   : > { %1702 = vadd.xlane.f32.xlu0 %v1701_v56  ;;  %v1471_v42 = vmax.f32 %v1225_v34, 0.0  ;;  %v1503_v43 = vmax.f32 %v1385_v12, 0.0  ;;  %v3273_v44 = vpop.f32.mrb[20].mxu0  ;;  %v3321_v45 = vpop.f32.mrb[20].mxu1 }
 0x21f   : > { %1612 = vadd.xlane.f32.xlu1 %v1611_v62  ;;  %v1240_v48 = vadd.f32 %v3273_v44, %v4063_v2  ;;  %v4196_v49 = vmul.f32 %v4071_v13, %v1472_v38  ;;  %v1234_v50 = vpop.f32.mrb[21].mxu0  ;;  %v1400_v51 = vadd.f32 %v3321_v45, %v4063_v2  ;;  %v1394_v53 = vpop.f32.mrb[21].mxu1  ;;  %v4200_v54 = vmul.f32 %v4071_v13, %v1504_v39 }
 0x220   : > { %v1235_v55 = vadd.f32 %v4063_v2, %v1234_v50  ;;  %v4204_v56 = vmul.f32 %v4071_v13, %v1471_v42  ;;  %v1395_v57 = vadd.f32 %v4063_v2, %v1394_v53  ;;  %v4208_v58 = vmul.f32 %v4071_v13, %v1503_v43 }
 0x221   : > { %v1474_v62 = vmax.f32 %v1240_v48, 0.0  ;;  %v1506_v63 = vmax.f32 %v1400_v51, 0.0  ;;  %v1500_v43 = vmax.f32 %v4216_v0, 0.0  ;;  %v1722_v44 = vsel %vm875_vm1, %v1568_v1, 0.0 }
 0x222   : > { %1711 = vadd.xlane.f32.xlu0 %v4139_v60  ;;  %v1473_v4 = vmax.f32 %v1235_v55, 0.0  ;;  %v1505_v5 = vmax.f32 %v1395_v57, 0.0  ;;  %v3276_v7 = vpop.f32.mrb[22].mxu0  ;;  %v3324_v8 = vpop.f32.mrb[22].mxu1  ;;  %v1220_v50 = vadd.f32 %v4149_v3, %v4063_v2  ;;  %v1538_v51 = vmul.f32 %v4071_v13, %v1468_v26 }
 0x223   : > { %1621 = vadd.xlane.f32.xlu1 %v1620_v23  ;;  %v1250_v9 = vadd.f32 %v3276_v7, %v4063_v2  ;;  %v4221_v46 = vmul.f32 %v4071_v13, %v1474_v62  ;;  %v1244_v15 = vpop.f32.mrb[23].mxu0  ;;  %v1410_v16 = vadd.f32 %v3324_v8, %v4063_v2  ;;  %v1404_v60 = vpop.f32.mrb[23].mxu1  ;;  %v4225_v10 = vmul.f32 %v4071_v13, %v1506_v63 }
 0x224   : > { %v1245_v47 = vadd.f32 %v4063_v2, %v1244_v15  ;;  %v4229_v17 = vmul.f32 %v4071_v13, %v1473_v4  ;;  %v1405_v19 = vadd.f32 %v4063_v2, %v1404_v60  ;;  %v4233_v21 = vmul.f32 %v4071_v13, %v1505_v5 }
 0x225   : > { %v1535_v23 = vmul.f32 %v4071_v13, %v1465_v14  ;;  %v1476_v24 = vmax.f32 %v1250_v9, 0.0  ;;  %v1508_v25 = vmax.f32 %v1410_v16, 0.0  ;;  %v1467_v8 = vmax.f32 %v4237_v22, 0.0 }
 0x226   : > { %1708 = vadd.xlane.f32.xlu0 %v4155_v6  ;;  %v1475_v28 = vmax.f32 %v1245_v47, 0.0  ;;  %v1507_v30 = vmax.f32 %v1405_v19, 0.0  ;;  %v3279_v31 = vpop.f32.mrb[24].mxu0  ;;  %v3327_v11 = vpop.f32.mrb[24].mxu1  ;;  %v1470_v60 = vmax.f32 %v1220_v50, 0.0  ;;  %v1632_v47 = vsel %vm875_vm1, %v1538_v51, 0.0 }
 0x227   : > { %1618 = vadd.xlane.f32.xlu1 %v1617_v37  ;;  %v1260_v32 = vadd.f32 %v3279_v31, %v4063_v2  ;;  %v4244_v34 = vmul.f32 %v4071_v13, %v1476_v24  ;;  %v1254_v52 = vpop.f32.mrb[25].mxu0  ;;  %v1420_v12 = vadd.f32 %v3327_v11, %v4063_v2  ;;  %v1414_v14 = vpop.f32.mrb[25].mxu1  ;;  %v4248_v38 = vmul.f32 %v4071_v13, %v1508_v25 }
 0x228   : > { %v1255_v6 = vadd.f32 %v4063_v2, %v1254_v52  ;;  %v4252_v39 = vmul.f32 %v4071_v13, %v1475_v28  ;;  %v1415_v42 = vadd.f32 %v4063_v2, %v1414_v14  ;;  %v4256_v37 = vmul.f32 %v4071_v13, %v1507_v30 }
 0x229   : > { %v1478_v45 = vmax.f32 %v1260_v32, 0.0  ;;  %v1510_v48 = vmax.f32 %v1420_v12, 0.0  ;;  %v1623_v9 = vsel %vm875_vm1, %v1535_v23, 0.0  ;;  %v1567_v12 = vmul.f32 %v4071_v13, %v1497_v40 }
 0x22a   : > { %1717 = vadd.xlane.f32.xlu0 %v4173_v29  ;;  %v1477_v53 = vmax.f32 %v1255_v6, 0.0  ;;  %v1509_v55 = vmax.f32 %v1415_v42, 0.0  ;;  %v3282_v57 = vpop.f32.mrb[26].mxu0  ;;  %v3330_v59 = vpop.f32.mrb[26].mxu1  ;;  %v1570_v14 = vmul.f32 %v4071_v13, %v1500_v43 }
 0x22b   : > { %1627 = vadd.xlane.f32.xlu1 %v1626_v27  ;;  %v1270_v61 = vadd.f32 %v3282_v57, %v4063_v2  ;;  %v4266_v62 = vmul.f32 %v4071_v13, %v1478_v45  ;;  %v1264_v63 = vpop.f32.mrb[27].mxu0  ;;  %v1430_v0 = vadd.f32 %v3330_v59, %v4063_v2  ;;  %v1424_v1 = vpop.f32.mrb[27].mxu1  ;;  %v4270_v29 = vmul.f32 %v4071_v13, %v1510_v48 }
 0x22c   : > { %v1265_v3 = vadd.f32 %v4063_v2, %v1264_v63  ;;  %v4274_v4 = vmul.f32 %v4071_v13, %v1477_v53  ;;  %v1425_v5 = vadd.f32 %v4063_v2, %v1424_v1  ;;  %v4278_v7 = vmul.f32 %v4071_v13, %v1509_v55 }
 0x22d   : > { %v1480_v15 = vmax.f32 %v1270_v61, 0.0  ;;  %v1512_v16 = vmax.f32 %v1430_v0, 0.0  ;;  %v1537_v45 = vmul.f32 %v4071_v13, %v1467_v8  ;;  %v1540_v48 = vmul.f32 %v4071_v13, %v1470_v60 }
 0x22e   : > { %1714 = vadd.xlane.f32.xlu0 %v4192_v41  ;;  %v1479_v19 = vmax.f32 %v1265_v3, 0.0  ;;  %v1511_v24 = vmax.f32 %v1425_v5, 0.0  ;;  %v3285_v25 = vpop.f32.mrb[28].mxu0  ;;  %v3333_v26 = vpop.f32.mrb[28].mxu1  ;;  %v1719_v3 = vsel %vm875_vm1, %v1567_v12, 0.0  ;;  %v1728_v60 = vsel %vm875_vm1, %v1570_v14, 0.0 }
 0x22f   : > { %1624 = vadd.xlane.f32.xlu1 %v1623_v9  ;;  %v1280_v27 = vadd.f32 %v3285_v25, %v4063_v2  ;;  %v4286_v28 = vmul.f32 %v4071_v13, %v1480_v15  ;;  %v1274_v22 = vpop.f32.mrb[29].mxu0  ;;  %v1440_v23 = vadd.f32 %v3333_v26, %v4063_v2  ;;  %v1434_v30 = vpop.f32.mrb[29].mxu1  ;;  %v4290_v31 = vmul.f32 %v4071_v13, %v1512_v16  ;;  %v4396_v12 = vld [vmem:[#allocation2] ss:$0 sm:$0xff] }
 0x230   : > { %v1275_v41 = vadd.f32 %v4063_v2, %v1274_v22  ;;  %v4294_v11 = vmul.f32 %v4071_v13, %v1479_v19  ;;  %v1435_v32 = vadd.f32 %v4063_v2, %v1434_v30  ;;  %v4298_v52 = vmul.f32 %v4071_v13, %v1511_v24 }
 0x231   : > { %v1482_v6 = vmax.f32 %v1280_v27, 0.0  ;;  %v1514_v42 = vmax.f32 %v1440_v23, 0.0  ;;  %v1629_v9 = vsel %vm875_vm1, %v1537_v45, 0.0  ;;  %v1725_v26 = vsel %vm875_vm1, %v4163_v18, 0.0 }
 0x232   : > { %1723 = vadd.xlane.f32.xlu0 %v1722_v44  ;;  %v1481_v50 = vmax.f32 %v1275_v41, 0.0  ;;  %v1513_v51 = vmax.f32 %v1435_v32, 0.0  ;;  %v3288_v53 = vpop.f32.mrb[30].mxu0  ;;  %v3336_v55 = vpop.f32.mrb[30].mxu1  ;;  %v1635_v27 = vsel %vm875_vm1, %v4182_v35, 0.0  ;;  %v1734_v22 = vsel %vm875_vm1, %v4178_v33, 0.0 }
 0x233   : > { %1633 = vadd.xlane.f32.xlu1 %v1632_v47  ;;  %v1290_v57 = vadd.f32 %v3288_v53, %v4063_v2  ;;  %v4308_v20 = vmul.f32 %v4071_v13, %v1482_v6  ;;  %v1284_v40 = vpop.f32.mrb[31].mxu0  ;;  %v1450_v43 = vadd.f32 %v3336_v55, %v4063_v2  ;;  %v1444_v59 = vpop.f32.mrb[31].mxu1  ;;  %v4312_v44 = vmul.f32 %v4071_v13, %v1514_v42 }
 0x234   : > { %v1285_v61 = vadd.f32 %v4063_v2, %v1284_v40  ;;  %v4316_v63 = vmul.f32 %v4071_v13, %v1481_v50  ;;  %v1445_v0 = vadd.f32 %v4063_v2, %v1444_v59  ;;  %v4320_v1 = vmul.f32 %v4071_v13, %v1513_v51 }
 0x235   : > { %v1484_v5 = vmax.f32 %v1290_v57, 0.0  ;;  %v1516_v8 = vmax.f32 %v1450_v43, 0.0  ;;  %v1638_v2 = vsel %vm875_vm1, %v1540_v48, 0.0  ;;  %v1644_v23 = vsel %vm875_vm1, %v4196_v49, 0.0 }
 0x236   : > { %1720 = vadd.xlane.f32.xlu0 %v1719_v3  ;;  %v1483_v15 = vmax.f32 %v1285_v61, 0.0  ;;  %v1515_v16 = vmax.f32 %v1445_v0, 0.0  ;;  %v1641_v18 = vsel %vm875_vm1, %v4204_v56, 0.0  ;;  %v1740_v35 = vsel %vm875_vm1, %v4200_v54, 0.0 }
 0x237   : > { %1630 = vadd.xlane.f32.xlu1 %v1629_v9  ;;  %v1554_v47 = vmul.f32 %v4071_v13, %v1484_v5  ;;  %v4327_v19 = vmul.f32 %v4071_v13, %v1516_v8  ;;  %v1650_v30 = vsel %vm875_vm1, %v4221_v46, 0.0  ;;  %v1737_v33 = vsel %vm875_vm1, %v4208_v58, 0.0 }
 0x238   : > { %v1553_v24 = vmul.f32 %v4071_v13, %v1483_v15  ;;  %v4332_v25 = vmul.f32 %v4071_v13, %v1515_v16  ;;  %v1731_v13 = vsel %vm875_vm1, %v4186_v36, 0.0  ;;  %v1647_v36 = vsel %vm875_vm1, %v4229_v17, 0.0 }
 0x239   : > { %v1746_v49 = vsel %vm875_vm1, %v4225_v10, 0.0  ;;  %v1656_v56 = vsel %vm875_vm1, %v4244_v34, 0.0  ;;  %v1743_v54 = vsel %vm875_vm1, %v4233_v21, 0.0  ;;  %v1653_v58 = vsel %vm875_vm1, %v4252_v39, 0.0 }
 0x23a   : > { %1729 = vadd.xlane.f32.xlu0 %v1728_v60  ;;  %v1752_v46 = vsel %vm875_vm1, %v4248_v38, 0.0  ;;  %v1662_v17 = vsel %vm875_vm1, %v4266_v62, 0.0  ;;  %v1749_v10 = vsel %vm875_vm1, %v4256_v37, 0.0  ;;  %v1659_v21 = vsel %vm875_vm1, %v4274_v4, 0.0 }
 0x23b   : > { %1639 = vadd.xlane.f32.xlu1 %v1638_v2  ;;  %v1758_v34 = vsel %vm875_vm1, %v4270_v29, 0.0  ;;  %v1668_v39 = vsel %vm875_vm1, %v4286_v28, 0.0  ;;  %v1755_v38 = vsel %vm875_vm1, %v4278_v7, 0.0  ;;  %v1665_v37 = vsel %vm875_vm1, %v4294_v11, 0.0 }
 0x23c   : > { %v1764_v62 = vsel %vm875_vm1, %v4290_v31, 0.0  ;;  %v1674_v4 = vsel %vm875_vm1, %v4308_v20, 0.0  ;;  %v1761_v29 = vsel %vm875_vm1, %v4298_v52, 0.0  ;;  %v1671_v7 = vsel %vm875_vm1, %v4316_v63, 0.0 }
 0x23d   : > { %v1770_v28 = vsel %vm875_vm1, %v4312_v44, 0.0  ;;  %v1680_v41 = vsel %vm875_vm1, %v1554_v47, 0.0  ;;  %v1767_v31 = vsel %vm875_vm1, %v4320_v1, 0.0  ;;  %v1677_v11 = vsel %vm875_vm1, %v1553_v24, 0.0 }
 0x23e   : > { %1726 = vadd.xlane.f32.xlu0 %v1725_v26  ;;  %v1773_v32 = vsel %vm875_vm1, %v4332_v25, 0.0  ;;  %v1776_v52 = vsel %vm875_vm1, %v4327_v19, 0.0  ;;  %v2491_v26 = vlaneseq }
 0x23f   : > { %1636 = vadd.xlane.f32.xlu1 %v1635_v27 }
 0x242   : > { %1735 = vadd.xlane.f32.xlu0 %v1734_v22 }
 0x243   : > { %1645 = vadd.xlane.f32.xlu1 %v1644_v23 }
 0x246   : > { %1732 = vadd.xlane.f32.xlu0 %v1731_v13 }
 0x247   : > { %1642 = vadd.xlane.f32.xlu1 %v1641_v18 }
 0x24a   : > { %1741 = vadd.xlane.f32.xlu0 %v1740_v35 }
 0x24b   : > { %1651 = vadd.xlane.f32.xlu1 %v1650_v30 }
 0x24e   : > { %1738 = vadd.xlane.f32.xlu0 %v1737_v33 }
 0x24f   : > { %1648 = vadd.xlane.f32.xlu1 %v1647_v36 }
 0x252   : > { %1747 = vadd.xlane.f32.xlu0 %v1746_v49 }
 0x253   : > { %1657 = vadd.xlane.f32.xlu1 %v1656_v56  ;;  %v4438_v56 = vshrl.u32 %v2491_v26, 7 }
 0x255   : > { %5290 = vst [vmem:[#allocation9_spill] sm:$0xff] %v4438_v56  ;;  %v2498_v26 = vadd.s32 48, %v4438_v56 }
 0x256   : > { %1744 = vadd.xlane.f32.xlu0 %v1743_v54 }
 0x257   : > { %1654 = vadd.xlane.f32.xlu1 %v1653_v58 }
 0x25a   : > { %1753 = vadd.xlane.f32.xlu0 %v1752_v46 }
 0x25b   : > { %1663 = vadd.xlane.f32.xlu1 %v1662_v17 }
 0x25e   : > { %1750 = vadd.xlane.f32.xlu0 %v1749_v10 }
 0x25f   : > { %1660 = vadd.xlane.f32.xlu1 %v1659_v21 }
 0x262   : > { %1759 = vadd.xlane.f32.xlu0 %v1758_v34 }
 0x263   : > { %1669 = vadd.xlane.f32.xlu1 %v1668_v39 }
 0x266   : > { %1756 = vadd.xlane.f32.xlu0 %v1755_v38 }
 0x267   : > { %1666 = vadd.xlane.f32.xlu1 %v1665_v37 }
 0x26a   : > { %1765 = vadd.xlane.f32.xlu0 %v1764_v62 }
 0x26b   : > { %1675 = vadd.xlane.f32.xlu1 %v1674_v4  ;;  %v2493_v4 = vadd.s32 8, %v4438_v56 }
 0x26e   : > { %1762 = vadd.xlane.f32.xlu0 %v1761_v29 }
 0x26f   : > { %1672 = vadd.xlane.f32.xlu1 %v1671_v7  ;;  %v4449_v7 = vstv %s2884_s24 }
 0x270   : > { %5291 = vst [vmem:[#allocation10_spill] sm:$0xff] %v4449_v7 }
 0x272   : > { %1771 = vadd.xlane.f32.xlu0 %v1770_v28 }
 0x273   : > { %1681 = vadd.xlane.f32.xlu1 %v1680_v41 }
 0x276   : > { %1768 = vadd.xlane.f32.xlu0 %v1767_v31 }
 0x277   : > { %1678 = vadd.xlane.f32.xlu1 %v1677_v11 }
 0x27a   : > { %1774 = vadd.xlane.f32.xlu0 %v1773_v32 }
 0x27b   : > { %1777 = vadd.xlane.f32.xlu1 %v1776_v52  ;;  %v2495_v52 = vadd.s32 24, %v4438_v56 }
 0x28b   : > { %v1592_v14 = vpop.xlane.xlu0 %1591 }
 0x28c   : > { %v4399_v6 = vadd.f32 %v4396_v12, %v1592_v14  ;;  %v1685_v42 = vpop.xlane.xlu1 %1684 }
 0x28d   : > { %v4402_v45 = vadd.f32 %v4396_v12, %v1685_v42 }
 0x28e   : > { %v1850_v48 = vsub.f32 0.0, %v4399_v6 }
 0x28f   : > { %v2201_v50 = vand.u32 2147483647, %v4402_v45  ;;  %v1688_v51 = vpop.xlane.xlu0 %1687 }
 0x290   : > { %v1914_v53 = vand.u32 2147483647, %v1850_v48  ;;  %v4409_v55 = vadd.f32 %v4396_v12, %v1688_v51  ;;  %v1598_v57 = vpop.xlane.xlu1 %1597  ;;  %v4463_v51 = vadd.s32 %v4449_v7, %v4438_v56 }
 0x291   : > { %v2233_v20 = vsub.f32 0.0, %v2201_v50  ;;  %v4416_v3 = vadd.f32 %v4396_v12, %v1598_v57  ;;  %v4459_v50 = vadd.s32 %v4449_v7, %v2493_v4  ;;  %v2497_v57 = vadd.s32 40, %v4438_v56 }
 0x292   : > { %v1946_v40 = vsub.f32 0.0, %v1914_v53  ;;  %v2202_v43 = vand.u32 2147483647, %v4409_v55  ;;  %v2494_v53 = vadd.s32 16, %v4438_v56  ;;  %vm2557_vm3 = vcmp.lt.s32.totalorder %v4463_v51, 500 }
 0x293   : > { %v2265_v59 = vmul.f32 1.442695, %v2233_v20  ;;  %v1589_v44 = vpop.xlane.xlu0 %1588  ;;  %v1852_v47 = vsub.f32 0.0, %v4416_v3  ;;  %vm2558_vm2 = vcmp.lt.s32.totalorder %v4459_v50, 500  ;;  %v2509_v51 = vadd.s32 136, %v4438_v56 }
 0x294   : > { %v1979_v61 = vmul.f32 1.442695, %v1946_v40  ;;  %v2234_v63 = vsub.f32 0.0, %v2202_v43  ;;  %v4413_v0 = vadd.f32 %v4396_v12, %v1589_v44  ;;  %v1595_v1 = vpop.xlane.xlu1 %1594 }
 0x295   : > { %3425 = vpow2.f32 %v2265_v59  ;;  %v4426_v2 = vadd.f32 %v4396_v12, %v1595_v1  ;;  %v1916_v22 = vand.u32 2147483647, %v1852_v47  ;;  %v2496_v1 = vadd.s32 32, %v4438_v56 }
 0x296   : > { %3427 = vpow2.f32 %v1979_v61  ;;  %v2267_v5 = vmul.f32 1.442695, %v2234_v63  ;;  %v1849_v8 = vsub.f32 0.0, %v4413_v0  ;;  %v2505_v0 = vadd.s32 104, %v4438_v56 }
 0x297   : > { %v1694_v9 = vpop.xlane.xlu0 %1693  ;;  %v1851_v13 = vsub.f32 0.0, %v4426_v2  ;;  %v1948_v17 = vsub.f32 0.0, %v1916_v22 }
 0x298   : > { %3429 = vpow2.f32 %v2267_v5  ;;  %v1913_v15 = vand.u32 2147483647, %v1849_v8  ;;  %v4422_v16 = vadd.f32 %v4396_v12, %v1694_v9  ;;  %v1604_v60 = vpop.xlane.xlu1 %1603  ;;  %v4473_v9 = vadd.s32 %v4449_v7, %v2495_v52 }
 0x299   : > { %v4436_v35 = vadd.f32 %v4396_v12, %v1604_v60  ;;  %v1915_v10 = vand.u32 2147483647, %v1851_v13  ;;  %v1983_v31 = vmul.f32 1.442695, %v1948_v17 }
 0x29a   : > { %v1945_v19 = vsub.f32 0.0, %v1913_v15  ;;  %v2204_v24 = vand.u32 2147483647, %v4422_v16  ;;  %vm2560_vm5 = vcmp.lt.s32.totalorder %v4473_v9, 500 }
 0x29b   : > { %v1691_v25 = vpop.xlane.xlu0 %1690  ;;  %v1854_v34 = vsub.f32 0.0, %v4436_v35  ;;  %v1947_v11 = vsub.f32 0.0, %v1915_v10  ;;  %v2500_v10 = vadd.s32 64, %v4438_v56 }
 0x29c   : > { %v1977_v27 = vmul.f32 1.442695, %v1945_v19  ;;  %v4432_v23 = vadd.f32 %v4396_v12, %v1691_v25  ;;  %v2236_v18 = vsub.f32 0.0, %v2204_v24  ;;  %v1601_v30 = vpop.xlane.xlu1 %1600  ;;  %v4481_v19 = vadd.s32 %v4449_v7, %v2494_v53 }
 0x29d   : > { %v4446_v37 = vadd.f32 %v4396_v12, %v1601_v30  ;;  %v1918_v32 = vand.u32 2147483647, %v1854_v34  ;;  %v1981_v61 = vmul.f32 1.442695, %v1947_v11  ;;  %v4484_v24 = vadd.s32 %v4449_v7, %v2497_v57 }
 0x29e   : > { %3431 = vpow2.f32 %v1977_v27  ;;  %v2203_v58 = vand.u32 2147483647, %v4432_v23  ;;  %v2271_v21 = vmul.f32 1.442695, %v2236_v18  ;;  %v2499_v25 = vadd.s32 56, %v4438_v56 }
 0x29f   : > { %v3426_v33 = vpop.eup %3425  ;;  %v1700_v36 = vpop.xlane.xlu0 %1699  ;;  %v1853_v14 = vsub.f32 0.0, %v4446_v37  ;;  %v1950_v63 = vsub.f32 0.0, %v1918_v32  ;;  %v1882_v53 = vmax.f32 %v1850_v48, 0.0  ;;  %v4611_v2 = vmax.f32 %v1854_v34, 0.0 }
 0x2a0   : > { %v3428_v49 = vpop.eup %3427  ;;  %v2329_v39 = vadd.f32 1.0, %v3426_v33  ;;  %v1610_v29 = vpop.xlane.xlu1 %1609  ;;  %v2235_v28 = vsub.f32 0.0, %v2203_v58  ;;  %v4452_v41 = vadd.f32 %v4396_v12, %v1700_v36  ;;  %v4493_v36 = vadd.s32 %v4449_v7, %v2496_v1 }
 0x2a1   : > { %v2042_v54 = vadd.f32 1.0, %v3428_v49  ;;  %v1917_v15 = vand.u32 2147483647, %v1853_v14  ;;  %v4478_v60 = vadd.f32 %v4396_v12, %v1610_v29  ;;  %v1987_v33 = vmul.f32 1.442695, %v1950_v63 }
 0x2a2   : > { %v3430_v46 = vpop.eup %3429  ;;  %v2269_v43 = vmul.f32 1.442695, %v2235_v28  ;;  %v2206_v59 = vand.u32 2147483647, %v4452_v41  ;;  %v4504_v29 = vadd.s32 %v4449_v7, %v2499_v25  ;;  %vm2559_vm6 = vcmp.lt.s32.totalorder %v4481_v19, 500 }
 0x2a3   : > { %3433 = vlog2.f32 %v2042_v54  ;;  %v2330_v38 = vadd.f32 1.0, %v3430_v46  ;;  %v1697_v62 = vpop.xlane.xlu0 %1696  ;;  %v2501_v54 = vadd.s32 72, %v4438_v56  ;;  %v1949_v46 = vsub.f32 0.0, %v1917_v15 }
 0x2a4   : > { %v4469_v44 = vadd.f32 %v4396_v12, %v1697_v62  ;;  %v1607_v5 = vpop.xlane.xlu1 %1606  ;;  %v2238_v22 = vsub.f32 0.0, %v2206_v59  ;;  %v1856_v17 = vsub.f32 0.0, %v4478_v60  ;;  %v2170_v62 = vmax.f32 %v4409_v55, 0.0 }
 0x2a5   : > { %3435 = vlog2.f32 %v2330_v38  ;;  %v4490_v30 = vadd.f32 %v4396_v12, %v1607_v5  ;;  %v4514_v57 = vadd.s32 %v4449_v7, %v2501_v54  ;;  %v4519_v59 = vadd.s32 %v4449_v7, %v2500_v10 }
 0x2a6   : > { %3437 = vpow2.f32 %v2271_v21  ;;  %v2205_v18 = vand.u32 2147483647, %v4469_v44  ;;  %v2503_v21 = vadd.s32 88, %v4438_v56  ;;  %v1881_v54 = vmax.f32 %v1849_v8, 0.0 }
 0x2a7   : > { %3439 = vlog2.f32 %v2329_v39  ;;  %v1706_v20 = vpop.xlane.xlu0 %1705  ;;  %v1855_v32 = vsub.f32 0.0, %v4490_v30  ;;  %vm2562_vm7 = vcmp.lt.s32.totalorder %v4484_v24, 500  ;;  %vm2561_vm8 = vcmp.lt.s32.totalorder %v4493_v36, 500 }
 0x2a8   : > { %v3432_v42 = vpop.eup %3431  ;;  %3441 = vpow2.f32 %v1983_v31  ;;  %v2275_v31 = vmul.f32 1.442695, %v2238_v22  ;;  %v2237_v11 = vsub.f32 0.0, %v2205_v18  ;;  %v1616_v52 = vpop.xlane.xlu1 %1615  ;;  %v4525_v5 = vadd.f32 %v4396_v12, %v1706_v20 }
 0x2a9   : > { %v2041_v40 = vadd.f32 1.0, %v3432_v42  ;;  %v4509_v42 = vadd.s32 %v4449_v7, %v2498_v26  ;;  %v4532_v22 = vadd.f32 %v4396_v12, %v1616_v52  ;;  %v2169_v18 = vmax.f32 %v4402_v45, 0.0 }
 0x2aa   : > { %v2273_v26 = vmul.f32 1.442695, %v2237_v11  ;;  %vm2564_vm9 = vcmp.lt.s32.totalorder %v4504_v29, 500  ;;  %vm2565_vm11 = vcmp.lt.s32.totalorder %v4519_v59, 500  ;;  %vm2566_vm12 = vcmp.lt.s32.totalorder %v4514_v57, 500 }
 0x2ab   : > { %3443 = vlog2.f32 %v2041_v40  ;;  %v4495_v49 = vpop.xlane.xlu0 %1702  ;;  %v1985_v40 = vmul.f32 1.442695, %v1949_v46  ;;  %vm2563_vm10 = vcmp.lt.s32.totalorder %v4509_v42, 500 }
 0x2ac   : > { %3445 = vpow2.f32 %v2269_v43  ;;  %v1920_v43 = vand.u32 2147483647, %v1856_v17 }
 0x2ad   : > { %v3434_v27 = vpop.eup %3433  ;;  %3447 = vpow2.f32 %v1981_v61  ;;  %v4522_v61 = vadd.s32 %v4449_v7, %v2503_v21  ;;  %v1613_v21 = vpop.xlane.xlu1 %1612 }
 0x2ae   : > { %v2076_v38 = vmul.f32 0.6931472, %v3434_v27  ;;  %3449 = vpow2.f32 %v1987_v33  ;;  %v1919_v27 = vand.u32 2147483647, %v1855_v32  ;;  %v1952_v10 = vsub.f32 0.0, %v1920_v43 }
 0x2af   : > { %v3436_v58 = vpop.eup %3435  ;;  %v4527_v15 = vpop.xlane.xlu0 %1711  ;;  %3451 = vpow2.f32 %v2275_v31  ;;  %v5268_v31 = vsub.f32 0.0, %v4532_v22  ;;  %v4546_v43 = vadd.f32 %v4396_v12, %v4495_v49  ;;  %vm2568_vm13 = vcmp.lt.s32.totalorder %v4522_v61, 500 }
 0x2b0   : > { %v3438_v39 = vpop.eup %3437  ;;  %v2364_v4 = vmul.f32 0.6931472, %v3436_v58  ;;  %v2138_v1 = vadd.f32 %v2076_v38, %v1882_v53  ;;  %3453 = vpow2.f32 %v1985_v40  ;;  %v1951_v45 = vsub.f32 0.0, %v1919_v27 }
 0x2b1   : > { %v3440_v28 = vpop.eup %3439  ;;  %v2332_v48 = vadd.f32 1.0, %v3438_v39  ;;  %v2502_v39 = vadd.s32 80, %v4438_v56  ;;  %v4556_v49 = vpop.xlane.xlu1 %1621  ;;  %v4606_v3 = vadd.f32 %v4396_v12, %v4527_v15  ;;  %v2510_v15 = vadd.s32 144, %v4438_v56 }
 0x2b2   : > { %v2426_v55 = vadd.f32 %v2364_v4, %v2170_v62  ;;  %v3442_v63 = vpop.eup %3441  ;;  %v2362_v6 = vmul.f32 0.6931472, %v3440_v28  ;;  %v2208_v28 = vand.u32 2147483647, %v4525_v5  ;;  %v4633_v35 = vadd.f32 %v4396_v12, %v4556_v49 }
 0x2b3   : > { %v2044_v46 = vadd.f32 1.0, %v3442_v63  ;;  %3455 = vlog2.f32 %v2332_v48  ;;  %v1709_v53 = vpop.xlane.xlu0 %1708  ;;  %v2507_v63 = vadd.s32 120, %v4438_v56  ;;  %v1991_v48 = vmul.f32 1.442695, %v1952_v10 }
 0x2b4   : > { %v2458_v33 = vadd.f32 %v2426_v55, %v2138_v1  ;;  %v2425_v62 = vadd.f32 %v2362_v6, %v2169_v18  ;;  %3457 = vpow2.f32 %v2273_v26  ;;  %v2504_v55 = vadd.s32 96, %v4438_v56 }
 0x2b5   : > { %v3444_v25 = vpop.eup %3443  ;;  %3459 = vlog2.f32 %v2044_v46  ;;  %v2240_v50 = vsub.f32 0.0, %v2208_v28  ;;  %v1989_v18 = vmul.f32 1.442695, %v1951_v45  ;;  %v2207_v10 = vand.u32 2147483647, %v4546_v43 }
 0x2b6   : > { %v2074_v58 = vmul.f32 0.6931472, %v3444_v25  ;;  %v3446_v20 = vpop.eup %3445  ;;  %v2590_v8 = vsel %vm2558_vm2, %v2458_v33, 0.0  ;;  %v2506_v25 = vadd.s32 112, %v4438_v56  ;;  %v1922_v33 = vand.u32 2147483647, %v5268_v31 }
 0x2b7   : > { %v3448_v38 = vpop.eup %3447  ;;  %v2331_v52 = vadd.f32 1.0, %v3446_v20  ;;  %v2624_v26 = vsel %vm2622_vm4, %v2590_v8, 0.0  ;;  %v4569_v28 = vadd.s32 %v4449_v7, %v2502_v39  ;;  %v4572_v45 = vadd.s32 %v4449_v7, %v2505_v0 }
 0x2b8   : > { %v2137_v4 = vadd.f32 %v2074_v58, %v1881_v54  ;;  %v2043_v40 = vadd.f32 1.0, %v3448_v38  ;;  %v3450_v1 = vpop.eup %3449  ;;  %v2508_v58 = vadd.s32 128, %v4438_v56  ;;  %v4564_v38 = vadd.f32 %v4396_v12, %v1613_v21 }
 0x2b9   : > { %3461 = vlog2.f32 %v2331_v52  ;;  %v3452_v20 = vpop.eup %3451  ;;  %v2046_v46 = vadd.f32 1.0, %v3450_v1  ;;  %v4575_v52 = vadd.s32 %v4449_v7, %v2504_v55  ;;  %v4585_v39 = vadd.s32 %v4449_v7, %v2509_v51  ;;  %v4588_v55 = vpop.xlane.xlu1 %1618 }
 0x2ba   : > { %v2457_v11 = vadd.f32 %v2425_v62, %v2137_v4  ;;  %3463 = vlog2.f32 %v2043_v40  ;;  %v2279_v62 = vmul.f32 1.442695, %v2240_v50  ;;  %v4566_v4 = vpop.xlane.xlu0 %1717  ;;  %v3454_v8 = vpop.eup %3453  ;;  %v2511_v40 = vadd.s32 152, %v4438_v56 }
 0x2bb   : > { %3465 = vpow2.f32 %v1991_v48  ;;  %v2334_v1 = vadd.f32 1.0, %v3452_v20  ;;  %v4582_v48 = vadd.s32 %v4449_v7, %v2506_v25  ;;  %5292 = vst [vmem:[#allocation11_spill] sm:$0xff] %v4585_v39  ;;  %v2239_v50 = vsub.f32 0.0, %v2207_v10 }
 0x2bc   : > { %v2589_v6 = vsel %vm2557_vm3, %v2457_v11, 0.0  ;;  %3467 = vpow2.f32 %v1989_v18  ;;  %v1954_v11 = vsub.f32 0.0, %v1922_v33  ;;  %v2045_v18 = vadd.f32 1.0, %v3454_v8 }
 0x2bd   : > { %v2623_v27 = vsel %vm2622_vm4, %v2589_v6, 0.0  ;;  %v3456_v21 = vpop.eup %3455  ;;  %v4579_v6 = vadd.s32 %v4449_v7, %v2507_v63  ;;  %3469 = vlog2.f32 %v2046_v46  ;;  %v1884_v63 = vmax.f32 %v1852_v47, 0.0  ;;  %v4624_v34 = vpop.xlane.xlu1 %1627 }
 0x2be   : > { %v4558_v54 = vadd.f32 %v2624_v26, %v2623_v27  ;;  %v3458_v0 = vpop.eup %3457  ;;  %v5269_v26 = vsub.f32 0.0, %v4564_v38  ;;  %v4591_v27 = vadd.s32 %v4449_v7, %v2508_v58  ;;  %3471 = vpow2.f32 %v2279_v62  ;;  %v1715_v47 = vpop.xlane.xlu0 %1714 }
 0x2bf   : > { %v4596_v25 = vadd.f32 %v4396_v12, %v1709_v53  ;;  %v3460_v33 = vpop.eup %3459  ;;  %v1883_v51 = vmax.f32 %v1851_v13, 0.0  ;;  %v2172_v20 = vmax.f32 %v4422_v16, 0.0  ;;  %v1995_v46 = vmul.f32 1.442695, %v1954_v11 }
 0x2c0   : > { %5293 = vst [vmem:[#allocation12_spill] sm:$0xff] %v4591_v27  ;;  %v4602_v10 = vadd.s32 %v4449_v7, %v2511_v40  ;;  %v2368_v58 = vmul.f32 0.6931472, %v3456_v21  ;;  %3473 = vlog2.f32 %v2334_v1  ;;  %v2333_v31 = vadd.f32 1.0, %v3458_v0 }
 0x2c1   : > { %v2171_v16 = vmax.f32 %v4432_v23, 0.0  ;;  %v2277_v13 = vmul.f32 1.442695, %v2239_v50  ;;  %v1921_v53 = vand.u32 2147483647, %v5269_v26  ;;  %3475 = vlog2.f32 %v2045_v18 }
 0x2c2   : > { %5294 = vst [vmem:[#allocation13_spill] sm:$0xff] %v4602_v10  ;;  %v2080_v8 = vmul.f32 0.6931472, %v3460_v33  ;;  %v2209_v11 = vand.u32 2147483647, %v4596_v25  ;;  %v4620_v21 = vmax.f32 %v1853_v14, 0.0  ;;  %3477 = vpow2.f32 %v1995_v46 }
 0x2c3   : > { %v3462_v62 = vpop.eup %3461  ;;  %v2428_v0 = vadd.f32 %v2368_v58, %v2172_v20  ;;  %v4628_v50 = vmax.f32 %v1856_v17, 0.0  ;;  %3479 = vlog2.f32 %v2333_v31  ;;  %v2210_v18 = vand.u32 2147483647, %v4606_v3  ;;  %v4640_v17 = vpop.xlane.xlu0 %1723 }
 0x2c4   : > { %v3464_v40 = vpop.eup %3463  ;;  %v2366_v37 = vmul.f32 0.6931472, %v3462_v62  ;;  %3481 = vpow2.f32 %v2277_v13  ;;  %v1953_v14 = vsub.f32 0.0, %v1921_v53  ;;  %v2140_v46 = vadd.f32 %v2080_v8, %v1884_v63 }
 0x2c5   : > { %v3466_v1 = vpop.eup %3465  ;;  %v4638_v20 = vmax.f32 %v1855_v32, 0.0  ;;  %v2241_v60 = vsub.f32 0.0, %v2209_v11  ;;  %v4643_v31 = vadd.s32 %v4449_v7, %v2510_v15  ;;  %v2078_v13 = vmul.f32 0.6931472, %v3464_v40 }
 0x2c6   : > { %v3468_v33 = vpop.eup %3467  ;;  %v2048_v53 = vadd.f32 1.0, %v3466_v1  ;;  %v4648_v49 = vadd.f32 %v4396_v12, %v4566_v4  ;;  %v2460_v8 = vadd.f32 %v2428_v0, %v2140_v46  ;;  %v5296_v32 = vsub.f32 0.0, %v4532_v22  ;;  %v1625_v1 = vpop.xlane.xlu1 %1624 }
 0x2c7   : > { %5295 = vst [vmem:[#allocation14_spill] sm:$0xff] %v4643_v31  ;;  %v3470_v58 = vpop.eup %3469  ;;  %v2047_v30 = vadd.f32 1.0, %v3468_v33  ;;  %v2242_v23 = vsub.f32 0.0, %v2210_v18  ;;  %v2427_v26 = vadd.f32 %v2366_v37, %v2171_v16  ;;  %v1993_v31 = vmul.f32 1.442695, %v1953_v14 }
 0x2c8   : > { %v3472_v63 = vpop.eup %3471  ;;  %v4652_v11 = vmax.f32 %v5296_v32, 0.0  ;;  %v1860_v40 = vsub.f32 0.0, %v4633_v35  ;;  %v2084_v10 = vmul.f32 0.6931472, %v3470_v58  ;;  %v5297_v4 = vsub.f32 0.0, %v4564_v38  ;;  %v1721_v38 = vpop.xlane.xlu0 %1720 }
 0x2c9   : > { %v2281_v0 = vmul.f32 1.442695, %v2241_v60  ;;  %v1795_v22 = vadd.f32 %v4396_v12, %v4588_v55  ;;  %v2139_v33 = vadd.f32 %v2078_v13, %v1883_v51  ;;  %3483 = vlog2.f32 %v2048_v53 }
 0x2ca   : > { %v3474_v62 = vpop.eup %3473  ;;  %v4658_v7 = vmax.f32 %v5297_v4, 0.0  ;;  %v2336_v18 = vadd.f32 1.0, %v3472_v63  ;;  %v2212_v16 = vand.u32 2147483647, %v4648_v49  ;;  %v2592_v35 = vsel %vm2560_vm5, %v2460_v8, 0.0 }
 0x2cb   : > { %v3476_v37 = vpop.eup %3475  ;;  %3485 = vlog2.f32 %v2047_v30  ;;  %v2283_v14 = vmul.f32 1.442695, %v2242_v23  ;;  %v4666_v46 = vadd.f32 %v4396_v12, %v1715_v47  ;;  %v2459_v60 = vadd.f32 %v2427_v26, %v2139_v33  ;;  %v1634_v30 = vpop.xlane.xlu1 %1633 }
 0x2cc   : > { %v3478_v58 = vpop.eup %3477  ;;  %v2372_v32 = vmul.f32 0.6931472, %v3474_v62  ;;  %3487 = vpow2.f32 %v1993_v31  ;;  %v1924_v55 = vand.u32 2147483647, %v1860_v40  ;;  %v2142_v13 = vadd.f32 %v2084_v10, %v4611_v2  ;;  %v1730_v19 = vpop.xlane.xlu0 %1729 }
 0x2cd   : > { %v3480_v51 = vpop.eup %3479  ;;  %3489 = vpow2.f32 %v2281_v0  ;;  %v1859_v63 = vsub.f32 0.0, %v1795_v22  ;;  %v4671_v8 = vsel %vm2622_vm4, %v2592_v35, 0.0  ;;  %v2082_v23 = vmul.f32 0.6931472, %v3476_v37 }
 0x2ce   : > { %v3482_v9 = vpop.eup %3481  ;;  %3491 = vlog2.f32 %v2336_v18  ;;  %v2244_v47 = vsub.f32 0.0, %v2212_v16  ;;  %v2050_v4 = vadd.f32 1.0, %v3478_v58  ;;  %v2211_v26 = vand.u32 2147483647, %v4666_v46 }
 0x2cf   : > { %3493 = vpow2.f32 %v2283_v14  ;;  %v4675_v31 = vadd.f32 %v4396_v12, %v1625_v1  ;;  %v2591_v10 = vsel %vm2559_vm6, %v2459_v60, 0.0  ;;  %v5298_v2 = vmax.f32 %v4452_v41, 0.0 }
 0x2d0   : > { %v2370_v0 = vmul.f32 0.6931472, %v3480_v51  ;;  %v1956_v22 = vsub.f32 0.0, %v1924_v55  ;;  %v2335_v33 = vadd.f32 1.0, %v3482_v9  ;;  %v1923_v18 = vand.u32 2147483647, %v1859_v63  ;;  %v1631_v9 = vpop.xlane.xlu1 %1630 }
 0x2d1   : > { %v2430_v62 = vadd.f32 %v2372_v32, %v5298_v2  ;;  %v4685_v16 = vadd.f32 %v4396_v12, %v4624_v34  ;;  %v4688_v1 = vadd.f32 %v4396_v12, %v1721_v38  ;;  %v2141_v37 = vadd.f32 %v2082_v23, %v4620_v21 }
 0x2d2   : > { %v4691_v41 = vmax.f32 %v1860_v40, 0.0  ;;  %v2287_v35 = vmul.f32 1.442695, %v2244_v47  ;;  %v4695_v14 = vadd.f32 %v4396_v12, %v4640_v17  ;;  %3495 = vlog2.f32 %v2050_v4 }
 0x2d3   : > { %v2243_v60 = vsub.f32 0.0, %v2211_v26  ;;  %v5274_v34 = vsub.f32 0.0, %v4675_v31  ;;  %v3484_v32 = vpop.eup %3483  ;;  %v2626_v38 = vsel %vm2622_vm4, %v2591_v10, 0.0  ;;  %v2462_v55 = vadd.f32 %v2430_v62, %v2142_v13 }
 0x2d4   : > { %v5299_v51 = vmax.f32 %v4469_v44, 0.0  ;;  %v1999_v40 = vmul.f32 1.442695, %v1956_v22  ;;  %3497 = vlog2.f32 %v2335_v33  ;;  %v1955_v47 = vsub.f32 0.0, %v1923_v18  ;;  %v1727_v33 = vpop.xlane.xlu0 %1726 }
 0x2d5   : > { %v3486_v23 = vpop.eup %3485  ;;  %v5281_v17 = vsub.f32 0.0, %v4685_v16  ;;  %v2213_v4 = vand.u32 2147483647, %v4688_v1  ;;  %v4704_v26 = vmax.f32 %v1859_v63, 0.0  ;;  %3499 = vpow2.f32 %v2287_v35 }
 0x2d6   : > { %v2429_v21 = vadd.f32 %v2370_v0, %v5299_v51  ;;  %v3488_v2 = vpop.eup %3487  ;;  %v2214_v53 = vand.u32 2147483647, %v4695_v14  ;;  %v4708_v13 = vadd.f32 %v4396_v12, %v1634_v30  ;;  %v2285_v10 = vmul.f32 1.442695, %v2243_v60 }
 0x2d7   : > { %v3490_v44 = vpop.eup %3489  ;;  %v1925_v62 = vand.u32 2147483647, %v5274_v34  ;;  %v4713_v0 = vadd.f32 %v4396_v12, %v1631_v9  ;;  %v4716_v22 = vadd.f32 %v4396_v12, %v1730_v19  ;;  %v2627_v18 = vadd.f32 %v2626_v38, %v4558_v54  ;;  %v1640_v19 = vpop.xlane.xlu1 %1639 }
 0x2d8   : > { %v3492_v63 = vpop.eup %3491  ;;  %v2088_v35 = vmul.f32 0.6931472, %v3484_v32  ;;  %v2461_v51 = vadd.f32 %v2429_v21, %v2141_v37  ;;  %3501 = vpow2.f32 %v1999_v40  ;;  %v2049_v58 = vadd.f32 1.0, %v3488_v2 }
 0x2d9   : > { %v3494_v30 = vpop.eup %3493  ;;  %v1997_v15 = vmul.f32 1.442695, %v1955_v47  ;;  %v1926_v60 = vand.u32 2147483647, %v5281_v17  ;;  %v2245_v34 = vsub.f32 0.0, %v2213_v4  ;;  %v2337_v27 = vadd.f32 1.0, %v3490_v44 }
 0x2da   : > { %v2246_v9 = vsub.f32 0.0, %v2214_v53  ;;  %v5279_v56 = vsub.f32 0.0, %v4708_v13  ;;  %v4723_v39 = vadd.f32 %v4396_v12, %v1727_v33  ;;  %3503 = vpow2.f32 %v2285_v10 }
 0x2db   : > { %v1957_v54 = vsub.f32 0.0, %v1925_v62  ;;  %v5280_v37 = vsub.f32 0.0, %v4713_v0  ;;  %v2216_v32 = vand.u32 2147483647, %v4716_v22  ;;  %v2594_v38 = vsel %vm2562_vm7, %v2462_v55, 0.0 }
 0x2dc   : > { %v2593_v21 = vsel %vm2561_vm8, %v2461_v51, 0.0  ;;  %v2376_v40 = vmul.f32 0.6931472, %v3492_v63  ;;  %v2338_v53 = vadd.f32 1.0, %v3494_v30  ;;  %v3496_v47 = vpop.eup %3495  ;;  %3505 = vpow2.f32 %v1997_v15 }
 0x2dd   : > { %v1958_v4 = vsub.f32 0.0, %v1926_v60  ;;  %v2289_v2 = vmul.f32 1.442695, %v2245_v34  ;;  %v4732_v44 = vadd.f32 %v4396_v12, %v1640_v19  ;;  %3507 = vlog2.f32 %v2337_v27  ;;  %v1637_v60 = vpop.xlane.xlu1 %1636 }
 0x2de   : > { %v2291_v10 = vmul.f32 1.442695, %v2246_v9  ;;  %v1928_v62 = vand.u32 2147483647, %v5279_v56  ;;  %v2215_v24 = vand.u32 2147483647, %v4723_v39  ;;  %v3498_v55 = vpop.eup %3497  ;;  %3509 = vlog2.f32 %v2049_v58  ;;  %v1736_v9 = vpop.xlane.xlu0 %1735 }
 0x2df   : > { %v2001_v36 = vmul.f32 1.442695, %v1957_v54  ;;  %v1927_v15 = vand.u32 2147483647, %v5280_v37  ;;  %v2248_v33 = vsub.f32 0.0, %v2216_v32  ;;  %v3500_v34 = vpop.eup %3499  ;;  %v4741_v63 = vsel %vm2622_vm4, %v2594_v38, 0.0 }
 0x2e0   : > { %v2086_v27 = vmul.f32 0.6931472, %v3486_v23  ;;  %v5300_v51 = vmax.f32 %v4525_v5, 0.0  ;;  %3511 = vlog2.f32 %v2338_v53  ;;  %v2003_v19 = vmul.f32 1.442695, %v1958_v4 }
 0x2e1   : > { %3513 = vpow2.f32 %v2289_v2  ;;  %v5282_v58 = vsub.f32 0.0, %v4732_v44  ;;  %v2247_v54 = vsub.f32 0.0, %v2215_v24  ;;  %v2630_v37 = vsel %vm2622_vm4, %v2593_v21, 0.0 }
 0x2e2   : > { %v2432_v30 = vadd.f32 %v2376_v40, %v5300_v51  ;;  %v3502_v56 = vpop.eup %3501  ;;  %v2374_v32 = vmul.f32 0.6931472, %v3498_v55  ;;  %3515 = vpow2.f32 %v2291_v10  ;;  %v1960_v17 = vsub.f32 0.0, %v1928_v62 }
 0x2e3   : > { %3517 = vpow2.f32 %v2001_v36  ;;  %v1959_v38 = vsub.f32 0.0, %v1927_v15  ;;  %v2295_v23 = vmul.f32 1.442695, %v2248_v33  ;;  %v4748_v5 = vadd.f32 %v4396_v12, %v1637_v60 }
 0x2e4   : > { %v2144_v40 = vadd.f32 %v2088_v35, %v4628_v50  ;;  %v2629_v53 = vadd.f32 %v4671_v8, %v2627_v18  ;;  %v2180_v4 = vmax.f32 %v4648_v49, 0.0  ;;  %v2340_v2 = vadd.f32 1.0, %v3500_v34  ;;  %v3504_v24 = vpop.eup %3503  ;;  %v1733_v8 = vpop.xlane.xlu0 %1732 }
 0x2e5   : > { %3519 = vpow2.f32 %v2003_v19  ;;  %v1930_v21 = vand.u32 2147483647, %v5282_v58  ;;  %v2293_v10 = vmul.f32 1.442695, %v2247_v54  ;;  %v4757_v62 = vadd.f32 %v4396_v12, %v1736_v9 }
 0x2e6   : > { %v2631_v55 = vadd.f32 %v2630_v37, %v2629_v53  ;;  %v2143_v36 = vadd.f32 %v2086_v27, %v4638_v20  ;;  %v2464_v50 = vadd.f32 %v2432_v30, %v2144_v40  ;;  %v2007_v35 = vmul.f32 1.442695, %v1960_v17  ;;  %v3506_v18 = vpop.eup %3505  ;;  %v1646_v17 = vpop.xlane.xlu1 %1645 }
 0x2e7   : > { %v5301_v15 = vmax.f32 %v4546_v43, 0.0  ;;  %v2005_v34 = vmul.f32 1.442695, %v1959_v38  ;;  %3521 = vpow2.f32 %v2295_v23  ;;  %v1865_v51 = vsub.f32 0.0, %v4748_v5  ;;  %v3508_v60 = vpop.eup %3507 }
 0x2e8   : > { %v2092_v19 = vmul.f32 0.6931472, %v3496_v47  ;;  %v2052_v54 = vadd.f32 1.0, %v3502_v56  ;;  %3523 = vlog2.f32 %v2340_v2  ;;  %v2339_v9 = vadd.f32 1.0, %v3504_v24  ;;  %v3510_v58 = vpop.eup %3509 }
 0x2e9   : > { %v2431_v33 = vadd.f32 %v2374_v32, %v5301_v15  ;;  %v1962_v37 = vsub.f32 0.0, %v1930_v21  ;;  %3525 = vpow2.f32 %v2293_v10  ;;  %v2218_v20 = vand.u32 2147483647, %v4757_v62 }
 0x2ea   : > { %v4765_v27 = vadd.f32 %v4396_v12, %v1733_v8  ;;  %v3512_v43 = vpop.eup %3511  ;;  %v2596_v30 = vsel %vm2564_vm9, %v2464_v50, 0.0  ;;  %v2051_v32 = vadd.f32 1.0, %v3506_v18  ;;  %v5302_v38 = vsub.f32 0.0, %v4685_v16 }
 0x2eb   : > { %3527 = vpow2.f32 %v2007_v35  ;;  %v3514_v56 = vpop.eup %3513  ;;  %v2463_v23 = vadd.f32 %v2431_v33, %v2143_v36  ;;  %v2378_v40 = vmul.f32 0.6931472, %v3508_v60  ;;  %v1929_v53 = vand.u32 2147483647, %v1865_v51 }
 0x2ec   : > { %v4771_v47 = vmax.f32 %v5302_v38, 0.0  ;;  %3529 = vpow2.f32 %v2005_v34  ;;  %v3516_v2 = vpop.eup %3515  ;;  %v2090_v24 = vmul.f32 0.6931472, %v3510_v58  ;;  %v2179_v29 = vmax.f32 %v4666_v46, 0.0 }
 0x2ed   : > { %3531 = vlog2.f32 %v2339_v9  ;;  %v4778_v21 = vadd.f32 %v4396_v12, %v1646_v17  ;;  %v3518_v16 = vpop.eup %3517  ;;  %v2011_v10 = vmul.f32 1.442695, %v1962_v37  ;;  %v2250_v50 = vsub.f32 0.0, %v2218_v20 }
 0x2ee   : > { %3533 = vlog2.f32 %v2052_v54  ;;  %v2217_v36 = vand.u32 2147483647, %v4765_v27  ;;  %v2636_v35 = vsel %vm2622_vm4, %v2596_v30, 0.0  ;;  %v2380_v8 = vmul.f32 0.6931472, %v3512_v43  ;;  %v1643_v43 = vpop.xlane.xlu1 %1642 }
 0x2ef   : > { %3535 = vlog2.f32 %v2051_v32  ;;  %v2341_v18 = vadd.f32 1.0, %v3514_v56  ;;  %v3520_v58 = vpop.eup %3519  ;;  %v2595_v15 = vsel %vm2563_vm10, %v2463_v23, 0.0  ;;  %v5303_v33 = vmax.f32 %v4596_v25, 0.0 }
 0x2f0   : > { %v2342_v60 = vadd.f32 1.0, %v3516_v2  ;;  %v1961_v54 = vsub.f32 0.0, %v1929_v53  ;;  %v2146_v9 = vadd.f32 %v2092_v19, %v4652_v11  ;;  %v2633_v37 = vadd.f32 %v4741_v63, %v2631_v55  ;;  %v1742_v2 = vpop.xlane.xlu0 %1741 }
 0x2f1   : > { %v2433_v34 = vadd.f32 %v2378_v40, %v5303_v33  ;;  %v2053_v20 = vadd.f32 1.0, %v3518_v16  ;;  %v1868_v17 = vsub.f32 0.0, %v4778_v21  ;;  %v3522_v30 = vpop.eup %3521  ;;  %v2145_v32 = vadd.f32 %v2090_v24, %v4658_v7 }
 0x2f2   : > { %3537 = vpow2.f32 %v2011_v10  ;;  %v2299_v42 = vmul.f32 1.442695, %v2250_v50  ;;  %v2249_v38 = vsub.f32 0.0, %v2217_v36  ;;  %v3524_v56 = vpop.eup %3523  ;;  %v2634_v25 = vsel %vm2622_vm4, %v2595_v15, 0.0 }
 0x2f3   : > { %v5304_v23 = vmax.f32 %v4606_v3, 0.0  ;;  %v2054_v53 = vadd.f32 1.0, %v3520_v58  ;;  %3539 = vlog2.f32 %v2341_v18  ;;  %v3526_v11 = vpop.eup %3525  ;;  %v2465_v63 = vadd.f32 %v2433_v34, %v2145_v32 }
 0x2f4   : > { %3541 = vlog2.f32 %v2342_v60  ;;  %v2009_v55 = vmul.f32 1.442695, %v1961_v54  ;;  %v4795_v19 = vadd.f32 %v4396_v12, %v1643_v43  ;;  %v2182_v24 = vmax.f32 %v4695_v14, 0.0  ;;  %v1652_v60 = vpop.xlane.xlu1 %1651  ;;  %v1739_v59 = vpop.xlane.xlu0 %1738 }
 0x2f5   : > { %v2434_v40 = vadd.f32 %v2380_v8, %v5304_v23  ;;  %v3528_v7 = vpop.eup %3527  ;;  %3543 = vlog2.f32 %v2053_v20  ;;  %v2344_v16 = vadd.f32 1.0, %v3522_v30  ;;  %v1932_v10 = vand.u32 2147483647, %v1868_v17 }
 0x2f6   : > { %v3530_v3 = vpop.eup %3529  ;;  %v2635_v50 = vadd.f32 %v2634_v25, %v2633_v37  ;;  %v5305_v36 = vsub.f32 0.0, %v4675_v31  ;;  %3545 = vpow2.f32 %v2299_v42  ;;  %v2297_v18 = vmul.f32 1.442695, %v2249_v38  ;;  %v4812_v38 = vld [vmem:[#allocation2] ss:$0 sm:$0xff] }
 0x2f7   : > { %v3532_v58 = vpop.eup %3531  ;;  %v2466_v12 = vadd.f32 %v2434_v40, %v2146_v9  ;;  %3547 = vlog2.f32 %v2054_v53  ;;  %v5306_v15 = vsub.f32 0.0, %v4708_v13  ;;  %v2343_v34 = vadd.f32 1.0, %v3526_v11 }
 0x2f8   : > { %v4802_v8 = vmax.f32 %v5305_v36, 0.0  ;;  %v3534_v54 = vpop.eup %3533  ;;  %v2597_v20 = vsel %vm2565_vm11, %v2465_v63, 0.0  ;;  %v2056_v37 = vadd.f32 1.0, %v3528_v7  ;;  %3549 = vpow2.f32 %v2009_v55 }
 0x2f9   : > { %v4806_v33 = vmax.f32 %v5306_v15, 0.0  ;;  %v1867_v31 = vsub.f32 0.0, %v4795_v19  ;;  %v3536_v43 = vpop.eup %3535  ;;  %v2384_v30 = vmul.f32 0.6931472, %v3524_v56  ;;  %v2055_v32 = vadd.f32 1.0, %v3530_v3 }
 0x2fa   : > { %3551 = vlog2.f32 %v2344_v16  ;;  %v1964_v9 = vsub.f32 0.0, %v1932_v10  ;;  %v2637_v42 = vadd.f32 %v2636_v35, %v2635_v50  ;;  %v2382_v13 = vmul.f32 0.6931472, %v3532_v58  ;;  %v1649_v16 = vpop.xlane.xlu1 %1648 }
 0x2fb   : > { %3553 = vpow2.f32 %v2297_v18  ;;  %v4815_v25 = vadd.f32 %v4812_v38, %v1742_v2  ;;  %v2598_v23 = vsel %vm2566_vm12, %v2466_v12, 0.0  ;;  %v2096_v40 = vmul.f32 0.6931472, %v3534_v54 }
 0x2fc   : > { %vm2567_vm14 = vcmp.lt.s32.totalorder %v4569_v28, 500  ;;  %v2181_v56 = vmax.f32 %v4688_v1, 0.0  ;;  %3555 = vlog2.f32 %v2343_v34  ;;  %v3538_v35 = vpop.eup %3537  ;;  %v2638_v53 = vsel %vm2622_vm4, %v2597_v20, 0.0 }
 0x2fd   : > { %v2094_v11 = vmul.f32 0.6931472, %v3536_v43  ;;  %3557 = vlog2.f32 %v2056_v37  ;;  %v1931_v63 = vand.u32 2147483647, %v1867_v31  ;;  %v3540_v55 = vpop.eup %3539  ;;  %v2436_v2 = vadd.f32 %v2384_v30, %v2180_v4 }
 0x2fe   : > { %3559 = vlog2.f32 %v2055_v32  ;;  %v2015_v57 = vmul.f32 1.442695, %v1964_v9  ;;  %v4827_v7 = vadd.f32 %v4812_v38, %v1739_v59  ;;  %v3542_v1 = vpop.eup %3541  ;;  %v2435_v10 = vadd.f32 %v2382_v13, %v2179_v29  ;;  %v1748_v32 = vpop.xlane.xlu0 %1747 }
 0x2ff   : > { %v5307_v3 = vsub.f32 0.0, %v4713_v0  ;;  %v2184_v36 = vmax.f32 %v4716_v22, 0.0  ;;  %v2220_v18 = vand.u32 2147483647, %v4815_v25  ;;  %v3544_v49 = vpop.eup %3543  ;;  %v2640_v4 = vsel %vm2622_vm4, %v2598_v23, 0.0 }
 0x300   : > { %v2148_v58 = vadd.f32 %v2096_v40, %v4691_v41  ;;  %v2058_v12 = vadd.f32 1.0, %v3538_v35  ;;  %v4840_v15 = vadd.f32 %v4812_v38, %v1652_v60  ;;  %v3546_v34 = vpop.eup %3545  ;;  %v2639_v46 = vadd.f32 %v2638_v53, %v2637_v42  ;;  %v4851_v53 = vpop.xlane.xlu1 %1657 }
 0x301   : > { %v4833_v50 = vmax.f32 %v5307_v3, 0.0  ;;  %v2147_v29 = vadd.f32 %v2094_v11, %v4704_v26  ;;  %v2386_v0 = vmul.f32 0.6931472, %v3540_v55  ;;  %v1963_v54 = vsub.f32 0.0, %v1931_v63  ;;  %v3548_v20 = vpop.eup %3547 }
 0x302   : > { %v2468_v37 = vadd.f32 %v2436_v2, %v2148_v58  ;;  %vm2569_vm15 = vcmp.lt.s32.totalorder %v4575_v52, 500  ;;  %v5308_v43 = vsub.f32 0.0, %v4732_v44  ;;  %3561 = vpow2.f32 %v2015_v57  ;;  %v3550_v60 = vpop.eup %3549 }
 0x303   : > { %v2219_v41 = vand.u32 2147483647, %v4827_v7  ;;  %v2467_v9 = vadd.f32 %v2435_v10, %v2147_v29  ;;  %v2098_v13 = vmul.f32 0.6931472, %v3544_v49  ;;  %v2183_v42 = vmax.f32 %v4723_v39, 0.0 }
 0x304   : > { %v4846_v30 = vmax.f32 %v5308_v43, 0.0  ;;  %v2252_v26 = vsub.f32 0.0, %v2220_v18  ;;  %v3552_v59 = vpop.eup %3551  ;;  %v2388_v23 = vmul.f32 0.6931472, %v3542_v1  ;;  %3563 = vlog2.f32 %v2058_v12 }
 0x305   : > { %v2346_v40 = vadd.f32 1.0, %v3546_v34  ;;  %v1870_v35 = vsub.f32 0.0, %v4840_v15  ;;  %v3554_v44 = vpop.eup %3553  ;;  %v2641_v11 = vadd.f32 %v2640_v4, %v2639_v46  ;;  %vm2570_vm0 = vcmp.lt.s32.totalorder %v4572_v45, 500  ;;  %v1745_v34 = vpop.xlane.xlu0 %1744 }
 0x306   : > { %v2437_v63 = vadd.f32 %v2386_v0, %v2181_v56  ;;  %v4856_v55 = vmax.f32 %v1865_v51, 0.0  ;;  %v2013_v2 = vmul.f32 1.442695, %v1963_v54  ;;  %v3556_v39 = vpop.eup %3555  ;;  %v2600_v57 = vsel %vm2568_vm13, %v2468_v37, 0.0 }
 0x307   : > { %v2100_v1 = vmul.f32 0.6931472, %v3548_v20  ;;  %v2057_v10 = vadd.f32 1.0, %v3550_v60  ;;  %v2251_v3 = vsub.f32 0.0, %v2219_v41  ;;  %v3558_v18 = vpop.eup %3557  ;;  %v2599_v49 = vsel %vm2567_vm14, %v2467_v9, 0.0 }
 0x308   : > { %v2149_v4 = vadd.f32 %v2098_v13, %v4802_v8  ;;  %v2303_v58 = vmul.f32 1.442695, %v2252_v26  ;;  %v4864_v56 = vadd.f32 %v4812_v38, %v1649_v16  ;;  %v3560_v5 = vpop.eup %3559  ;;  %v2438_v51 = vadd.f32 %v2388_v23, %v2182_v24  ;;  %v4874_v24 = vpop.xlane.xlu1 %1654 }
 0x309   : > { %3565 = vlog2.f32 %v2346_v40  ;;  %v2345_v61 = vadd.f32 1.0, %v3554_v44  ;;  %v1934_v12 = vand.u32 2147483647, %v1870_v35  ;;  %v2392_v29 = vmul.f32 0.6931472, %v3552_v59 }
 0x30a   : > { %v2469_v46 = vadd.f32 %v2437_v63, %v2149_v4  ;;  %v2390_v28 = vmul.f32 0.6931472, %v3556_v39  ;;  %3567 = vpow2.f32 %v2013_v2  ;;  %v2150_v8 = vadd.f32 %v2100_v1, %v4771_v47  ;;  %v4890_v63 = vpop.xlane.xlu0 %1753 }
 0x30b   : > { %v2642_v0 = vsel %vm2622_vm4, %v2599_v49, 0.0  ;;  %vm2572_vm1 = vcmp.lt.s32.totalorder %v4579_v6, 500  ;;  %vm2571_vm2 = vcmp.lt.s32.totalorder %v4582_v48, 500  ;;  %3569 = vlog2.f32 %v2057_v10 }
 0x30c   : > { %v2301_v14 = vmul.f32 1.442695, %v2251_v3  ;;  %v2104_v16 = vmul.f32 0.6931472, %v3558_v18  ;;  %v2102_v54 = vmul.f32 0.6931472, %v3560_v5  ;;  %3571 = vpow2.f32 %v2303_v58  ;;  %v3562_v37 = vpop.eup %3561  ;;  %v4898_v39 = vpop.xlane.xlu1 %1663 }
 0x30d   : > { %v1869_v20 = vsub.f32 0.0, %v4864_v56  ;;  %v2470_v43 = vadd.f32 %v2438_v51, %v2150_v8  ;;  %v2186_v41 = vmax.f32 %v4757_v62, 0.0  ;;  %3573 = vlog2.f32 %v2345_v61  ;;  %v5309_v8 = vld [vmem:[#allocation11_spill] sm:$0xff] }
 0x30e   : > { %v1966_v47 = vsub.f32 0.0, %v1934_v12  ;;  %v2643_v60 = vadd.f32 %v2642_v0, %v2641_v11  ;;  %v2601_v9 = vsel %vm2569_vm15, %v2469_v46, 0.0  ;;  %v2440_v13 = vadd.f32 %v2392_v29, %v2184_v36  ;;  %v3564_v59 = vpop.eup %3563  ;;  %v1751_v51 = vpop.xlane.xlu0 %1750 }
 0x30f   : > { %v2439_v26 = vadd.f32 %v2390_v28, %v2183_v42  ;;  %v2644_v23 = vsel %vm2622_vm4, %v2600_v57, 0.0  ;;  %v4885_v40 = vmax.f32 %v1868_v17, 0.0  ;;  %3575 = vpow2.f32 %v2301_v14 }
 0x310   : > { %v4888_v44 = vadd.f32 %v4812_v38, %v1748_v32  ;;  %v2152_v52 = vadd.f32 %v2104_v16, %v4806_v33  ;;  %v2151_v11 = vadd.f32 %v2102_v54, %v4833_v50  ;;  %v2060_v22 = vadd.f32 1.0, %v3562_v37  ;;  %v1661_v16 = vpop.xlane.xlu1 %1660 }
 0x311   : > { %v1933_v36 = vand.u32 2147483647, %v1869_v20  ;;  %v2602_v42 = vsel %vm2570_vm0, %v2470_v43, 0.0  ;;  %v2646_v2 = vsel %vm2622_vm4, %v2601_v9, 0.0  ;;  %v2185_v21 = vmax.f32 %v4765_v27, 0.0  ;;  %v5310_v9 = vld [vmem:[#allocation9_spill] sm:$0xff] }
 0x312   : > { %v2019_v17 = vmul.f32 1.442695, %v1966_v47  ;;  %v2645_v32 = vadd.f32 %v2644_v23, %v2643_v60  ;;  %v2472_v57 = vadd.f32 %v2440_v13, %v2152_v52  ;;  %v2108_v1 = vmul.f32 0.6931472, %v3564_v59  ;;  %v5311_v52 = vld [vmem:[#allocation12_spill] sm:$0xff] }
 0x313   : > { %v2471_v10 = vadd.f32 %v2439_v26, %v2151_v11  ;;  %v3566_v3 = vpop.eup %3565  ;;  %v4902_v33 = vmax.f32 %v1867_v31, 0.0  ;;  %v2222_v50 = vand.u32 2147483647, %v4888_v44  ;;  %v4907_v45 = vadd.f32 %v4812_v38, %v4851_v53 }
 0x314   : > { %v4910_v18 = vadd.f32 %v4812_v38, %v1745_v34  ;;  %v3568_v49 = vpop.eup %3567  ;;  %v2648_v4 = vsel %vm2622_vm4, %v2602_v42, 0.0  ;;  %v2647_v58 = vadd.f32 %v2646_v2, %v2645_v32  ;;  %3577 = vlog2.f32 %v2060_v22  ;;  %v5312_v32 = vld [vmem:[#allocation10_spill] sm:$0xff] }
 0x315   : > { %v1965_v56 = vsub.f32 0.0, %v1933_v36  ;;  %v3570_v5 = vpop.eup %3569  ;;  %v2188_v19 = vmax.f32 %v4815_v25, 0.0  ;;  %v4916_v31 = vmax.f32 %v1870_v35, 0.0  ;;  %3579 = vpow2.f32 %v2019_v17  ;;  %v1760_v36 = vpop.xlane.xlu0 %1759 }
 0x316   : > { %v2187_v53 = vmax.f32 %v4827_v7, 0.0  ;;  %v3572_v61 = vpop.eup %3571  ;;  %v2604_v12 = vsel %vm2572_vm1, %v2472_v57, 0.0  ;;  %v2154_v34 = vadd.f32 %v2108_v1, %v4846_v30  ;;  %v2603_v46 = vsel %vm2571_vm2, %v2471_v10, 0.0  ;;  %v1670_v1 = vpop.xlane.xlu1 %1669 }
 0x317   : > { %v2396_v29 = vmul.f32 0.6931472, %v3566_v3  ;;  %v3574_v28 = vpop.eup %3573  ;;  %vm2574_vm3 = vcmp.lt.s32.totalorder %v5309_v8, 500  ;;  %v2059_v15 = vadd.f32 1.0, %v3568_v49  ;;  %v2254_v35 = vsub.f32 0.0, %v2222_v50 }
 0x318   : > { %v1872_v0 = vsub.f32 0.0, %v4907_v45  ;;  %v2221_v14 = vand.u32 2147483647, %v4910_v18  ;;  %v2649_v54 = vadd.f32 %v2648_v4, %v2647_v58  ;;  %v4927_v37 = vmax.f32 %v1869_v20, 0.0 }
 0x319   : > { %v2017_v6 = vmul.f32 1.442695, %v1965_v56  ;;  %v4931_v30 = vadd.f32 %v4812_v38, %v4874_v24  ;;  %v3576_v48 = vpop.eup %3575  ;;  %v2652_v43 = vsel %vm2622_vm4, %v2604_v12, 0.0  ;;  %v2650_v47 = vsel %vm2622_vm4, %v2603_v46, 0.0  ;;  %v1757_v46 = vpop.xlane.xlu0 %1756 }
 0x31a   : > { %v2348_v60 = vadd.f32 1.0, %v3572_v61  ;;  %v2513_v13 = vadd.s32 168, %v5310_v9  ;;  %v2106_v26 = vmul.f32 0.6931472, %v3570_v5  ;;  %v2442_v59 = vadd.f32 %v2396_v29, %v2186_v41 }
 0x31b   : > { %v2394_v23 = vmul.f32 0.6931472, %v3574_v28  ;;  %v4939_v20 = vadd.f32 %v4812_v38, %v1751_v51  ;;  %vm2573_vm5 = vcmp.lt.s32.totalorder %v5311_v52, 500  ;;  %3581 = vlog2.f32 %v2059_v15 }
 0x31c   : > { %v2307_v24 = vmul.f32 1.442695, %v2254_v35  ;;  %v1936_v11 = vand.u32 2147483647, %v1872_v0  ;;  %v2253_v22 = vsub.f32 0.0, %v2221_v14  ;;  %v2651_v42 = vadd.f32 %v2650_v47, %v2649_v54 }
 0x31d   : > { %v2347_v2 = vadd.f32 1.0, %v3576_v48  ;;  %3583 = vpow2.f32 %v2017_v6  ;;  %v1871_v17 = vsub.f32 0.0, %v4931_v30  ;;  %v4944_v62 = vadd.s32 %v5312_v32, %v2513_v13 }
 0x31e   : > { %3585 = vlog2.f32 %v2348_v60  ;;  %v2190_v41 = vmax.f32 %v4888_v44, 0.0  ;;  %v4949_v57 = vadd.f32 %v4812_v38, %v4890_v63  ;;  %v3578_v10 = vpop.eup %3577  ;;  %v2474_v3 = vadd.f32 %v2442_v59, %v2154_v34 }
 0x31f   : > { %v2441_v50 = vadd.f32 %v2394_v23, %v2185_v21  ;;  %v2512_v45 = vadd.s32 160, %v5310_v9  ;;  %v2223_v49 = vand.u32 2147483647, %v4939_v20  ;;  %v3580_v4 = vpop.eup %3579  ;;  %3587 = vpow2.f32 %v2307_v24 }
 0x320   : > { %v1968_v58 = vsub.f32 0.0, %v1936_v11  ;;  %v2305_v56 = vmul.f32 1.442695, %v2253_v22  ;;  %v4956_v5 = vadd.f32 %v4812_v38, %v1661_v16  ;;  %v2153_v63 = vadd.f32 %v2106_v26, %v4856_v55  ;;  %v1667_v16 = vpop.xlane.xlu1 %1666 }
 0x321   : > { %v2653_v51 = vadd.f32 %v2652_v43, %v2651_v42  ;;  %3589 = vlog2.f32 %v2347_v2  ;;  %v1935_v61 = vand.u32 2147483647, %v1871_v17  ;;  %v2112_v27 = vmul.f32 0.6931472, %v3578_v10 }
 0x322   : > { %v4961_v21 = vmax.f32 %v1872_v0, 0.0  ;;  %v2224_v12 = vand.u32 2147483647, %v4949_v57  ;;  %v4966_v34 = vadd.f32 %v4812_v38, %v4898_v39  ;;  %v2606_v29 = vsel %vm2574_vm3, %v2474_v3, 0.0 }
 0x323   : > { %v2473_v28 = vadd.f32 %v2441_v50, %v2153_v63  ;;  %v2062_v55 = vadd.f32 1.0, %v3580_v4  ;;  %v2255_v15 = vsub.f32 0.0, %v2223_v49  ;;  %v2023_v35 = vmul.f32 1.442695, %v1968_v58 }
 0x324   : > { %v4971_v14 = vadd.s32 %v5312_v32, %v2512_v45  ;;  %3591 = vpow2.f32 %v2305_v56  ;;  %v1873_v0 = vsub.f32 0.0, %v4956_v5  ;;  %v2189_v54 = vmax.f32 %v4910_v18, 0.0 }
 0x325   : > { %v1967_v6 = vsub.f32 0.0, %v1935_v61  ;;  %v2515_v39 = vadd.s32 184, %v5310_v9  ;;  %v4977_v48 = vadd.f32 %v4812_v38, %v1757_v46  ;;  %v3582_v8 = vpop.eup %3581  ;;  %v4980_v43 = vsel %vm2622_vm4, %v2606_v29, 0.0 }
 0x326   : > { %v2256_v47 = vsub.f32 0.0, %v2224_v12  ;;  %v1874_v60 = vsub.f32 0.0, %v4966_v34  ;;  %v4984_v13 = vadd.f32 %v4812_v38, %v1670_v1  ;;  %v2605_v59 = vsel %vm2573_vm5, %v2473_v28, 0.0  ;;  %v1766_v1 = vpop.xlane.xlu0 %1765  ;;  %v1676_v28 = vpop.xlane.xlu1 %1675 }
 0x327   : > { %v3584_v26 = vpop.eup %3583  ;;  %3593 = vlog2.f32 %v2062_v55  ;;  %v2309_v23 = vmul.f32 1.442695, %v2255_v15  ;;  %v4989_v24 = vadd.f32 %v4812_v38, %v1667_v16  ;;  %v2156_v22 = vadd.f32 %v2112_v27, %v4885_v40 }
 0x328   : > { %v3586_v11 = vpop.eup %3585  ;;  %3595 = vpow2.f32 %v2023_v35  ;;  %v1937_v42 = vand.u32 2147483647, %v1873_v0  ;;  %v4995_v2 = vadd.f32 %v4812_v38, %v1760_v36  ;;  %v2021_v10 = vmul.f32 1.442695, %v1967_v6  ;;  %v5313_v6 = vld [vmem:[#allocation13_spill] sm:$0xff] }
 0x329   : > { %v4998_v52 = vadd.s32 %v5312_v32, %v2515_v39  ;;  %v2514_v3 = vadd.s32 176, %v5310_v9  ;;  %v2225_v50 = vand.u32 2147483647, %v4977_v48  ;;  %v3588_v45 = vpop.eup %3587  ;;  %v2654_v49 = vsel %vm2622_vm4, %v2605_v59, 0.0 }
 0x32a   : > { %v2311_v40 = vmul.f32 1.442695, %v2256_v47  ;;  %v1938_v4 = vand.u32 2147483647, %v1874_v60  ;;  %v1876_v58 = vsub.f32 0.0, %v4984_v13  ;;  %3597 = vpow2.f32 %v2309_v23  ;;  %v1763_v59 = vpop.xlane.xlu0 %1762 }
 0x32b   : > { %v3590_v36 = vpop.eup %3589  ;;  %v2110_v56 = vmul.f32 0.6931472, %v3582_v8  ;;  %v2257_v63 = vsub.f32 0.0, %v2225_v50  ;;  %v1875_v61 = vsub.f32 0.0, %v4989_v24  ;;  %v2400_v27 = vmul.f32 0.6931472, %v3586_v11 }
 0x32c   : > { %v2061_v12 = vadd.f32 1.0, %v3584_v26  ;;  %v1969_v46 = vsub.f32 0.0, %v1937_v42  ;;  %v2226_v29 = vand.u32 2147483647, %v4995_v2  ;;  %v2655_v55 = vadd.f32 %v2654_v49, %v2653_v51 }
 0x32d   : > { %v2350_v15 = vadd.f32 1.0, %v3588_v45  ;;  %3599 = vpow2.f32 %v2021_v10  ;;  %v2192_v35 = vmax.f32 %v4949_v57, 0.0  ;;  %vm2576_vm6 = vcmp.lt.s32.totalorder %v5313_v6, 500  ;;  %v5314_v10 = vld [vmem:[#allocation14_spill] sm:$0xff] }
 0x32e   : > { %v3592_v16 = vpop.eup %3591  ;;  %v2398_v39 = vmul.f32 0.6931472, %v3590_v36  ;;  %3601 = vpow2.f32 %v2311_v40  ;;  %v1970_v8 = vsub.f32 0.0, %v1938_v4  ;;  %v1940_v47 = vand.u32 2147483647, %v1876_v58  ;;  %v1772_v7 = vpop.xlane.xlu0 %1771 }
 0x32f   : > { %v2313_v26 = vmul.f32 1.442695, %v2257_v63  ;;  %v1939_v23 = vand.u32 2147483647, %v1875_v61  ;;  %v5015_v51 = vadd.f32 %v4812_v38, %v1766_v1  ;;  %v5018_v11 = vadd.f32 %v4812_v38, %v1676_v28 }
 0x330   : > { %v2444_v42 = vadd.f32 %v2400_v27, %v2188_v19  ;;  %vm2575_vm7 = vcmp.lt.s32.totalorder %v5314_v10, 500  ;;  %3603 = vlog2.f32 %v2061_v12  ;;  %v2025_v50 = vmul.f32 1.442695, %v1969_v46 }
 0x331   : > { %v2258_v45 = vsub.f32 0.0, %v2226_v29  ;;  %v3594_v49 = vpop.eup %3593  ;;  %v2155_v40 = vadd.f32 %v2110_v56, %v4902_v33  ;;  %3605 = vlog2.f32 %v2350_v15  ;;  %v2349_v4 = vadd.f32 1.0, %v3592_v16  ;;  %v1673_v56 = vpop.xlane.xlu1 %1672 }
 0x332   : > { %v5026_v1 = vmax.f32 %v1871_v17, 0.0  ;;  %v3596_v36 = vpop.eup %3595  ;;  %v2443_v63 = vadd.f32 %v2398_v39, %v2187_v53  ;;  %v2027_v25 = vmul.f32 1.442695, %v1970_v8  ;;  %v1972_v19 = vsub.f32 0.0, %v1940_v47 }
 0x333   : > { %v2228_v27 = vand.u32 2147483647, %v5015_v51  ;;  %v5032_v12 = vadd.s32 %v5312_v32, %v2514_v3  ;;  %3607 = vpow2.f32 %v2313_v26  ;;  %v1971_v46 = vsub.f32 0.0, %v1939_v23 }
 0x334   : > { %v1878_v33 = vsub.f32 0.0, %v5018_v11  ;;  %v2476_v29 = vadd.f32 %v2444_v42, %v2156_v22  ;;  %v5036_v30 = vadd.f32 %v4980_v43, %v2655_v55  ;;  %3609 = vpow2.f32 %v2025_v50  ;;  %v3598_v53 = vpop.eup %3597 }
 0x335   : > { %v2315_v17 = vmul.f32 1.442695, %v2258_v45  ;;  %v2064_v28 = vadd.f32 1.0, %v3596_v36  ;;  %3611 = vlog2.f32 %v2349_v4  ;;  %v5040_v15 = vmax.f32 %v1874_v60, 0.0 }
 0x336   : > { %v2260_v3 = vsub.f32 0.0, %v2228_v27  ;;  %v2475_v16 = vadd.f32 %v2443_v63, %v2155_v40  ;;  %3613 = vpow2.f32 %v2027_v25  ;;  %v2031_v39 = vmul.f32 1.442695, %v1972_v19  ;;  %v1682_v40 = vpop.xlane.xlu1 %1681 }
 0x337   : > { %v5043_v8 = vadd.f32 %v4812_v38, %v1763_v59  ;;  %v3600_v22 = vpop.eup %3599  ;;  %v2029_v43 = vmul.f32 1.442695, %v1971_v46  ;;  %v1942_v55 = vand.u32 2147483647, %v1878_v33  ;;  %v5048_v47 = vadd.f32 %v4812_v38, %v1673_v56 }
 0x338   : > { %v5051_v26 = vadd.f32 %v4812_v38, %v1772_v7  ;;  %v3602_v34 = vpop.eup %3601  ;;  %v2116_v60 = vmul.f32 0.6931472, %v3594_v49  ;;  %v2351_v23 = vadd.f32 1.0, %v3598_v53  ;;  %3615 = vpow2.f32 %v2315_v17  ;;  %v1769_v17 = vpop.xlane.xlu0 %1768 }
 0x339   : > { %v2227_v42 = vand.u32 2147483647, %v5043_v8  ;;  %v2608_v59 = vsel %vm2576_vm6, %v2476_v29, 0.0  ;;  %3617 = vlog2.f32 %v2064_v28  ;;  %v2319_v50 = vmul.f32 1.442695, %v2260_v3 }
 0x33a   : > { %v5284_v45 = vsub.f32 0.0, %v5048_v47  ;;  %v3604_v4 = vpop.eup %3603  ;;  %v2063_v36 = vadd.f32 1.0, %v3600_v22  ;;  %3619 = vpow2.f32 %v2031_v39  ;;  %v2230_v25 = vand.u32 2147483647, %v5051_v26 }
 0x33b   : > { %v2259_v63 = vsub.f32 0.0, %v2227_v42  ;;  %v3606_v19 = vpop.eup %3605  ;;  %v2607_v49 = vsel %vm2575_vm7, %v2475_v16, 0.0  ;;  %v2352_v27 = vadd.f32 1.0, %v3602_v34  ;;  %3621 = vpow2.f32 %v2029_v43  ;;  %v1679_v42 = vpop.xlane.xlu1 %1678 }
 0x33c   : > { %v1974_v46 = vsub.f32 0.0, %v1942_v55  ;;  %v2660_v6 = vsel %vm2622_vm4, %v2608_v59, 0.0  ;;  %v2191_v56 = vmax.f32 %v4939_v20, 0.0  ;;  %3623 = vlog2.f32 %v2351_v23 }
 0x33d   : > { %v2317_v29 = vmul.f32 1.442695, %v2259_v63  ;;  %v3608_v7 = vpop.eup %3607  ;;  %v2517_v53 = vadd.s32 200, %v5310_v9  ;;  %3625 = vpow2.f32 %v2319_v50  ;;  %v1941_v28 = vand.u32 2147483647, %v5284_v45 }
 0x33e   : > { %v2262_v3 = vsub.f32 0.0, %v2230_v25  ;;  %v3610_v10 = vpop.eup %3609  ;;  %v2658_v16 = vsel %vm2622_vm4, %v2607_v49, 0.0  ;;  %v2114_v39 = vmul.f32 0.6931472, %v3604_v4  ;;  %3627 = vlog2.f32 %v2063_v36 }
 0x33f   : > { %v5067_v22 = vadd.f32 %v4812_v38, %v1682_v40  ;;  %v3612_v43 = vpop.eup %3611  ;;  %3629 = vlog2.f32 %v2352_v27  ;;  %v2035_v55 = vmul.f32 1.442695, %v1974_v46  ;;  %v1973_v34 = vsub.f32 0.0, %v1941_v28 }
 0x340   : > { %v2323_v23 = vmul.f32 1.442695, %v2262_v3  ;;  %v3614_v59 = vpop.eup %3613  ;;  %v5070_v50 = vadd.f32 %v2116_v60, %v4916_v31  ;;  %v2353_v63 = vadd.f32 1.0, %v3608_v7  ;;  %3631 = vpow2.f32 %v2317_v29  ;;  %v1775_v29 = vpop.xlane.xlu0 %1774 }
 0x341   : > { %v5283_v25 = vsub.f32 0.0, %v5067_v22  ;;  %v5075_v4 = vmax.f32 %v1873_v0, 0.0  ;;  %v2065_v40 = vadd.f32 1.0, %v3610_v10  ;;  %v5078_v36 = vadd.s32 %v5312_v32, %v2517_v53 }
 0x342   : > { %3633 = vpow2.f32 %v2323_v23  ;;  %v3616_v49 = vpop.eup %3615  ;;  %v2659_v27 = vadd.f32 %v2658_v16, %v5036_v30  ;;  %v2194_v46 = vmax.f32 %v4995_v2, 0.0  ;;  %v2033_v31 = vmul.f32 1.442695, %v1973_v34 }
 0x343   : > { %v1944_v60 = vand.u32 2147483647, %v5283_v25  ;;  %v5084_v7 = vpop.eup %3617  ;;  %v2157_v5 = vadd.f32 %v2114_v39, %v4927_v37  ;;  %v2402_v0 = vmul.f32 0.6931472, %v3612_v43  ;;  %v2066_v28 = vadd.f32 1.0, %v3614_v59  ;;  %v1778_v39 = vpop.xlane.xlu1 %1777 }
 0x344   : > { %3635 = vpow2.f32 %v2035_v55  ;;  %v3620_v53 = vpop.eup %3619  ;;  %v5088_v10 = vadd.f32 %v4812_v38, %v1769_v17  ;;  %v5091_v30 = vadd.f32 %v4812_v38, %v1679_v42  ;;  %v2404_v34 = vmul.f32 0.6931472, %v3606_v19 }
 0x345   : > { %3637 = vlog2.f32 %v2353_v63  ;;  %v1976_v3 = vsub.f32 0.0, %v1944_v60  ;;  %v3622_v16 = vpop.eup %3621  ;;  %vm2577_vm8 = vcmp.lt.s32.totalorder %v4971_v14, 500  ;;  %v2354_v23 = vadd.f32 1.0, %v3616_v49 }
 0x346   : > { %3639 = vlog2.f32 %v2065_v40  ;;  %v5095_v37 = vadd.f32 %v4812_v38, %v1775_v29  ;;  %v3624_v43 = vpop.eup %3623  ;;  %v5097_v55 = vadd.f32 %v2660_v6, %v2659_v27  ;;  %v2516_v59 = vadd.s32 192, %v5310_v9 }
 0x347   : > { %3641 = vpow2.f32 %v2033_v31  ;;  %v2039_v17 = vmul.f32 1.442695, %v1976_v3  ;;  %v3626_v63 = vpop.eup %3625  ;;  %v2445_v42 = vadd.f32 %v2402_v0, %v2189_v54  ;;  %v2068_v19 = vadd.f32 1.0, %v3620_v53 }
 0x348   : > { %v2229_v60 = vand.u32 2147483647, %v5088_v10  ;;  %v1879_v40 = vsub.f32 0.0, %v5091_v30  ;;  %v3628_v49 = vpop.eup %3627  ;;  %3643 = vlog2.f32 %v2066_v28  ;;  %v2067_v29 = vadd.f32 1.0, %v3622_v16 }
 0x349   : > { %v2231_v25 = vand.u32 2147483647, %v5095_v37  ;;  %v5106_v6 = vadd.f32 %v4812_v38, %v1778_v39  ;;  %v3630_v27 = vpop.eup %3629  ;;  %v2446_v31 = vadd.f32 %v2404_v34, %v2190_v41  ;;  %v2406_v3 = vmul.f32 0.6931472, %v3624_v43 }
 0x34a   : > { %3645 = vlog2.f32 %v2354_v23  ;;  %v2261_v18 = vsub.f32 0.0, %v2229_v60  ;;  %v3632_v54 = vpop.eup %3631  ;;  %vm2578_vm9 = vcmp.lt.s32.totalorder %v4944_v62, 500  ;;  %v2356_v0 = vadd.f32 1.0, %v3626_v63 }
 0x34b   : > { %3647 = vpow2.f32 %v2039_v17  ;;  %v1943_v28 = vand.u32 2147483647, %v1879_v40  ;;  %v2263_v53 = vsub.f32 0.0, %v2231_v25  ;;  %v2355_v38 = vadd.f32 1.0, %v3632_v54 }
 0x34c   : > { %v3634_v16 = vpop.eup %3633  ;;  %3649 = vlog2.f32 %v2068_v19  ;;  %v2321_v39 = vmul.f32 1.442695, %v2261_v18  ;;  %v2232_v45 = vand.u32 2147483647, %v5106_v6  ;;  %v2477_v44 = vadd.f32 %v2445_v42, %v2157_v5 }
 0x34d   : > { %vm2579_vm10 = vcmp.lt.s32.totalorder %v5032_v12, 500  ;;  %3651 = vlog2.f32 %v2067_v29  ;;  %v2358_v41 = vadd.f32 1.0, %v3634_v16  ;;  %v1975_v34 = vsub.f32 0.0, %v1943_v28 }
 0x34e   : > { %v3636_v23 = vpop.eup %3635  ;;  %v2118_v43 = vmul.f32 0.6931472, %v3628_v49  ;;  %v5116_v17 = vadd.s32 %v5312_v32, %v2516_v59  ;;  %3653 = vlog2.f32 %v2355_v38  ;;  %v2264_v63 = vsub.f32 0.0, %v2232_v45 }
 0x34f   : > { %v3638_v25 = vpop.eup %3637  ;;  %v2408_v60 = vmul.f32 0.6931472, %v3630_v27  ;;  %3655 = vlog2.f32 %v2356_v0  ;;  %v2037_v19 = vmul.f32 1.442695, %v1975_v34  ;;  %v2325_v18 = vmul.f32 1.442695, %v2263_v53 }
 0x350   : > { %v3640_v54 = vpop.eup %3639  ;;  %v2447_v5 = vadd.f32 %v2406_v3, %v2191_v56  ;;  %v2193_v42 = vmax.f32 %v4977_v48, 0.0  ;;  %3657 = vpow2.f32 %v2321_v39  ;;  %v2327_v29 = vmul.f32 1.442695, %v2264_v63 }
 0x351   : > { %v3642_v28 = vpop.eup %3641  ;;  %v2478_v49 = vadd.f32 %v2446_v31, %v5070_v50  ;;  %v2120_v59 = vmul.f32 0.6931472, %v5084_v7  ;;  %v2609_v45 = vsel %vm2577_vm8, %v2477_v44, 0.0  ;;  %vm2580_vm11 = vcmp.lt.s32.totalorder %v4998_v52, 500 }
 0x352   : > { %3659 = vlog2.f32 %v2358_v41  ;;  %v2159_v27 = vadd.f32 %v2118_v43, %v5026_v1  ;;  %v2410_v0 = vmul.f32 0.6931472, %v3638_v25  ;;  %v2070_v20 = vadd.f32 1.0, %v3636_v23  ;;  %v3644_v56 = vpop.eup %3643 }
 0x353   : > { %3661 = vpow2.f32 %v2037_v19  ;;  %v2448_v48 = vadd.f32 %v2408_v60, %v2192_v35  ;;  %v2122_v3 = vmul.f32 0.6931472, %v3640_v54  ;;  %v2518_v50 = vadd.s32 208, %v5310_v9 }
 0x354   : > { %3663 = vpow2.f32 %v2325_v18  ;;  %v3646_v7 = vpop.eup %3645  ;;  %v2662_v14 = vsel %vm2622_vm4, %v2609_v45, 0.0  ;;  %v2479_v31 = vadd.f32 %v2447_v5, %v2159_v27  ;;  %v2069_v53 = vadd.f32 1.0, %v3642_v28 }
 0x355   : > { %3665 = vpow2.f32 %v2327_v29  ;;  %v3648_v16 = vpop.eup %3647  ;;  %v2160_v1 = vadd.f32 %v2120_v59, %v4961_v21  ;;  %v5134_v38 = vmax.f32 %v1876_v58, 0.0  ;;  %vm2581_vm12 = vcmp.lt.s32.totalorder %v5116_v17, 500 }
 0x356   : > { %v2519_v57 = vadd.s32 216, %v5310_v9  ;;  %v3650_v35 = vpop.eup %3649  ;;  %v2610_v39 = vsel %vm2578_vm9, %v2478_v49, 0.0  ;;  %v2449_v44 = vadd.f32 %v2410_v0, %v2193_v42  ;;  %v1907_v41 = vmax.f32 %v1875_v61, 0.0 }
 0x357   : > { %3667 = vlog2.f32 %v2070_v20  ;;  %v3652_v34 = vpop.eup %3651  ;;  %v2663_v21 = vadd.f32 %v2662_v14, %v5097_v55  ;;  %v2480_v23 = vadd.f32 %v2448_v48, %v2160_v1  ;;  %v2161_v13 = vadd.f32 %v2122_v3, %v5075_v4 }
 0x358   : > { %v2551_v58 = vadd.s32 %v5312_v32, %v2518_v50  ;;  %v3654_v43 = vpop.eup %3653  ;;  %v2611_v63 = vsel %vm2579_vm10, %v2479_v31, 0.0  ;;  %v2412_v25 = vmul.f32 0.6931472, %v3646_v7  ;;  %3669 = vlog2.f32 %v2069_v53 }
 0x359   : > { %v2072_v62 = vadd.f32 1.0, %v3648_v16  ;;  %v3656_v60 = vpop.eup %3655  ;;  %v2664_v24 = vsel %vm2622_vm4, %v2610_v39, 0.0  ;;  %v2124_v61 = vmul.f32 0.6931472, %v3644_v56  ;;  %vm2582_vm13 = vcmp.lt.s32.totalorder %v5078_v36, 500 }
 0x35a   : > { %v5150_v55 = vadd.s32 %v5312_v32, %v2519_v57  ;;  %v2414_v19 = vmul.f32 0.6931472, %v3654_v43  ;;  %v3658_v4 = vpop.eup %3657  ;;  %v2481_v18 = vadd.f32 %v2449_v44, %v2161_v13  ;;  %v2126_v54 = vmul.f32 0.6931472, %v3652_v34 }
 0x35b   : > { %v2196_v5 = vmax.f32 %v5015_v51, 0.0  ;;  %v2195_v12 = vmax.f32 %v5043_v8, 0.0  ;;  %v2665_v29 = vadd.f32 %v2664_v24, %v2663_v21  ;;  %v2666_v28 = vsel %vm2622_vm4, %v2611_v63, 0.0 }
 0x35c   : > { %v3660_v42 = vpop.eup %3659  ;;  %vm2583_vm14 = vcmp.lt.s32.totalorder %v2551_v58, 500  ;;  %v2357_v49 = vadd.f32 1.0, %v3658_v4  ;;  %v2612_v45 = vsel %vm2580_vm11, %v2480_v23, 0.0  ;;  %v2450_v27 = vadd.f32 %v2412_v25, %v2194_v46 }
 0x35d   : > { %v3662_v59 = vpop.eup %3661  ;;  %v2451_v0 = vadd.f32 %v2414_v19, %v2195_v12  ;;  %3671 = vlog2.f32 %v2072_v62  ;;  %v2162_v51 = vadd.f32 %v2124_v61, %v5040_v15  ;;  %v2416_v56 = vmul.f32 0.6931472, %v3656_v60 }
 0x35e   : > { %v3664_v20 = vpop.eup %3663  ;;  %3673 = vlog2.f32 %v2357_v49  ;;  %v2071_v8 = vadd.f32 1.0, %v3662_v59  ;;  %v2667_v3 = vadd.f32 %v2666_v28, %v2665_v29  ;;  %v2613_v50 = vsel %vm2581_vm12, %v2481_v18, 0.0 }
 0x35f   : > { %v3666_v48 = vpop.eup %3665  ;;  %v2163_v7 = vadd.f32 %v2126_v54, %v1907_v41  ;;  %v2359_v14 = vadd.f32 1.0, %v3664_v20  ;;  %v2668_v52 = vsel %vm2622_vm4, %v2612_v45, 0.0  ;;  %v2128_v31 = vmul.f32 0.6931472, %v3650_v35 }
 0x360   : > { %3675 = vlog2.f32 %v2071_v8  ;;  %v2360_v2 = vadd.f32 1.0, %v3666_v48  ;;  %v2482_v53 = vadd.f32 %v2450_v27, %v2162_v51  ;;  %v2521_v15 = vadd.s32 232, %v5310_v9 }
 0x361   : > { %v3668_v46 = vpop.eup %3667  ;;  %v2483_v16 = vadd.f32 %v2451_v0, %v2163_v7  ;;  %3677 = vlog2.f32 %v2359_v14  ;;  %v2670_v1 = vsel %vm2622_vm4, %v2613_v50, 0.0  ;;  %v2452_v57 = vadd.f32 %v2416_v56, %v2196_v5 }
 0x362   : > { %v2420_v39 = vmul.f32 0.6931472, %v3660_v42  ;;  %3679 = vlog2.f32 %v2360_v2  ;;  %v3670_v17 = vpop.eup %3669  ;;  %v2669_v44 = vadd.f32 %v2668_v52, %v2667_v3  ;;  %vm2584_vm15 = vcmp.lt.s32.totalorder %v5150_v55, 500 }
 0x363   : > { %v2520_v41 = vadd.s32 224, %v5310_v9  ;;  %v2164_v35 = vadd.f32 %v2128_v31, %v5134_v38  ;;  %v1910_v34 = vmax.f32 %v1878_v33, 0.0  ;;  %v2132_v21 = vmul.f32 0.6931472, %v3668_v46 }
 0x364   : > { %v2198_v23 = vmax.f32 %v5051_v26, 0.0  ;;  %v2614_v13 = vsel %vm2582_vm13, %v2482_v53, 0.0  ;;  %v2671_v43 = vadd.f32 %v2670_v1, %v2669_v44  ;;  %v2615_v63 = vsel %vm2583_vm14, %v2483_v16, 0.0 }
 0x365   : > { %v2522_v25 = vadd.s32 240, %v5310_v9  ;;  %v2484_v62 = vadd.f32 %v2452_v57, %v2164_v35  ;;  %v2130_v60 = vmul.f32 0.6931472, %v3670_v17  ;;  %v2554_v61 = vadd.s32 %v5312_v32, %v2521_v15 }
 0x366   : > { %v2454_v24 = vadd.f32 %v2420_v39, %v2198_v23  ;;  %v5315_v11 = vsub.f32 0.0, %v5048_v47  ;;  %v5316_v19 = vsub.f32 0.0, %v5067_v22  ;;  %v2553_v36 = vadd.s32 %v5312_v32, %v2520_v41 }
 0x367   : > { %v3672_v38 = vpop.eup %3671  ;;  %v2197_v4 = vmax.f32 %v5088_v10, 0.0  ;;  %v2672_v18 = vsel %vm2622_vm4, %v2614_v13, 0.0  ;;  %v2166_v54 = vadd.f32 %v2132_v21, %v1910_v34  ;;  %v2674_v5 = vsel %vm2622_vm4, %v2615_v63, 0.0 }
 0x368   : > { %v1909_v33 = vmax.f32 %v5315_v11, 0.0  ;;  %v1912_v26 = vmax.f32 %v5316_v19, 0.0  ;;  %v3674_v58 = vpop.eup %3673  ;;  %v2523_v12 = vadd.s32 248, %v5310_v9  ;;  %v2673_v42 = vadd.f32 %v2672_v18, %v2671_v43 }
 0x369   : > { %v2418_v29 = vmul.f32 0.6931472, %v3674_v58  ;;  %v1911_v47 = vmax.f32 %v1879_v40, 0.0  ;;  %v2555_v22 = vadd.s32 %v5312_v32, %v2522_v25  ;;  %v2616_v49 = vsel %vm2584_vm15, %v2484_v62, 0.0  ;;  %v2621_v25 = vld [vmem:[%s3877_s27] sm:$0xff] }
 0x36a   : > { %v3676_v28 = vpop.eup %3675  ;;  %v2165_v10 = vadd.f32 %v2130_v60, %v1909_v33  ;;  %v2486_v59 = vadd.f32 %v2454_v24, %v2166_v54  ;;  %vm2586_vm0 = vcmp.lt.s32.totalorder %v2554_v61, 500  ;;  %v2675_v27 = vadd.f32 %v2674_v5, %v2673_v42 }
 0x36b   : > { %v3678_v45 = vpop.eup %3677  ;;  %v2136_v0 = vmul.f32 0.6931472, %v3672_v38  ;;  %v2453_v20 = vadd.f32 %v2418_v29, %v2197_v4  ;;  %v2134_v51 = vmul.f32 0.6931472, %v3676_v28  ;;  %vm2585_vm1 = vcmp.lt.s32.totalorder %v2553_v36, 500 }
 0x36c   : > { %v3680_v9 = vpop.eup %3679  ;;  %v2199_v56 = vmax.f32 %v5095_v37, 0.0  ;;  %v2422_v30 = vmul.f32 0.6931472, %v3678_v45  ;;  %v2556_v40 = vadd.s32 %v5312_v32, %v2523_v12  ;;  %v2200_v55 = vmax.f32 %v5106_v6, 0.0 }
 0x36d   : > { %v2485_v8 = vadd.f32 %v2453_v20, %v2165_v10  ;;  %v2167_v48 = vadd.f32 %v2134_v51, %v1911_v47  ;;  %v2424_v3 = vmul.f32 0.6931472, %v3680_v9  ;;  %v2676_v50 = vsel %vm2622_vm4, %v2616_v49, 0.0 }
 0x36e   : > { %v2455_v7 = vadd.f32 %v2422_v30, %v2199_v56  ;;  %vm2587_vm2 = vcmp.lt.s32.totalorder %v2555_v22, 500  ;;  %v2618_v14 = vsel %vm2586_vm0, %v2486_v59, 0.0  ;;  %v2168_v52 = vadd.f32 %v2136_v0, %v1912_v26 }
 0x36f   : > { %v2617_v31 = vsel %vm2585_vm1, %v2485_v8, 0.0  ;;  %v2456_v2 = vadd.f32 %v2424_v3, %v2200_v55  ;;  %v2677_v46 = vadd.f32 %v2676_v50, %v2675_v27  ;;  %vm2588_vm3 = vcmp.lt.s32.totalorder %v2556_v40, 500 }
 0x370   : > { %v2487_v53 = vadd.f32 %v2455_v7, %v2167_v48  ;;  %v2678_v37 = vsel %vm2622_vm4, %v2617_v31, 0.0  ;;  %v2680_v6 = vsel %vm2622_vm4, %v2618_v14, 0.0 }
 0x371   : > { %v2488_v32 = vadd.f32 %v2456_v2, %v2168_v52  ;;  %v2679_v16 = vadd.f32 %v2678_v37, %v2677_v46 }
 0x372   : > { %v2619_v15 = vsel %vm2587_vm2, %v2487_v53, 0.0 }
 0x373   : > { %v2620_v1 = vsel %vm2588_vm3, %v2488_v32, 0.0  ;;  %v2681_v57 = vadd.f32 %v2680_v6, %v2679_v16  ;;  %v2682_v39 = vsel %vm2622_vm4, %v2619_v15, 0.0 }
 0x374   : > { %v2684_v17 = vsel %vm2622_vm4, %v2620_v1, 0.0 }
 0x375   : > { %v2683_v44 = vadd.f32 %v2682_v39, %v2681_v57 }
 0x377   : > { %v2685_v41 = vadd.f32 %v2684_v17, %v2683_v44 }
 0x379   : > { %2686 = vadd.xlane.f32.xlu0 %v2685_v41 }
 0x406   : > { %v2687_v35 = vpop.xlane.xlu0 %2686 }
 0x407   : > { %v2688_v34 = vrot.slane %v2687_v35, 4 }
 0x409   : > { %v2689_v21 = vadd.f32 %v2688_v34, %v2687_v35 }
 0x40b   : > { %v2690_v23 = vrot.slane %v2689_v21, 2 }
 0x40d   : > { %v2691_v13 = vadd.f32 %v2690_v23, %v2689_v21 }
 0x40f   : > { %v2692_v43 = vrot.slane %v2691_v13, 1 }
 0x411   : > { %v2693_v63 = vadd.f32 %v2692_v43, %v2691_v13 }
 0x413   : > { %3351 = vpush %v2693_v63 }
 0x444   : > { %s3352_s28 = spop %3351 }
 0x445   : > { %s2695_s23 = smul.f32 0.002, %s3352_s28 }
 0x447   : > { %v2696_v62 = vstv %s2695_s23 }
 0x448   : > { %v2697_v60 = vadd.f32 %v2696_v62, %v2621_v25 }
 0x44a   : > { %2698 = vst [vmem:[%s3877_s27] sm:$0xff] %v2697_v60 }
 0x44b   : > { %3695 = shalt.err (!%p3692_p6)
}
 0x44c   : > { %s3696_s27 = scalar_lea.hbm %s5205_s26, 128  ;;  %s3700_s28 = scalar_lea.hbm %s5264_s9, 256 }
 0x44d   : > { %p3697_p7 = scmp.ne.s32.totalorder %s5205_s26, %s3696_s27  ;;  %p3701_p11 = scmp.lt.u32.totalorder %s5205_s26, %s5264_s9 }
 0x44e   : > { %p3702_p12 = scmp.lt.u32.totalorder %s3700_s28, %s3696_s27  ;;  %p3704_p0 = scmp.lt.u32.totalorder %s3696_s27, %s5205_s26 }
 0x44f   : > { %p3698_p9 = pnand %p3697_p7, %p3857_p4 }
 0x450   : > { %p3703_p13 = por %p3702_p12, %p3701_p11 }
 0x451   : > { %p3699_p10 = pneg %p3698_p9 }
 0x452   : > { %p3705_p1 = por %p3704_p0, %p3703_p13 }
 0x454   : > { %p3706_p2 = pnand %p3705_p1, %p3699_p10 }
 0x456   : > { %3709 = shalt.err (!%p3706_p2)
}
 0x457   : > { %3353 = dma.vmem_to_hbm [thread:$0]  (%p3857_p4), %s5207_s6, 128, %s5205_s26, %s2700_s29  }
 0x458 PF: > { %p3359_p3 = scmp.ge.s32.totalorder %s3760_s16, 2  ;;  %s2725_s17 = sand.u32 1, %s3740_s11  }
 0x459   : > { %s2726_s21 = scalar_lea.sflag [#allocation4], %s2725_s17 }
 0x45a   : > { %p3356_p5 = pnand %p3359_p3, %p3864_p8 }
 0x45c   : > { %3735 = dma.done.wait (!%p3356_p5), %s2726_s21, 128  }
 0x45d   : > { %3737 = vsyncadd (!%p3356_p5), %s2726_s21, 4294967168  ;;  %s24_s16 = sadd.s32 1, %s3760_s16   ;;  %s5318_s20 = sld [smem:[#allocation8_spill]] }
 0x45e   : > { %p21_p6 = scmp.ge.s32.totalorder %s24_s16, 4   ;;  %s5319_s14 = sld [smem:[#allocation6_spill]] }
 0x45f   : > { %s5320_s15 = sld [smem:[#allocation7_spill]]  ;;  %s5321_s11 = smov %s3744_s12 }
 0x460   : > { %s5322_s12 = smov %s3748_s13  ;;  %23 = sbr.rel (!%p21_p6) target bundleno = 7 (0x7), region = 105 }
 0x463   : > { %s5323_s13 = smov %s5318_s20 }
 0x467   :  { %2731 = vsyncpa [#allocation4], 1 }
 0x468   :  { %2733 = vsyncpa [#allocation4 + $0x1], 1 }

</bundles_post_ra>
